<compile_context>
chip_gen: v7x
topology: tpu7x:2x2x1
jax: 0.10.0
libtpu: 0.0.40
codegen_flags: <defaults>
</compile_context>

<pallas_src>
import jax
import jax.numpy as jnp
from jax import lax
from jax.experimental import pallas as pl
from jax.experimental.pallas import tpu as pltpu

# ---- model hyper-parameters (small, consistent with the module's forward) ----
IN_CH = 8            # in_channels
DIM = 32             # model dim
DEPTH = 2            # transformer depth
HEADS = 4
MLP_DIM = 16
NUM_CLASSES = 16
HD = DIM // HEADS    # per-head dim
LN_EPS = 1e-5        # nn.LayerNorm default
SCALE = DIM ** (-0.5)  # PyTorch source: Attention.scale = dim ** -0.5 (model dim, verified)
OUT_PAD = 128        # lane-dense padded logits width (host slices back to NUM_CLASSES)
VEC_W = 128          # lane width of the packed bias / gamma / beta table

# ---- rows of the packed vector table ----
ROW_EMB_B = 0
ROW_CLS = 1
ROW_HEAD_B = 2
ROWS_FIXED = 3
ROWS_PER_LAYER = 8   # ln1_g, ln1_b, bqkv, bo, ln2_g, ln2_b, b1, b2
N_VEC_ROWS = ROWS_FIXED + DEPTH * ROWS_PER_LAYER

_INV_SQRT2 = 0.7071067811865476


# ----------------------------- in-kernel helpers ------------------------------
def _erf(z):
    # Abramowitz & Stegun 7.1.26 (|err| < 1.5e-7) — matches torch's exact-erf GELU to
    # fp32 tolerance and lowers to plain VPU/EUP ops on every TPU generation.
    a1, a2, a3, a4, a5 = 0.254829592, -0.284496736, 1.421413741, -1.453152027, 1.061405429
    p = 0.3275911
    s = jnp.where(z >= 0.0, 1.0, -1.0)
    az = jnp.abs(z)
    t = 1.0 / (1.0 + p * az)
    poly = t * (a1 + t * (a2 + t * (a3 + t * (a4 + t * a5))))
    return s * (1.0 - poly * jnp.exp(-az * az))


def _gelu_exact(x):
    return 0.5 * x * (1.0 + _erf(x * _INV_SQRT2))


def _layernorm(x, gamma, beta):
    mu = jnp.mean(x, axis=-1, keepdims=True)
    var = jnp.mean(jnp.square(x - mu), axis=-1, keepdims=True)
    return (x - mu) * lax.rsqrt(var + LN_EPS) * gamma + beta


def _softmax(x):
    # exact division (not approx reciprocal) for parity with torch.softmax
    x = x - jnp.max(x, axis=-1, keepdims=True)
    e = jnp.exp(x)
    return e / jnp.sum(e, axis=-1, keepdims=True)


# --------------------------------- fused kernel --------------------------------
def fused_vit_kernel(x_ref, vecs_ref, emb_w_ref, wqkv_ref, wo_ref, w1_ref, w2_ref,
                     head_w_ref, o_ref):
    """Full forward for one batch element:
       embed -> prepend cls -> DEPTH x (x += Attn(LN(x)); x += MLP(LN(x))) -> head."""
    f32 = jnp.float32
    b = pl.program_id(0)

    def vec(r, width):
        # (1, width) static slice of the packed vector table
        return vecs_ref[r:r + 1, 0:width]

    # embedding Linear(in_channels, dim); x is VMEM-resident, indexed per grid step
    xp = x_ref[b]                                                        # (HW, C)
    xe = jnp.dot(xp, emb_w_ref[...], preferred_element_type=f32) + vec(ROW_EMB_B, DIM)

    # prepend cls token -> (SEQ, DIM)
    x = jnp.concatenate([vec(ROW_CLS, DIM), xe], axis=0)

    for l in range(DEPTH):                                               # static unroll
        r0 = ROWS_FIXED + l * ROWS_PER_LAYER

        # ---- Residual(LayerNormalize(Attention)) ----
        xn = _layernorm(x, vec(r0 + 0, DIM), vec(r0 + 1, DIM))
        # single fused QKV matmul: (SEQ, DIM) @ (DIM, 3*DIM); no head broadcast
        qkv = jnp.dot(xn, wqkv_ref[l], preferred_element_type=f32) + vec(r0 + 2, 3 * DIM)

        head_outs = []
        for h in range(HEADS):                       # per-head static lane slices
            q_h = qkv[:, h * HD:(h + 1) * HD]                            # (SEQ, HD)
            k_h = qkv[:, DIM + h * HD:DIM + (h + 1) * HD]
            v_h = qkv[:, 2 * DIM + h * HD:2 * DIM + (h + 1) * HD]
            dots = lax.dot_general(q_h, k_h, (((1,), (1,)), ((), ())),
                                   preferred_element_type=f32) * SCALE   # (SEQ, SEQ)
            attn = _softmax(dots)
            head_outs.append(jnp.dot(attn, v_h, preferred_element_type=f32))  # (SEQ, HD)
        out_cat = jnp.concatenate(head_outs, axis=-1)                    # (SEQ, DIM)
        x = x + jnp.dot(out_cat, wo_ref[l], preferred_element_type=f32) + vec(r0 + 3, DIM)

        # ---- Residual(LayerNormalize(MLP_Block)) ----
        xn2 = _layernorm(x, vec(r0 + 4, DIM), vec(r0 + 5, DIM))
        hid = jnp.dot(xn2, w1_ref[l], preferred_element_type=f32) + vec(r0 + 6, MLP_DIM)
        hid = _gelu_exact(hid)
        x = x + jnp.dot(hid, w2_ref[l], preferred_element_type=f32) + vec(r0 + 7, DIM)

    # classification head on cls token; head weights/bias are lane-padded to 128 so the
    # only HBM store of the kernel is a lane-dense (1,1,128) slab.
    logits = jnp.dot(x[0:1, :], head_w_ref[...], preferred_element_type=f32) \
        + vecs_ref[ROW_HEAD_B:ROW_HEAD_B + 1, :]
    o_ref[...] = logits.reshape(1, 1, OUT_PAD)


# ------------------------------ full forward ----------------------------------
def posfree_vit_forward(x, params):
    # x: (B, 1, C, H, W)  ->  squeeze(1), rearrange 'b c h w -> b (h w) c' (host side)
    b = x.shape[0]
    x = x[:, 0]                                                 # (B, C, H, W)
    c, hgt, wdt = x.shape[1], x.shape[2], x.shape[3]
    hw = hgt * wdt
    xp = jnp.transpose(x, (0, 2, 3, 1)).reshape(b, hw, c)       # (B, HW, C)

    args = [xp, params["vecs"], params["emb_w"], params["wqkv"], params["wo"],
            params["w1"], params["w2"], params["head_w"]]

    def resident(a):
        # whole array VMEM-resident, constant block index => DMA'd once, never refetched
        return pl.BlockSpec(a.shape, lambda i, nd=a.ndim: (0,) * nd)

    out = pl.pallas_call(
        fused_vit_kernel,
        grid=(b,),   # one batch element per step; B=2 keeps both v7x TCs busy.
        out_shape=jax.ShapeDtypeStruct((b, 1, OUT_PAD), jnp.float32),
        in_specs=[resident(a) for a in args],
        out_specs=pl.BlockSpec((1, 1, OUT_PAD), lambda i: (i, 0, 0)),
        compiler_params=pltpu.CompilerParams(dimension_semantics=("parallel",)),
    )(*args)
    return out[:, 0, :NUM_CLASSES]


# ----------------------------- parameter init ---------------------------------
def make_params(key):
    kiter = iter(jax.random.split(key, 32))

    def xavier(shape):  # same bound as torch xavier_uniform_ on the (out,in) matrix
        limit = (6.0 / (shape[0] + shape[1])) ** 0.5
        return jax.random.uniform(next(kiter), shape, jnp.float32, -limit, limit)

    def lin(shape, fan_in):  # torch default Linear init bound 1/sqrt(fan_in)
        bound = 1.0 / (fan_in ** 0.5)
        return jax.random.uniform(next(kiter), shape, jnp.float32, -bound, bound)

    def row(v):
        v = jnp.asarray(v, jnp.float32).reshape(-1)
        return jnp.pad(v, (0, VEC_W - v.shape[0]))

    emb_w = xavier((IN_CH, DIM))
    emb_b = jax.random.normal(next(kiter), (DIM,), jnp.float32) * 1e-6
    cls = jnp.zeros((DIM,), jnp.float32)
    head_w = jnp.pad(xavier((DIM, NUM_CLASSES)), ((0, 0), (0, OUT_PAD - NUM_CLASSES)))
    head_b = jax.random.normal(next(kiter), (NUM_CLASSES,), jnp.float32) * 1e-6

    vec_rows = [row(emb_b), row(cls), row(head_b)]
    wqkv, wo, w1, w2 = [], [], [], []
    for _ in range(DEPTH):
        # to_qkv stored as torch weight.T: (DIM, 3*DIM), [q | k | v] along the out axis
        wqkv.append(lin((DIM, 3 * DIM), DIM))
        bqkv = lin((3 * DIM,), DIM)
        wo.append(lin((DIM, DIM), DIM))            # attention out-proj weight.T
        bo = lin((DIM,), DIM)
        w1.append(lin((DIM, MLP_DIM), DIM))
        b1 = lin((MLP_DIM,), DIM)
        w2.append(lin((MLP_DIM, DIM), MLP_DIM))
        b2 = lin((DIM,), MLP_DIM)
        vec_rows += [row(jnp.ones((DIM,))), row(jnp.zeros((DIM,))),      # ln1 gamma/beta
                     row(bqkv), row(bo),
                     row(jnp.ones((DIM,))), row(jnp.zeros((DIM,))),      # ln2 gamma/beta
                     row(b1), row(b2)]

    vecs = jnp.stack(vec_rows)                      # (N_VEC_ROWS, 128)
    assert vecs.shape == (N_VEC_ROWS, VEC_W)

    return {
        "vecs": vecs,
        "emb_w": emb_w,                             # (IN_CH, DIM)
        "wqkv": jnp.stack(wqkv),                    # (DEPTH, DIM, 3*DIM)
        "wo": jnp.stack(wo),                        # (DEPTH, DIM, DIM)
        "w1": jnp.stack(w1),                        # (DEPTH, DIM, MLP_DIM)
        "w2": jnp.stack(w2),                        # (DEPTH, MLP_DIM, DIM)
        "head_w": head_w,                           # (DIM, OUT_PAD)
    }


# ----------------------------------- main --------------------------------------
if __name__ == "__main__":
    key = jax.random.PRNGKey(0)
    pkey, xkey = jax.random.split(key)

    B, H, W = 2, 4, 4   # seq = 4*4 + 1 = 17
    params = make_params(pkey)
    x = jax.random.normal(xkey, (B, 1, IN_CH, H, W), jnp.float32)

    fwd = jax.jit(posfree_vit_forward)
    out = jax.block_until_ready(fwd(x, params))

    assert out.shape == (B, NUM_CLASSES), out.shape
    assert bool(jnp.all(jnp.isfinite(out)))
    print("KERNEL_OK")
</pallas_src>

<mosaic_0001>
module attributes {stable_mosaic.version = 11 : i64} {
  func.func @fused_vit_kernel(%arg0: i32, %arg1: memref<2x16x8xf32, #tpu.memory_space<vmem>>, %arg2: memref<19x128xf32, #tpu.memory_space<vmem>>, %arg3: memref<8x32xf32, #tpu.memory_space<vmem>>, %arg4: memref<2x32x96xf32, #tpu.memory_space<vmem>>, %arg5: memref<2x32x32xf32, #tpu.memory_space<vmem>>, %arg6: memref<2x32x16xf32, #tpu.memory_space<vmem>>, %arg7: memref<2x16x32xf32, #tpu.memory_space<vmem>>, %arg8: memref<32x128xf32, #tpu.memory_space<vmem>>, %arg9: memref<1x1x128xf32, #tpu.memory_space<vmem>>) attributes {dimension_semantics = [#tpu.dimension_semantics<parallel>], iteration_bounds = array<i64: 2>, scalar_prefetch = 0 : i64, scratch_operands = 0 : i64, tpu.core_type = #tpu.core_type<tc>, window_params = [{pipeline_mode = #tpu.pipeline_mode<synchronous>, transform_indices = @transform_0, window_bounds = array<i64: 2, 16, 8>}, {pipeline_mode = #tpu.pipeline_mode<synchronous>, transform_indices = @transform_1, window_bounds = array<i64: 19, 128>}, {pipeline_mode = #tpu.pipeline_mode<synchronous>, transform_indices = @transform_2, window_bounds = array<i64: 8, 32>}, {pipeline_mode = #tpu.pipeline_mode<synchronous>, transform_indices = @transform_3, window_bounds = array<i64: 2, 32, 96>}, {pipeline_mode = #tpu.pipeline_mode<synchronous>, transform_indices = @transform_4, window_bounds = array<i64: 2, 32, 32>}, {pipeline_mode = #tpu.pipeline_mode<synchronous>, transform_indices = @transform_5, window_bounds = array<i64: 2, 32, 16>}, {pipeline_mode = #tpu.pipeline_mode<synchronous>, transform_indices = @transform_6, window_bounds = array<i64: 2, 16, 32>}, {pipeline_mode = #tpu.pipeline_mode<synchronous>, transform_indices = @transform_7, window_bounds = array<i64: 32, 128>}, {transform_indices = @transform_8, window_bounds = array<i64: 1, 1, 128>}]} {
    %0 = arith.index_cast %arg0 : i32 to index
    %c0 = arith.constant 0 : index
    %c0_0 = arith.constant 0 : index
    %1 = vector.load %arg1[%0, %c0, %c0_0] : memref<2x16x8xf32, #tpu.memory_space<vmem>>, vector<1x16x8xf32>
    %2 = vector.shape_cast %1 : vector<1x16x8xf32> to vector<16x8xf32>
    %c0_1 = arith.constant 0 : index
    %c0_2 = arith.constant 0 : index
    %3 = vector.load %arg3[%c0_1, %c0_2] : memref<8x32xf32, #tpu.memory_space<vmem>>, vector<8x32xf32>
    %cst = arith.constant dense<0.000000e+00> : vector<16x32xf32>
    %4 = tpu.matmul %2, %3, %cst {dimension_numbers = #tpu.dot_dimension_numbers<[1], [0], [0], [1], [0, 0, 1, 1], [], []>} : vector<16x8xf32>, vector<8x32xf32>, vector<16x32xf32> -> vector<16x32xf32>
    %c0_3 = arith.constant 0 : index
    %c0_4 = arith.constant 0 : index
    %5 = vector.load %arg2[%c0_3, %c0_4] : memref<19x128xf32, #tpu.memory_space<vmem>>, vector<1x32xf32>
    %6 = vector.broadcast %5 : vector<1x32xf32> to vector<16x32xf32>
    %7 = arith.addf %4, %6 : vector<16x32xf32>
    %c1 = arith.constant 1 : index
    %c0_5 = arith.constant 0 : index
    %8 = vector.load %arg2[%c1, %c0_5] : memref<19x128xf32, #tpu.memory_space<vmem>>, vector<1x32xf32>
    %9 = tpu.concatenate %8, %7 in 0 : vector<1x32xf32>, vector<16x32xf32> -> vector<17x32xf32>
    %c3 = arith.constant 3 : index
    %c0_6 = arith.constant 0 : index
    %10 = vector.load %arg2[%c3, %c0_6] : memref<19x128xf32, #tpu.memory_space<vmem>>, vector<1x32xf32>
    %c4 = arith.constant 4 : index
    %c0_7 = arith.constant 0 : index
    %11 = vector.load %arg2[%c4, %c0_7] : memref<19x128xf32, #tpu.memory_space<vmem>>, vector<1x32xf32>
    %cst_8 = arith.constant dense<0.000000e+00> : vector<17xf32>
    %12 = vector.multi_reduction <add>, %9, %cst_8 [1] : vector<17x32xf32> to vector<17xf32>
    %13 = vector.shape_cast %12 : vector<17xf32> to vector<17x1xf32>
    %cst_9 = arith.constant 3.200000e+01 : f32
    %14 = vector.broadcast %cst_9 : f32 to vector<17x1xf32>
    %15 = arith.divf %13, %14 : vector<17x1xf32>
    %16 = vector.broadcast %15 : vector<17x1xf32> to vector<17x32xf32>
    %17 = arith.subf %9, %16 : vector<17x32xf32>
    %18 = arith.mulf %17, %17 : vector<17x32xf32>
    %cst_10 = arith.constant dense<0.000000e+00> : vector<17xf32>
    %19 = vector.multi_reduction <add>, %18, %cst_10 [1] : vector<17x32xf32> to vector<17xf32>
    %20 = vector.shape_cast %19 : vector<17xf32> to vector<17x1xf32>
    %cst_11 = arith.constant 3.200000e+01 : f32
    %21 = vector.broadcast %cst_11 : f32 to vector<17x1xf32>
    %22 = arith.divf %20, %21 : vector<17x1xf32>
    %23 = vector.broadcast %15 : vector<17x1xf32> to vector<17x32xf32>
    %24 = arith.subf %9, %23 : vector<17x32xf32>
    %cst_12 = arith.constant 9.99999974E-6 : f32
    %25 = vector.broadcast %cst_12 : f32 to vector<17x1xf32>
    %26 = arith.addf %22, %25 : vector<17x1xf32>
    %27 = math.rsqrt %26 : vector<17x1xf32>
    %28 = vector.broadcast %27 : vector<17x1xf32> to vector<17x32xf32>
    %29 = arith.mulf %24, %28 : vector<17x32xf32>
    %30 = vector.broadcast %10 : vector<1x32xf32> to vector<17x32xf32>
    %31 = arith.mulf %29, %30 : vector<17x32xf32>
    %32 = vector.broadcast %11 : vector<1x32xf32> to vector<17x32xf32>
    %33 = arith.addf %31, %32 : vector<17x32xf32>
    %c0_13 = arith.constant 0 : index
    %c0_14 = arith.constant 0 : index
    %c0_15 = arith.constant 0 : index
    %34 = vector.load %arg4[%c0_13, %c0_14, %c0_15] : memref<2x32x96xf32, #tpu.memory_space<vmem>>, vector<1x32x96xf32>
    %35 = vector.shape_cast %34 : vector<1x32x96xf32> to vector<32x96xf32>
    %cst_16 = arith.constant dense<0.000000e+00> : vector<17x96xf32>
    %36 = tpu.matmul %33, %35, %cst_16 {dimension_numbers = #tpu.dot_dimension_numbers<[1], [0], [0], [1], [0, 0, 1, 1], [], []>} : vector<17x32xf32>, vector<32x96xf32>, vector<17x96xf32> -> vector<17x96xf32>
    %c5 = arith.constant 5 : index
    %c0_17 = arith.constant 0 : index
    %37 = vector.load %arg2[%c5, %c0_17] : memref<19x128xf32, #tpu.memory_space<vmem>>, vector<1x96xf32>
    %38 = vector.broadcast %37 : vector<1x96xf32> to vector<17x96xf32>
    %39 = arith.addf %36, %38 : vector<17x96xf32>
    %40 = vector.extract_strided_slice %39 {offsets = [0, 0], sizes = [17, 8], strides = [1, 1]} : vector<17x96xf32> to vector<17x8xf32>
    %41 = vector.extract_strided_slice %39 {offsets = [0, 32], sizes = [17, 8], strides = [1, 1]} : vector<17x96xf32> to vector<17x8xf32>
    %42 = vector.extract_strided_slice %39 {offsets = [0, 64], sizes = [17, 8], strides = [1, 1]} : vector<17x96xf32> to vector<17x8xf32>
    %cst_18 = arith.constant dense<0.000000e+00> : vector<17x17xf32>
    %43 = tpu.matmul %40, %41, %cst_18 {dimension_numbers = #tpu.dot_dimension_numbers<[1], [1], [0], [0], [0, 0, 1, 0], [], []>} : vector<17x8xf32>, vector<17x8xf32>, vector<17x17xf32> -> vector<17x17xf32>
    %cst_19 = arith.constant 0.176776692 : f32
    %44 = vector.broadcast %cst_19 : f32 to vector<17x17xf32>
    %45 = arith.mulf %43, %44 : vector<17x17xf32>
    %cst_20 = arith.constant dense<0xFF800000> : vector<17xf32>
    %46 = vector.multi_reduction <maximumf>, %45, %cst_20 [1] : vector<17x17xf32> to vector<17xf32>
    %47 = vector.shape_cast %46 : vector<17xf32> to vector<17x1xf32>
    %48 = vector.broadcast %47 : vector<17x1xf32> to vector<17x17xf32>
    %49 = arith.subf %45, %48 : vector<17x17xf32>
    %50 = math.exp %49 : vector<17x17xf32>
    %cst_21 = arith.constant dense<0.000000e+00> : vector<17xf32>
    %51 = vector.multi_reduction <add>, %50, %cst_21 [1] : vector<17x17xf32> to vector<17xf32>
    %52 = vector.shape_cast %51 : vector<17xf32> to vector<17x1xf32>
    %53 = vector.broadcast %52 : vector<17x1xf32> to vector<17x17xf32>
    %54 = arith.divf %50, %53 : vector<17x17xf32>
    %cst_22 = arith.constant dense<0.000000e+00> : vector<17x8xf32>
    %55 = tpu.matmul %54, %42, %cst_22 {dimension_numbers = #tpu.dot_dimension_numbers<[1], [0], [0], [1], [0, 0, 1, 1], [], []>} : vector<17x17xf32>, vector<17x8xf32>, vector<17x8xf32> -> vector<17x8xf32>
    %56 = vector.extract_strided_slice %39 {offsets = [0, 8], sizes = [17, 8], strides = [1, 1]} : vector<17x96xf32> to vector<17x8xf32>
    %57 = vector.extract_strided_slice %39 {offsets = [0, 40], sizes = [17, 8], strides = [1, 1]} : vector<17x96xf32> to vector<17x8xf32>
    %58 = vector.extract_strided_slice %39 {offsets = [0, 72], sizes = [17, 8], strides = [1, 1]} : vector<17x96xf32> to vector<17x8xf32>
    %cst_23 = arith.constant dense<0.000000e+00> : vector<17x17xf32>
    %59 = tpu.matmul %56, %57, %cst_23 {dimension_numbers = #tpu.dot_dimension_numbers<[1], [1], [0], [0], [0, 0, 1, 0], [], []>} : vector<17x8xf32>, vector<17x8xf32>, vector<17x17xf32> -> vector<17x17xf32>
    %cst_24 = arith.constant 0.176776692 : f32
    %60 = vector.broadcast %cst_24 : f32 to vector<17x17xf32>
    %61 = arith.mulf %59, %60 : vector<17x17xf32>
    %cst_25 = arith.constant dense<0xFF800000> : vector<17xf32>
    %62 = vector.multi_reduction <maximumf>, %61, %cst_25 [1] : vector<17x17xf32> to vector<17xf32>
    %63 = vector.shape_cast %62 : vector<17xf32> to vector<17x1xf32>
    %64 = vector.broadcast %63 : vector<17x1xf32> to vector<17x17xf32>
    %65 = arith.subf %61, %64 : vector<17x17xf32>
    %66 = math.exp %65 : vector<17x17xf32>
    %cst_26 = arith.constant dense<0.000000e+00> : vector<17xf32>
    %67 = vector.multi_reduction <add>, %66, %cst_26 [1] : vector<17x17xf32> to vector<17xf32>
    %68 = vector.shape_cast %67 : vector<17xf32> to vector<17x1xf32>
    %69 = vector.broadcast %68 : vector<17x1xf32> to vector<17x17xf32>
    %70 = arith.divf %66, %69 : vector<17x17xf32>
    %cst_27 = arith.constant dense<0.000000e+00> : vector<17x8xf32>
    %71 = tpu.matmul %70, %58, %cst_27 {dimension_numbers = #tpu.dot_dimension_numbers<[1], [0], [0], [1], [0, 0, 1, 1], [], []>} : vector<17x17xf32>, vector<17x8xf32>, vector<17x8xf32> -> vector<17x8xf32>
    %72 = vector.extract_strided_slice %39 {offsets = [0, 16], sizes = [17, 8], strides = [1, 1]} : vector<17x96xf32> to vector<17x8xf32>
    %73 = vector.extract_strided_slice %39 {offsets = [0, 48], sizes = [17, 8], strides = [1, 1]} : vector<17x96xf32> to vector<17x8xf32>
    %74 = vector.extract_strided_slice %39 {offsets = [0, 80], sizes = [17, 8], strides = [1, 1]} : vector<17x96xf32> to vector<17x8xf32>
    %cst_28 = arith.constant dense<0.000000e+00> : vector<17x17xf32>
    %75 = tpu.matmul %72, %73, %cst_28 {dimension_numbers = #tpu.dot_dimension_numbers<[1], [1], [0], [0], [0, 0, 1, 0], [], []>} : vector<17x8xf32>, vector<17x8xf32>, vector<17x17xf32> -> vector<17x17xf32>
    %cst_29 = arith.constant 0.176776692 : f32
    %76 = vector.broadcast %cst_29 : f32 to vector<17x17xf32>
    %77 = arith.mulf %75, %76 : vector<17x17xf32>
    %cst_30 = arith.constant dense<0xFF800000> : vector<17xf32>
    %78 = vector.multi_reduction <maximumf>, %77, %cst_30 [1] : vector<17x17xf32> to vector<17xf32>
    %79 = vector.shape_cast %78 : vector<17xf32> to vector<17x1xf32>
    %80 = vector.broadcast %79 : vector<17x1xf32> to vector<17x17xf32>
    %81 = arith.subf %77, %80 : vector<17x17xf32>
    %82 = math.exp %81 : vector<17x17xf32>
    %cst_31 = arith.constant dense<0.000000e+00> : vector<17xf32>
    %83 = vector.multi_reduction <add>, %82, %cst_31 [1] : vector<17x17xf32> to vector<17xf32>
    %84 = vector.shape_cast %83 : vector<17xf32> to vector<17x1xf32>
    %85 = vector.broadcast %84 : vector<17x1xf32> to vector<17x17xf32>
    %86 = arith.divf %82, %85 : vector<17x17xf32>
    %cst_32 = arith.constant dense<0.000000e+00> : vector<17x8xf32>
    %87 = tpu.matmul %86, %74, %cst_32 {dimension_numbers = #tpu.dot_dimension_numbers<[1], [0], [0], [1], [0, 0, 1, 1], [], []>} : vector<17x17xf32>, vector<17x8xf32>, vector<17x8xf32> -> vector<17x8xf32>
    %88 = vector.extract_strided_slice %39 {offsets = [0, 24], sizes = [17, 8], strides = [1, 1]} : vector<17x96xf32> to vector<17x8xf32>
    %89 = vector.extract_strided_slice %39 {offsets = [0, 56], sizes = [17, 8], strides = [1, 1]} : vector<17x96xf32> to vector<17x8xf32>
    %90 = vector.extract_strided_slice %39 {offsets = [0, 88], sizes = [17, 8], strides = [1, 1]} : vector<17x96xf32> to vector<17x8xf32>
    %cst_33 = arith.constant dense<0.000000e+00> : vector<17x17xf32>
    %91 = tpu.matmul %88, %89, %cst_33 {dimension_numbers = #tpu.dot_dimension_numbers<[1], [1], [0], [0], [0, 0, 1, 0], [], []>} : vector<17x8xf32>, vector<17x8xf32>, vector<17x17xf32> -> vector<17x17xf32>
    %cst_34 = arith.constant 0.176776692 : f32
    %92 = vector.broadcast %cst_34 : f32 to vector<17x17xf32>
    %93 = arith.mulf %91, %92 : vector<17x17xf32>
    %cst_35 = arith.constant dense<0xFF800000> : vector<17xf32>
    %94 = vector.multi_reduction <maximumf>, %93, %cst_35 [1] : vector<17x17xf32> to vector<17xf32>
    %95 = vector.shape_cast %94 : vector<17xf32> to vector<17x1xf32>
    %96 = vector.broadcast %95 : vector<17x1xf32> to vector<17x17xf32>
    %97 = arith.subf %93, %96 : vector<17x17xf32>
    %98 = math.exp %97 : vector<17x17xf32>
    %cst_36 = arith.constant dense<0.000000e+00> : vector<17xf32>
    %99 = vector.multi_reduction <add>, %98, %cst_36 [1] : vector<17x17xf32> to vector<17xf32>
    %100 = vector.shape_cast %99 : vector<17xf32> to vector<17x1xf32>
    %101 = vector.broadcast %100 : vector<17x1xf32> to vector<17x17xf32>
    %102 = arith.divf %98, %101 : vector<17x17xf32>
    %cst_37 = arith.constant dense<0.000000e+00> : vector<17x8xf32>
    %103 = tpu.matmul %102, %90, %cst_37 {dimension_numbers = #tpu.dot_dimension_numbers<[1], [0], [0], [1], [0, 0, 1, 1], [], []>} : vector<17x17xf32>, vector<17x8xf32>, vector<17x8xf32> -> vector<17x8xf32>
    %104 = tpu.concatenate %55, %71, %87, %103 in 1 : vector<17x8xf32>, vector<17x8xf32>, vector<17x8xf32>, vector<17x8xf32> -> vector<17x32xf32>
    %c0_38 = arith.constant 0 : index
    %c0_39 = arith.constant 0 : index
    %c0_40 = arith.constant 0 : index
    %105 = vector.load %arg5[%c0_38, %c0_39, %c0_40] : memref<2x32x32xf32, #tpu.memory_space<vmem>>, vector<1x32x32xf32>
    %106 = vector.shape_cast %105 : vector<1x32x32xf32> to vector<32x32xf32>
    %cst_41 = arith.constant dense<0.000000e+00> : vector<17x32xf32>
    %107 = tpu.matmul %104, %106, %cst_41 {dimension_numbers = #tpu.dot_dimension_numbers<[1], [0], [0], [1], [0, 0, 1, 1], [], []>} : vector<17x32xf32>, vector<32x32xf32>, vector<17x32xf32> -> vector<17x32xf32>
    %108 = arith.addf %9, %107 : vector<17x32xf32>
    %c6 = arith.constant 6 : index
    %c0_42 = arith.constant 0 : index
    %109 = vector.load %arg2[%c6, %c0_42] : memref<19x128xf32, #tpu.memory_space<vmem>>, vector<1x32xf32>
    %110 = vector.broadcast %109 : vector<1x32xf32> to vector<17x32xf32>
    %111 = arith.addf %108, %110 : vector<17x32xf32>
    %c7 = arith.constant 7 : index
    %c0_43 = arith.constant 0 : index
    %112 = vector.load %arg2[%c7, %c0_43] : memref<19x128xf32, #tpu.memory_space<vmem>>, vector<1x32xf32>
    %c8 = arith.constant 8 : index
    %c0_44 = arith.constant 0 : index
    %113 = vector.load %arg2[%c8, %c0_44] : memref<19x128xf32, #tpu.memory_space<vmem>>, vector<1x32xf32>
    %cst_45 = arith.constant dense<0.000000e+00> : vector<17xf32>
    %114 = vector.multi_reduction <add>, %111, %cst_45 [1] : vector<17x32xf32> to vector<17xf32>
    %115 = vector.shape_cast %114 : vector<17xf32> to vector<17x1xf32>
    %cst_46 = arith.constant 3.200000e+01 : f32
    %116 = vector.broadcast %cst_46 : f32 to vector<17x1xf32>
    %117 = arith.divf %115, %116 : vector<17x1xf32>
    %118 = vector.broadcast %117 : vector<17x1xf32> to vector<17x32xf32>
    %119 = arith.subf %111, %118 : vector<17x32xf32>
    %120 = arith.mulf %119, %119 : vector<17x32xf32>
    %cst_47 = arith.constant dense<0.000000e+00> : vector<17xf32>
    %121 = vector.multi_reduction <add>, %120, %cst_47 [1] : vector<17x32xf32> to vector<17xf32>
    %122 = vector.shape_cast %121 : vector<17xf32> to vector<17x1xf32>
    %cst_48 = arith.constant 3.200000e+01 : f32
    %123 = vector.broadcast %cst_48 : f32 to vector<17x1xf32>
    %124 = arith.divf %122, %123 : vector<17x1xf32>
    %125 = vector.broadcast %117 : vector<17x1xf32> to vector<17x32xf32>
    %126 = arith.subf %111, %125 : vector<17x32xf32>
    %cst_49 = arith.constant 9.99999974E-6 : f32
    %127 = vector.broadcast %cst_49 : f32 to vector<17x1xf32>
    %128 = arith.addf %124, %127 : vector<17x1xf32>
    %129 = math.rsqrt %128 : vector<17x1xf32>
    %130 = vector.broadcast %129 : vector<17x1xf32> to vector<17x32xf32>
    %131 = arith.mulf %126, %130 : vector<17x32xf32>
    %132 = vector.broadcast %112 : vector<1x32xf32> to vector<17x32xf32>
    %133 = arith.mulf %131, %132 : vector<17x32xf32>
    %134 = vector.broadcast %113 : vector<1x32xf32> to vector<17x32xf32>
    %135 = arith.addf %133, %134 : vector<17x32xf32>
    %c0_50 = arith.constant 0 : index
    %c0_51 = arith.constant 0 : index
    %c0_52 = arith.constant 0 : index
    %136 = vector.load %arg6[%c0_50, %c0_51, %c0_52] : memref<2x32x16xf32, #tpu.memory_space<vmem>>, vector<1x32x16xf32>
    %137 = vector.shape_cast %136 : vector<1x32x16xf32> to vector<32x16xf32>
    %cst_53 = arith.constant dense<0.000000e+00> : vector<17x16xf32>
    %138 = tpu.matmul %135, %137, %cst_53 {dimension_numbers = #tpu.dot_dimension_numbers<[1], [0], [0], [1], [0, 0, 1, 1], [], []>} : vector<17x32xf32>, vector<32x16xf32>, vector<17x16xf32> -> vector<17x16xf32>
    %c9 = arith.constant 9 : index
    %c0_54 = arith.constant 0 : index
    %139 = vector.load %arg2[%c9, %c0_54] : memref<19x128xf32, #tpu.memory_space<vmem>>, vector<1x16xf32>
    %140 = vector.broadcast %139 : vector<1x16xf32> to vector<17x16xf32>
    %141 = arith.addf %138, %140 : vector<17x16xf32>
    %cst_55 = arith.constant 5.000000e-01 : f32
    %142 = vector.broadcast %cst_55 : f32 to vector<17x16xf32>
    %143 = arith.mulf %142, %141 : vector<17x16xf32>
    %cst_56 = arith.constant 0.707106769 : f32
    %144 = vector.broadcast %cst_56 : f32 to vector<17x16xf32>
    %145 = arith.mulf %141, %144 : vector<17x16xf32>
    %cst_57 = arith.constant 0.000000e+00 : f32
    %146 = vector.broadcast %cst_57 : f32 to vector<17x16xf32>
    %147 = arith.cmpf oge, %145, %146 : vector<17x16xf32>
    %cst_58 = arith.constant 1.000000e+00 : f32
    %cst_59 = arith.constant -1.000000e+00 : f32
    %148 = vector.broadcast %cst_58 : f32 to vector<17x16xf32>
    %149 = vector.broadcast %cst_59 : f32 to vector<17x16xf32>
    %150 = arith.select %147, %148, %149 : vector<17x16xi1>, vector<17x16xf32>
    %151 = math.absf %145 : vector<17x16xf32>
    %cst_60 = arith.constant 0.327591091 : f32
    %152 = vector.broadcast %cst_60 : f32 to vector<17x16xf32>
    %153 = arith.mulf %152, %151 : vector<17x16xf32>
    %cst_61 = arith.constant 1.000000e+00 : f32
    %154 = vector.broadcast %cst_61 : f32 to vector<17x16xf32>
    %155 = arith.addf %154, %153 : vector<17x16xf32>
    %cst_62 = arith.constant 1.000000e+00 : f32
    %156 = vector.broadcast %cst_62 : f32 to vector<17x16xf32>
    %157 = arith.divf %156, %155 : vector<17x16xf32>
    %cst_63 = arith.constant 1.06140542 : f32
    %158 = vector.broadcast %cst_63 : f32 to vector<17x16xf32>
    %159 = arith.mulf %157, %158 : vector<17x16xf32>
    %cst_64 = arith.constant -1.45315206 : f32
    %160 = vector.broadcast %cst_64 : f32 to vector<17x16xf32>
    %161 = arith.addf %160, %159 : vector<17x16xf32>
    %162 = arith.mulf %157, %161 : vector<17x16xf32>
    %cst_65 = arith.constant 1.42141378 : f32
    %163 = vector.broadcast %cst_65 : f32 to vector<17x16xf32>
    %164 = arith.addf %163, %162 : vector<17x16xf32>
    %165 = arith.mulf %157, %164 : vector<17x16xf32>
    %cst_66 = arith.constant -0.284496725 : f32
    %166 = vector.broadcast %cst_66 : f32 to vector<17x16xf32>
    %167 = arith.addf %166, %165 : vector<17x16xf32>
    %168 = arith.mulf %157, %167 : vector<17x16xf32>
    %cst_67 = arith.constant 0.254829586 : f32
    %169 = vector.broadcast %cst_67 : f32 to vector<17x16xf32>
    %170 = arith.addf %169, %168 : vector<17x16xf32>
    %171 = arith.mulf %157, %170 : vector<17x16xf32>
    %cst_68 = arith.constant 0.000000e+00 : f32
    %172 = vector.broadcast %cst_68 : f32 to vector<17x16xf32>
    %173 = arith.subf %172, %151 : vector<17x16xf32>
    %174 = arith.mulf %173, %151 : vector<17x16xf32>
    %175 = math.exp %174 : vector<17x16xf32>
    %176 = arith.mulf %171, %175 : vector<17x16xf32>
    %cst_69 = arith.constant 1.000000e+00 : f32
    %177 = vector.broadcast %cst_69 : f32 to vector<17x16xf32>
    %178 = arith.subf %177, %176 : vector<17x16xf32>
    %179 = arith.mulf %150, %178 : vector<17x16xf32>
    %cst_70 = arith.constant 1.000000e+00 : f32
    %180 = vector.broadcast %cst_70 : f32 to vector<17x16xf32>
    %181 = arith.addf %180, %179 : vector<17x16xf32>
    %182 = arith.mulf %143, %181 : vector<17x16xf32>
    %c0_71 = arith.constant 0 : index
    %c0_72 = arith.constant 0 : index
    %c0_73 = arith.constant 0 : index
    %183 = vector.load %arg7[%c0_71, %c0_72, %c0_73] : memref<2x16x32xf32, #tpu.memory_space<vmem>>, vector<1x16x32xf32>
    %184 = vector.shape_cast %183 : vector<1x16x32xf32> to vector<16x32xf32>
    %cst_74 = arith.constant dense<0.000000e+00> : vector<17x32xf32>
    %185 = tpu.matmul %182, %184, %cst_74 {dimension_numbers = #tpu.dot_dimension_numbers<[1], [0], [0], [1], [0, 0, 1, 1], [], []>} : vector<17x16xf32>, vector<16x32xf32>, vector<17x32xf32> -> vector<17x32xf32>
    %186 = arith.addf %111, %185 : vector<17x32xf32>
    %c10 = arith.constant 10 : index
    %c0_75 = arith.constant 0 : index
    %187 = vector.load %arg2[%c10, %c0_75] : memref<19x128xf32, #tpu.memory_space<vmem>>, vector<1x32xf32>
    %188 = vector.broadcast %187 : vector<1x32xf32> to vector<17x32xf32>
    %189 = arith.addf %186, %188 : vector<17x32xf32>
    %c11 = arith.constant 11 : index
    %c0_76 = arith.constant 0 : index
    %190 = vector.load %arg2[%c11, %c0_76] : memref<19x128xf32, #tpu.memory_space<vmem>>, vector<1x32xf32>
    %c12 = arith.constant 12 : index
    %c0_77 = arith.constant 0 : index
    %191 = vector.load %arg2[%c12, %c0_77] : memref<19x128xf32, #tpu.memory_space<vmem>>, vector<1x32xf32>
    %cst_78 = arith.constant dense<0.000000e+00> : vector<17xf32>
    %192 = vector.multi_reduction <add>, %189, %cst_78 [1] : vector<17x32xf32> to vector<17xf32>
    %193 = vector.shape_cast %192 : vector<17xf32> to vector<17x1xf32>
    %cst_79 = arith.constant 3.200000e+01 : f32
    %194 = vector.broadcast %cst_79 : f32 to vector<17x1xf32>
    %195 = arith.divf %193, %194 : vector<17x1xf32>
    %196 = vector.broadcast %195 : vector<17x1xf32> to vector<17x32xf32>
    %197 = arith.subf %189, %196 : vector<17x32xf32>
    %198 = arith.mulf %197, %197 : vector<17x32xf32>
    %cst_80 = arith.constant dense<0.000000e+00> : vector<17xf32>
    %199 = vector.multi_reduction <add>, %198, %cst_80 [1] : vector<17x32xf32> to vector<17xf32>
    %200 = vector.shape_cast %199 : vector<17xf32> to vector<17x1xf32>
    %cst_81 = arith.constant 3.200000e+01 : f32
    %201 = vector.broadcast %cst_81 : f32 to vector<17x1xf32>
    %202 = arith.divf %200, %201 : vector<17x1xf32>
    %203 = vector.broadcast %195 : vector<17x1xf32> to vector<17x32xf32>
    %204 = arith.subf %189, %203 : vector<17x32xf32>
    %cst_82 = arith.constant 9.99999974E-6 : f32
    %205 = vector.broadcast %cst_82 : f32 to vector<17x1xf32>
    %206 = arith.addf %202, %205 : vector<17x1xf32>
    %207 = math.rsqrt %206 : vector<17x1xf32>
    %208 = vector.broadcast %207 : vector<17x1xf32> to vector<17x32xf32>
    %209 = arith.mulf %204, %208 : vector<17x32xf32>
    %210 = vector.broadcast %190 : vector<1x32xf32> to vector<17x32xf32>
    %211 = arith.mulf %209, %210 : vector<17x32xf32>
    %212 = vector.broadcast %191 : vector<1x32xf32> to vector<17x32xf32>
    %213 = arith.addf %211, %212 : vector<17x32xf32>
    %c1_83 = arith.constant 1 : index
    %c0_84 = arith.constant 0 : index
    %c0_85 = arith.constant 0 : index
    %214 = vector.load %arg4[%c1_83, %c0_84, %c0_85] : memref<2x32x96xf32, #tpu.memory_space<vmem>>, vector<1x32x96xf32>
    %215 = vector.shape_cast %214 : vector<1x32x96xf32> to vector<32x96xf32>
    %cst_86 = arith.constant dense<0.000000e+00> : vector<17x96xf32>
    %216 = tpu.matmul %213, %215, %cst_86 {dimension_numbers = #tpu.dot_dimension_numbers<[1], [0], [0], [1], [0, 0, 1, 1], [], []>} : vector<17x32xf32>, vector<32x96xf32>, vector<17x96xf32> -> vector<17x96xf32>
    %c13 = arith.constant 13 : index
    %c0_87 = arith.constant 0 : index
    %217 = vector.load %arg2[%c13, %c0_87] : memref<19x128xf32, #tpu.memory_space<vmem>>, vector<1x96xf32>
    %218 = vector.broadcast %217 : vector<1x96xf32> to vector<17x96xf32>
    %219 = arith.addf %216, %218 : vector<17x96xf32>
    %220 = vector.extract_strided_slice %219 {offsets = [0, 0], sizes = [17, 8], strides = [1, 1]} : vector<17x96xf32> to vector<17x8xf32>
    %221 = vector.extract_strided_slice %219 {offsets = [0, 32], sizes = [17, 8], strides = [1, 1]} : vector<17x96xf32> to vector<17x8xf32>
    %222 = vector.extract_strided_slice %219 {offsets = [0, 64], sizes = [17, 8], strides = [1, 1]} : vector<17x96xf32> to vector<17x8xf32>
    %cst_88 = arith.constant dense<0.000000e+00> : vector<17x17xf32>
    %223 = tpu.matmul %220, %221, %cst_88 {dimension_numbers = #tpu.dot_dimension_numbers<[1], [1], [0], [0], [0, 0, 1, 0], [], []>} : vector<17x8xf32>, vector<17x8xf32>, vector<17x17xf32> -> vector<17x17xf32>
    %cst_89 = arith.constant 0.176776692 : f32
    %224 = vector.broadcast %cst_89 : f32 to vector<17x17xf32>
    %225 = arith.mulf %223, %224 : vector<17x17xf32>
    %cst_90 = arith.constant dense<0xFF800000> : vector<17xf32>
    %226 = vector.multi_reduction <maximumf>, %225, %cst_90 [1] : vector<17x17xf32> to vector<17xf32>
    %227 = vector.shape_cast %226 : vector<17xf32> to vector<17x1xf32>
    %228 = vector.broadcast %227 : vector<17x1xf32> to vector<17x17xf32>
    %229 = arith.subf %225, %228 : vector<17x17xf32>
    %230 = math.exp %229 : vector<17x17xf32>
    %cst_91 = arith.constant dense<0.000000e+00> : vector<17xf32>
    %231 = vector.multi_reduction <add>, %230, %cst_91 [1] : vector<17x17xf32> to vector<17xf32>
    %232 = vector.shape_cast %231 : vector<17xf32> to vector<17x1xf32>
    %233 = vector.broadcast %232 : vector<17x1xf32> to vector<17x17xf32>
    %234 = arith.divf %230, %233 : vector<17x17xf32>
    %cst_92 = arith.constant dense<0.000000e+00> : vector<17x8xf32>
    %235 = tpu.matmul %234, %222, %cst_92 {dimension_numbers = #tpu.dot_dimension_numbers<[1], [0], [0], [1], [0, 0, 1, 1], [], []>} : vector<17x17xf32>, vector<17x8xf32>, vector<17x8xf32> -> vector<17x8xf32>
    %236 = vector.extract_strided_slice %219 {offsets = [0, 8], sizes = [17, 8], strides = [1, 1]} : vector<17x96xf32> to vector<17x8xf32>
    %237 = vector.extract_strided_slice %219 {offsets = [0, 40], sizes = [17, 8], strides = [1, 1]} : vector<17x96xf32> to vector<17x8xf32>
    %238 = vector.extract_strided_slice %219 {offsets = [0, 72], sizes = [17, 8], strides = [1, 1]} : vector<17x96xf32> to vector<17x8xf32>
    %cst_93 = arith.constant dense<0.000000e+00> : vector<17x17xf32>
    %239 = tpu.matmul %236, %237, %cst_93 {dimension_numbers = #tpu.dot_dimension_numbers<[1], [1], [0], [0], [0, 0, 1, 0], [], []>} : vector<17x8xf32>, vector<17x8xf32>, vector<17x17xf32> -> vector<17x17xf32>
    %cst_94 = arith.constant 0.176776692 : f32
    %240 = vector.broadcast %cst_94 : f32 to vector<17x17xf32>
    %241 = arith.mulf %239, %240 : vector<17x17xf32>
    %cst_95 = arith.constant dense<0xFF800000> : vector<17xf32>
    %242 = vector.multi_reduction <maximumf>, %241, %cst_95 [1] : vector<17x17xf32> to vector<17xf32>
    %243 = vector.shape_cast %242 : vector<17xf32> to vector<17x1xf32>
    %244 = vector.broadcast %243 : vector<17x1xf32> to vector<17x17xf32>
    %245 = arith.subf %241, %244 : vector<17x17xf32>
    %246 = math.exp %245 : vector<17x17xf32>
    %cst_96 = arith.constant dense<0.000000e+00> : vector<17xf32>
    %247 = vector.multi_reduction <add>, %246, %cst_96 [1] : vector<17x17xf32> to vector<17xf32>
    %248 = vector.shape_cast %247 : vector<17xf32> to vector<17x1xf32>
    %249 = vector.broadcast %248 : vector<17x1xf32> to vector<17x17xf32>
    %250 = arith.divf %246, %249 : vector<17x17xf32>
    %cst_97 = arith.constant dense<0.000000e+00> : vector<17x8xf32>
    %251 = tpu.matmul %250, %238, %cst_97 {dimension_numbers = #tpu.dot_dimension_numbers<[1], [0], [0], [1], [0, 0, 1, 1], [], []>} : vector<17x17xf32>, vector<17x8xf32>, vector<17x8xf32> -> vector<17x8xf32>
    %252 = vector.extract_strided_slice %219 {offsets = [0, 16], sizes = [17, 8], strides = [1, 1]} : vector<17x96xf32> to vector<17x8xf32>
    %253 = vector.extract_strided_slice %219 {offsets = [0, 48], sizes = [17, 8], strides = [1, 1]} : vector<17x96xf32> to vector<17x8xf32>
    %254 = vector.extract_strided_slice %219 {offsets = [0, 80], sizes = [17, 8], strides = [1, 1]} : vector<17x96xf32> to vector<17x8xf32>
    %cst_98 = arith.constant dense<0.000000e+00> : vector<17x17xf32>
    %255 = tpu.matmul %252, %253, %cst_98 {dimension_numbers = #tpu.dot_dimension_numbers<[1], [1], [0], [0], [0, 0, 1, 0], [], []>} : vector<17x8xf32>, vector<17x8xf32>, vector<17x17xf32> -> vector<17x17xf32>
    %cst_99 = arith.constant 0.176776692 : f32
    %256 = vector.broadcast %cst_99 : f32 to vector<17x17xf32>
    %257 = arith.mulf %255, %256 : vector<17x17xf32>
    %cst_100 = arith.constant dense<0xFF800000> : vector<17xf32>
    %258 = vector.multi_reduction <maximumf>, %257, %cst_100 [1] : vector<17x17xf32> to vector<17xf32>
    %259 = vector.shape_cast %258 : vector<17xf32> to vector<17x1xf32>
    %260 = vector.broadcast %259 : vector<17x1xf32> to vector<17x17xf32>
    %261 = arith.subf %257, %260 : vector<17x17xf32>
    %262 = math.exp %261 : vector<17x17xf32>
    %cst_101 = arith.constant dense<0.000000e+00> : vector<17xf32>
    %263 = vector.multi_reduction <add>, %262, %cst_101 [1] : vector<17x17xf32> to vector<17xf32>
    %264 = vector.shape_cast %263 : vector<17xf32> to vector<17x1xf32>
    %265 = vector.broadcast %264 : vector<17x1xf32> to vector<17x17xf32>
    %266 = arith.divf %262, %265 : vector<17x17xf32>
    %cst_102 = arith.constant dense<0.000000e+00> : vector<17x8xf32>
    %267 = tpu.matmul %266, %254, %cst_102 {dimension_numbers = #tpu.dot_dimension_numbers<[1], [0], [0], [1], [0, 0, 1, 1], [], []>} : vector<17x17xf32>, vector<17x8xf32>, vector<17x8xf32> -> vector<17x8xf32>
    %268 = vector.extract_strided_slice %219 {offsets = [0, 24], sizes = [17, 8], strides = [1, 1]} : vector<17x96xf32> to vector<17x8xf32>
    %269 = vector.extract_strided_slice %219 {offsets = [0, 56], sizes = [17, 8], strides = [1, 1]} : vector<17x96xf32> to vector<17x8xf32>
    %270 = vector.extract_strided_slice %219 {offsets = [0, 88], sizes = [17, 8], strides = [1, 1]} : vector<17x96xf32> to vector<17x8xf32>
    %cst_103 = arith.constant dense<0.000000e+00> : vector<17x17xf32>
    %271 = tpu.matmul %268, %269, %cst_103 {dimension_numbers = #tpu.dot_dimension_numbers<[1], [1], [0], [0], [0, 0, 1, 0], [], []>} : vector<17x8xf32>, vector<17x8xf32>, vector<17x17xf32> -> vector<17x17xf32>
    %cst_104 = arith.constant 0.176776692 : f32
    %272 = vector.broadcast %cst_104 : f32 to vector<17x17xf32>
    %273 = arith.mulf %271, %272 : vector<17x17xf32>
    %cst_105 = arith.constant dense<0xFF800000> : vector<17xf32>
    %274 = vector.multi_reduction <maximumf>, %273, %cst_105 [1] : vector<17x17xf32> to vector<17xf32>
    %275 = vector.shape_cast %274 : vector<17xf32> to vector<17x1xf32>
    %276 = vector.broadcast %275 : vector<17x1xf32> to vector<17x17xf32>
    %277 = arith.subf %273, %276 : vector<17x17xf32>
    %278 = math.exp %277 : vector<17x17xf32>
    %cst_106 = arith.constant dense<0.000000e+00> : vector<17xf32>
    %279 = vector.multi_reduction <add>, %278, %cst_106 [1] : vector<17x17xf32> to vector<17xf32>
    %280 = vector.shape_cast %279 : vector<17xf32> to vector<17x1xf32>
    %281 = vector.broadcast %280 : vector<17x1xf32> to vector<17x17xf32>
    %282 = arith.divf %278, %281 : vector<17x17xf32>
    %cst_107 = arith.constant dense<0.000000e+00> : vector<17x8xf32>
    %283 = tpu.matmul %282, %270, %cst_107 {dimension_numbers = #tpu.dot_dimension_numbers<[1], [0], [0], [1], [0, 0, 1, 1], [], []>} : vector<17x17xf32>, vector<17x8xf32>, vector<17x8xf32> -> vector<17x8xf32>
    %284 = tpu.concatenate %235, %251, %267, %283 in 1 : vector<17x8xf32>, vector<17x8xf32>, vector<17x8xf32>, vector<17x8xf32> -> vector<17x32xf32>
    %c1_108 = arith.constant 1 : index
    %c0_109 = arith.constant 0 : index
    %c0_110 = arith.constant 0 : index
    %285 = vector.load %arg5[%c1_108, %c0_109, %c0_110] : memref<2x32x32xf32, #tpu.memory_space<vmem>>, vector<1x32x32xf32>
    %286 = vector.shape_cast %285 : vector<1x32x32xf32> to vector<32x32xf32>
    %cst_111 = arith.constant dense<0.000000e+00> : vector<17x32xf32>
    %287 = tpu.matmul %284, %286, %cst_111 {dimension_numbers = #tpu.dot_dimension_numbers<[1], [0], [0], [1], [0, 0, 1, 1], [], []>} : vector<17x32xf32>, vector<32x32xf32>, vector<17x32xf32> -> vector<17x32xf32>
    %288 = arith.addf %189, %287 : vector<17x32xf32>
    %c14 = arith.constant 14 : index
    %c0_112 = arith.constant 0 : index
    %289 = vector.load %arg2[%c14, %c0_112] : memref<19x128xf32, #tpu.memory_space<vmem>>, vector<1x32xf32>
    %290 = vector.broadcast %289 : vector<1x32xf32> to vector<17x32xf32>
    %291 = arith.addf %288, %290 : vector<17x32xf32>
    %c15 = arith.constant 15 : index
    %c0_113 = arith.constant 0 : index
    %292 = vector.load %arg2[%c15, %c0_113] : memref<19x128xf32, #tpu.memory_space<vmem>>, vector<1x32xf32>
    %c16 = arith.constant 16 : index
    %c0_114 = arith.constant 0 : index
    %293 = vector.load %arg2[%c16, %c0_114] : memref<19x128xf32, #tpu.memory_space<vmem>>, vector<1x32xf32>
    %cst_115 = arith.constant dense<0.000000e+00> : vector<17xf32>
    %294 = vector.multi_reduction <add>, %291, %cst_115 [1] : vector<17x32xf32> to vector<17xf32>
    %295 = vector.shape_cast %294 : vector<17xf32> to vector<17x1xf32>
    %cst_116 = arith.constant 3.200000e+01 : f32
    %296 = vector.broadcast %cst_116 : f32 to vector<17x1xf32>
    %297 = arith.divf %295, %296 : vector<17x1xf32>
    %298 = vector.broadcast %297 : vector<17x1xf32> to vector<17x32xf32>
    %299 = arith.subf %291, %298 : vector<17x32xf32>
    %300 = arith.mulf %299, %299 : vector<17x32xf32>
    %cst_117 = arith.constant dense<0.000000e+00> : vector<17xf32>
    %301 = vector.multi_reduction <add>, %300, %cst_117 [1] : vector<17x32xf32> to vector<17xf32>
    %302 = vector.shape_cast %301 : vector<17xf32> to vector<17x1xf32>
    %cst_118 = arith.constant 3.200000e+01 : f32
    %303 = vector.broadcast %cst_118 : f32 to vector<17x1xf32>
    %304 = arith.divf %302, %303 : vector<17x1xf32>
    %305 = vector.broadcast %297 : vector<17x1xf32> to vector<17x32xf32>
    %306 = arith.subf %291, %305 : vector<17x32xf32>
    %cst_119 = arith.constant 9.99999974E-6 : f32
    %307 = vector.broadcast %cst_119 : f32 to vector<17x1xf32>
    %308 = arith.addf %304, %307 : vector<17x1xf32>
    %309 = math.rsqrt %308 : vector<17x1xf32>
    %310 = vector.broadcast %309 : vector<17x1xf32> to vector<17x32xf32>
    %311 = arith.mulf %306, %310 : vector<17x32xf32>
    %312 = vector.broadcast %292 : vector<1x32xf32> to vector<17x32xf32>
    %313 = arith.mulf %311, %312 : vector<17x32xf32>
    %314 = vector.broadcast %293 : vector<1x32xf32> to vector<17x32xf32>
    %315 = arith.addf %313, %314 : vector<17x32xf32>
    %c1_120 = arith.constant 1 : index
    %c0_121 = arith.constant 0 : index
    %c0_122 = arith.constant 0 : index
    %316 = vector.load %arg6[%c1_120, %c0_121, %c0_122] : memref<2x32x16xf32, #tpu.memory_space<vmem>>, vector<1x32x16xf32>
    %317 = vector.shape_cast %316 : vector<1x32x16xf32> to vector<32x16xf32>
    %cst_123 = arith.constant dense<0.000000e+00> : vector<17x16xf32>
    %318 = tpu.matmul %315, %317, %cst_123 {dimension_numbers = #tpu.dot_dimension_numbers<[1], [0], [0], [1], [0, 0, 1, 1], [], []>} : vector<17x32xf32>, vector<32x16xf32>, vector<17x16xf32> -> vector<17x16xf32>
    %c17 = arith.constant 17 : index
    %c0_124 = arith.constant 0 : index
    %319 = vector.load %arg2[%c17, %c0_124] : memref<19x128xf32, #tpu.memory_space<vmem>>, vector<1x16xf32>
    %320 = vector.broadcast %319 : vector<1x16xf32> to vector<17x16xf32>
    %321 = arith.addf %318, %320 : vector<17x16xf32>
    %cst_125 = arith.constant 5.000000e-01 : f32
    %322 = vector.broadcast %cst_125 : f32 to vector<17x16xf32>
    %323 = arith.mulf %322, %321 : vector<17x16xf32>
    %cst_126 = arith.constant 0.707106769 : f32
    %324 = vector.broadcast %cst_126 : f32 to vector<17x16xf32>
    %325 = arith.mulf %321, %324 : vector<17x16xf32>
    %cst_127 = arith.constant 0.000000e+00 : f32
    %326 = vector.broadcast %cst_127 : f32 to vector<17x16xf32>
    %327 = arith.cmpf oge, %325, %326 : vector<17x16xf32>
    %cst_128 = arith.constant 1.000000e+00 : f32
    %cst_129 = arith.constant -1.000000e+00 : f32
    %328 = vector.broadcast %cst_128 : f32 to vector<17x16xf32>
    %329 = vector.broadcast %cst_129 : f32 to vector<17x16xf32>
    %330 = arith.select %327, %328, %329 : vector<17x16xi1>, vector<17x16xf32>
    %331 = math.absf %325 : vector<17x16xf32>
    %cst_130 = arith.constant 0.327591091 : f32
    %332 = vector.broadcast %cst_130 : f32 to vector<17x16xf32>
    %333 = arith.mulf %332, %331 : vector<17x16xf32>
    %cst_131 = arith.constant 1.000000e+00 : f32
    %334 = vector.broadcast %cst_131 : f32 to vector<17x16xf32>
    %335 = arith.addf %334, %333 : vector<17x16xf32>
    %cst_132 = arith.constant 1.000000e+00 : f32
    %336 = vector.broadcast %cst_132 : f32 to vector<17x16xf32>
    %337 = arith.divf %336, %335 : vector<17x16xf32>
    %cst_133 = arith.constant 1.06140542 : f32
    %338 = vector.broadcast %cst_133 : f32 to vector<17x16xf32>
    %339 = arith.mulf %337, %338 : vector<17x16xf32>
    %cst_134 = arith.constant -1.45315206 : f32
    %340 = vector.broadcast %cst_134 : f32 to vector<17x16xf32>
    %341 = arith.addf %340, %339 : vector<17x16xf32>
    %342 = arith.mulf %337, %341 : vector<17x16xf32>
    %cst_135 = arith.constant 1.42141378 : f32
    %343 = vector.broadcast %cst_135 : f32 to vector<17x16xf32>
    %344 = arith.addf %343, %342 : vector<17x16xf32>
    %345 = arith.mulf %337, %344 : vector<17x16xf32>
    %cst_136 = arith.constant -0.284496725 : f32
    %346 = vector.broadcast %cst_136 : f32 to vector<17x16xf32>
    %347 = arith.addf %346, %345 : vector<17x16xf32>
    %348 = arith.mulf %337, %347 : vector<17x16xf32>
    %cst_137 = arith.constant 0.254829586 : f32
    %349 = vector.broadcast %cst_137 : f32 to vector<17x16xf32>
    %350 = arith.addf %349, %348 : vector<17x16xf32>
    %351 = arith.mulf %337, %350 : vector<17x16xf32>
    %cst_138 = arith.constant 0.000000e+00 : f32
    %352 = vector.broadcast %cst_138 : f32 to vector<17x16xf32>
    %353 = arith.subf %352, %331 : vector<17x16xf32>
    %354 = arith.mulf %353, %331 : vector<17x16xf32>
    %355 = math.exp %354 : vector<17x16xf32>
    %356 = arith.mulf %351, %355 : vector<17x16xf32>
    %cst_139 = arith.constant 1.000000e+00 : f32
    %357 = vector.broadcast %cst_139 : f32 to vector<17x16xf32>
    %358 = arith.subf %357, %356 : vector<17x16xf32>
    %359 = arith.mulf %330, %358 : vector<17x16xf32>
    %cst_140 = arith.constant 1.000000e+00 : f32
    %360 = vector.broadcast %cst_140 : f32 to vector<17x16xf32>
    %361 = arith.addf %360, %359 : vector<17x16xf32>
    %362 = arith.mulf %323, %361 : vector<17x16xf32>
    %c1_141 = arith.constant 1 : index
    %c0_142 = arith.constant 0 : index
    %c0_143 = arith.constant 0 : index
    %363 = vector.load %arg7[%c1_141, %c0_142, %c0_143] : memref<2x16x32xf32, #tpu.memory_space<vmem>>, vector<1x16x32xf32>
    %364 = vector.shape_cast %363 : vector<1x16x32xf32> to vector<16x32xf32>
    %cst_144 = arith.constant dense<0.000000e+00> : vector<17x32xf32>
    %365 = tpu.matmul %362, %364, %cst_144 {dimension_numbers = #tpu.dot_dimension_numbers<[1], [0], [0], [1], [0, 0, 1, 1], [], []>} : vector<17x16xf32>, vector<16x32xf32>, vector<17x32xf32> -> vector<17x32xf32>
    %366 = arith.addf %291, %365 : vector<17x32xf32>
    %c18 = arith.constant 18 : index
    %c0_145 = arith.constant 0 : index
    %367 = vector.load %arg2[%c18, %c0_145] : memref<19x128xf32, #tpu.memory_space<vmem>>, vector<1x32xf32>
    %368 = vector.broadcast %367 : vector<1x32xf32> to vector<17x32xf32>
    %369 = arith.addf %366, %368 : vector<17x32xf32>
    %370 = vector.extract_strided_slice %369 {offsets = [0, 0], sizes = [1, 32], strides = [1, 1]} : vector<17x32xf32> to vector<1x32xf32>
    %c0_146 = arith.constant 0 : index
    %c0_147 = arith.constant 0 : index
    %371 = vector.load %arg8[%c0_146, %c0_147] : memref<32x128xf32, #tpu.memory_space<vmem>>, vector<32x128xf32>
    %cst_148 = arith.constant dense<0.000000e+00> : vector<1x128xf32>
    %372 = tpu.matmul %370, %371, %cst_148 {dimension_numbers = #tpu.dot_dimension_numbers<[1], [0], [0], [1], [0, 0, 1, 1], [], []>} : vector<1x32xf32>, vector<32x128xf32>, vector<1x128xf32> -> vector<1x128xf32>
    %c2 = arith.constant 2 : index
    %c0_149 = arith.constant 0 : index
    %373 = vector.load %arg2[%c2, %c0_149] : memref<19x128xf32, #tpu.memory_space<vmem>>, vector<1x128xf32>
    %374 = arith.addf %372, %373 : vector<1x128xf32>
    %375 = vector.shape_cast %374 : vector<1x128xf32> to vector<1x1x128xf32>
    %c0_150 = arith.constant 0 : index
    %c0_151 = arith.constant 0 : index
    %c0_152 = arith.constant 0 : index
    %376 = vector.load %arg9[%c0_150, %c0_151, %c0_152] : memref<1x1x128xf32, #tpu.memory_space<vmem>>, vector<1x1x128xf32>
    tpu.vector_store %arg9[%c0_150, %c0_151, %c0_152], %375 {strides = array<i32>} : memref<1x1x128xf32, #tpu.memory_space<vmem>>, vector<1x1x128xf32>,
    return
  }
  func.func @transform_0(%arg0: i32) -> (i32, i32, i32) {
    %c0_i32 = arith.constant 0 : i32
    %c0_i32_0 = arith.constant 0 : i32
    %c0_i32_1 = arith.constant 0 : i32
    %c0_i32_2 = arith.constant 0 : i32
    return %c0_i32, %c0_i32_0, %c0_i32_1 : i32, i32, i32
  }
  func.func @transform_1(%arg0: i32) -> (i32, i32) {
    %c0_i32 = arith.constant 0 : i32
    %c0_i32_0 = arith.constant 0 : i32
    %c0_i32_1 = arith.constant 0 : i32
    return %c0_i32, %c0_i32_0 : i32, i32
  }
  func.func @transform_2(%arg0: i32) -> (i32, i32) {
    %c0_i32 = arith.constant 0 : i32
    %c0_i32_0 = arith.constant 0 : i32
    %c0_i32_1 = arith.constant 0 : i32
    return %c0_i32, %c0_i32_0 : i32, i32
  }
  func.func @transform_3(%arg0: i32) -> (i32, i32, i32) {
    %c0_i32 = arith.constant 0 : i32
    %c0_i32_0 = arith.constant 0 : i32
    %c0_i32_1 = arith.constant 0 : i32
    %c0_i32_2 = arith.constant 0 : i32
    return %c0_i32, %c0_i32_0, %c0_i32_1 : i32, i32, i32
  }
  func.func @transform_4(%arg0: i32) -> (i32, i32, i32) {
    %c0_i32 = arith.constant 0 : i32
    %c0_i32_0 = arith.constant 0 : i32
    %c0_i32_1 = arith.constant 0 : i32
    %c0_i32_2 = arith.constant 0 : i32
    return %c0_i32, %c0_i32_0, %c0_i32_1 : i32, i32, i32
  }
  func.func @transform_5(%arg0: i32) -> (i32, i32, i32) {
    %c0_i32 = arith.constant 0 : i32
    %c0_i32_0 = arith.constant 0 : i32
    %c0_i32_1 = arith.constant 0 : i32
    %c0_i32_2 = arith.constant 0 : i32
    return %c0_i32, %c0_i32_0, %c0_i32_1 : i32, i32, i32
  }
  func.func @transform_6(%arg0: i32) -> (i32, i32, i32) {
    %c0_i32 = arith.constant 0 : i32
    %c0_i32_0 = arith.constant 0 : i32
    %c0_i32_1 = arith.constant 0 : i32
    %c0_i32_2 = arith.constant 0 : i32
    return %c0_i32, %c0_i32_0, %c0_i32_1 : i32, i32, i32
  }
  func.func @transform_7(%arg0: i32) -> (i32, i32) {
    %c0_i32 = arith.constant 0 : i32
    %c0_i32_0 = arith.constant 0 : i32
    %c0_i32_1 = arith.constant 0 : i32
    return %c0_i32, %c0_i32_0 : i32, i32
  }
  func.func @transform_8(%arg0: i32) -> (i32, i32, i32) {
    %c0_i32 = arith.constant 0 : i32
    %c0_i32_0 = arith.constant 0 : i32
    %c0_i32_1 = arith.constant 0 : i32
    return %arg0, %c0_i32, %c0_i32_0 : i32, i32, i32
  }
}

</mosaic_0001>

<bundles_post_ra>
// kernel: posfree_vit_forward.1
= control target key start
LH: loop header
LB: loop body
LE: loop exit
PB: predicated region body
PF: predicated region fallthrough
CT: control target
= control target key end

     0   :  { %13 = vsyncpa [#allocation3], 0  ;;  %s6286_s0 = inlined_call_operand.vmem [shape: f32[2,16,8], index: 0, kind: input, shape index: {}]   ;;  %s6287_s1 = inlined_call_operand.vmem [shape: f32[19,128], index: 1, kind: input, shape index: {}]   ;;  %s6288_s2 = inlined_call_operand.hbm [shape: f32[8,32], index: 2, kind: input, shape index: {}]   ;;  %s6289_s3 = inlined_call_operand.vmem [shape: f32[2,32,96], index: 3, kind: input, shape index: {}]   ;;  %s6290_s4 = inlined_call_operand.hbm [shape: f32[2,32,32], index: 4, kind: input, shape index: {}]   ;;  %s6291_s5 = inlined_call_operand.vmem [shape: f32[2,32,16], index: 5, kind: input, shape index: {}]   ;;  %s6292_s6 = inlined_call_operand.hbm [shape: f32[2,16,32], index: 6, kind: input, shape index: {}]   ;;  %s6293_s7 = inlined_call_operand.hbm [shape: f32[32,128], index: 7, kind: input, shape index: {}]   ;;  %s6294_s8 = inlined_call_operand.hbm [shape: f32[2,1,128], index: 8, kind: output, shape index: {}]  }
   0x1   :  { %14 = vsyncpa [#allocation6], 0 }
   0x2   :  { %15 = vsyncpa [#allocation9], 0 }
   0x3   :  { %16 = vsyncpa [#allocation4], 0 }
   0x4   :  { %18 = vsyncpa [#allocation4 + $0x1], 0  ;;  %s5181_s27 = smov 0   ;;  %s5183_s28 = smov 0  }
   0x5   :  { %s5185_s29 = smov 0   ;;  %s5187_s30 = smov 0  }
   0x6 LB: > { %6313 = sst [smem:[#allocation15_spill]] %s5105_s29  ;;  %s5202_s9 = sadd.s32 4294967295, %s5109_s30   ;;  %s5109_s30 = sphi %s5187_s30, %s6340_s30   ;;  %s5105_s29 = sphi %s5185_s29, %s6342_s29   ;;  %s5101_s28 = sphi %s5183_s28, %s6344_s28   ;;  %s5097_s27 = sphi %s5181_s27, %s6343_s27  }
   0x7   : > { %s3808_s10 = sadd.s32 4294967294, %s5109_s30   ;;  %s5206_s11 = sadd.s32 1, %s5109_s30  }
   0x8   : > { %6314 = sst [smem:[#allocation16_spill]] %s5206_s11  ;;  %s199_s12 = sadd.s32 1, %s5105_s29 }
   0x9   : > { %s196_s13 = ssub.s32 %s5109_s30, %s5206_s11  ;;  %p209_p0 = scmp.ne.s32.totalorder %s5105_s29, %s5101_s28 }
   0xa   : > { %p197_p1 = scmp.eq.s32.totalorder %s196_s13, 0  ;;  %p210_p2 = scmp.eq.s32.totalorder %s5202_s9, 1 }
   0xb   : > { %p215_p3 = scmp.ne.s32.totalorder %s5101_s28, %s5097_s27  ;;  %p216_p4 = scmp.eq.s32.totalorder %s3808_s10, 1 }
   0xc   : > { %s5217_s14 = scalar_select %p197_p1, %s5105_s29, %s199_s12  }
   0xd   : > { %p5219_p5 = por %p210_p2, %p209_p0  ;;  %p5223_p6 = por %p216_p4, %p215_p3 }
   0xe   : > { %6315 = sst [smem:[#allocation17_spill]] %s5217_s14  ;;  %p3809_p7 = scmp.ge.s32.totalorder %s5109_s30, 1 }
   0xf   : > { %s6316_s15 = scalar_select %p5219_p5, 1, 0 }
  0x10   : > { %s6317_s16 = scalar_select %p5223_p6, 1, 0 }
  0x11   : > { %p223_p8 = scmp.lt.s32.totalorder %s5109_s30, 3  ;;  %p6295_p9 = scmp.eq.s32.totalorder %s5202_s9, 0 }
  0x12   : > { %6318 = sst [smem:[#allocation18_spill]] %s6317_s16  ;;  %s5111_s18 = smov [#allocation5]  }
  0x13   : > { %p5230_p10 = pnand %p3809_p7, %p223_p8  ;;  %s255_s19 = sshll.u32 %s5111_s18, 4  ;;  %s5236_s19 = int_to_ptr.vmem [resolvable:$true] %s255_s19 }
  0x14   : > { %s5112_s21 = smov [#allocation2]   ;;  %s5113_s23 = smov [#allocation7]  }
  0x15   : > { %s6319_s17 = scalar_select %p5230_p10, 1, 0 }
  0x16   : > { %p4617_p11 = pneg %p5230_p10  ;;  %s242_s22 = sshll.u32 %s5112_s21, 4  ;;  %s5244_s22 = int_to_ptr.vmem [resolvable:$true] %s242_s22 }
  0x17   : > { %s5246_s24 = sshll.u32 %s5113_s23, 4  ;;  %s4923_s10 = scalar_lea.hbm %s6290_s4, 1024  ;;  %s272_s24 = int_to_ptr.vmem [resolvable:$true] %s5246_s24 }
  0x18   : > { %p5240_p12 = pnand %p6295_p9, %p4617_p11  ;;  %p4924_p13 = scmp.ne.s32.totalorder %s6290_s4, %s4923_s10 }
  0x19   : > { %p4930_p3 = scmp.lt.u32.totalorder %s4923_s10, %s6290_s4 }
  0x1a   : > { %p5256_p0 = pneg %p5240_p12 }
  0x1c   : > { %p4926_p1 = pnand %p5256_p0, %p4924_p13 }
  0x1e   : > { %p4927_p2 = pneg %p4926_p1 }
  0x20   : > { %p4932_p4 = pnand %p4930_p3, %p4927_p2 }
  0x22   : > { %4935 = shalt.err (!%p4932_p4)
}
  0x23   : > { %s4936_s25 = scalar_lea.vmem %s5236_s19, 1024  ;;  %p4944_p9 = scmp.lt.s32.totalorder %s5236_s19, %s5236_s19 }
  0x24   : > { %p4937_p7 = scmp.ne.s32.totalorder %s5236_s19, %s4936_s25  ;;  %p4945_p6 = scmp.lt.s32.totalorder %s4936_s25, %s4936_s25 }
  0x26   : > { %p4939_p8 = pnand %p4937_p7, %p5256_p0  ;;  %p4946_p13 = por %p4945_p6, %p4944_p9 }
  0x28   : > { %p4940_p11 = pneg %p4939_p8 }
  0x2a   : > { %p4947_p1 = pnand %p4946_p13, %p4940_p11 }
  0x2c   : > { %4950 = shalt.err (!%p4947_p1)
}
  0x2d   : > { %s5114_s26 = smov 128   ;;  %s5115_s10 = smov 8  }
  0x2e   : > { %4623 = dma.hbm_to_vmem [thread:$0]  (!%p5240_p12), %s6290_s4, 1024, %s5236_s19, [#allocation6], %s5114_s26, %s5114_s26, %s5115_s10  }
  0x2f   : > { %s4951_s25 = scalar_lea.hbm %s6288_s2, 128 }
  0x30   : > { %p4952_p6 = scmp.ne.s32.totalorder %s6288_s2, %s4951_s25  ;;  %p4958_p3 = scmp.lt.u32.totalorder %s4951_s25, %s6288_s2 }
  0x32   : > { %p4954_p9 = pnand %p4952_p6, %p5256_p0 }
  0x34   : > { %p4955_p2 = pneg %p4954_p9 }
  0x36   : > { %p4960_p4 = pnand %p4958_p3, %p4955_p2 }
  0x38   : > { %4963 = shalt.err (!%p4960_p4)
}
  0x39   : > { %s4964_s19 = scalar_lea.vmem %s5244_s22, 128  ;;  %p4972_p13 = scmp.lt.s32.totalorder %s5244_s22, %s5244_s22 }
  0x3a   : > { %p4965_p7 = scmp.ne.s32.totalorder %s5244_s22, %s4964_s19  ;;  %p4973_p1 = scmp.lt.s32.totalorder %s4964_s19, %s4964_s19 }
  0x3c   : > { %p4967_p8 = pnand %p4965_p7, %p5256_p0  ;;  %p4974_p6 = por %p4973_p1, %p4972_p13 }
  0x3e   : > { %p4968_p11 = pneg %p4967_p8 }
  0x40   : > { %p4975_p9 = pnand %p4974_p6, %p4968_p11 }
  0x42   : > { %4978 = shalt.err (!%p4975_p9)
}
  0x43   : > { %4620 = dma.hbm_to_vmem [thread:$0]  (!%p5240_p12), %s6288_s2, 128, %s5244_s22, [#allocation3]  }
  0x44   : > { %s4979_s12 = scalar_lea.hbm %s6292_s6, 512 }
  0x45   : > { %p4980_p2 = scmp.ne.s32.totalorder %s6292_s6, %s4979_s12  ;;  %p4986_p7 = scmp.lt.u32.totalorder %s4979_s12, %s6292_s6 }
  0x47   : > { %p4982_p3 = pnand %p4980_p2, %p5256_p0 }
  0x49   : > { %p4983_p4 = pneg %p4982_p3 }
  0x4b   : > { %p4988_p8 = pnand %p4986_p7, %p4983_p4 }
  0x4d   : > { %4991 = shalt.err (!%p4988_p8)
}
  0x4e   : > { %s4992_s19 = scalar_lea.vmem %s272_s24, 512  ;;  %p5000_p6 = scmp.lt.s32.totalorder %s272_s24, %s272_s24 }
  0x4f   : > { %p4993_p11 = scmp.ne.s32.totalorder %s272_s24, %s4992_s19  ;;  %p5001_p9 = scmp.lt.s32.totalorder %s4992_s19, %s4992_s19 }
  0x51   : > { %p4995_p13 = pnand %p4993_p11, %p5256_p0  ;;  %p5002_p5 = por %p5001_p9, %p5000_p6 }
  0x53   : > { %p4996_p1 = pneg %p4995_p13 }
  0x55   : > { %p5003_p10 = pnand %p5002_p5, %p4996_p1 }
  0x57   : > { %5006 = shalt.err (!%p5003_p10)
}
  0x58   : > { %4626 = dma.hbm_to_vmem [thread:$0]  (!%p5240_p12), %s6292_s6, 512, %s272_s24, [#allocation6], %s5114_s26, %s5114_s26, %s5115_s10  }
  0x59   : > { %s5116_s11 = smov [#allocation8]   ;;  %s5007_s13 = scalar_lea.hbm %s6293_s7, 512 }
  0x5a   : > { %s284_s14 = sshll.u32 %s5116_s11, 4  ;;  %p5008_p5 = scmp.ne.s32.totalorder %s6293_s7, %s5007_s13  ;;  %s285_s14 = int_to_ptr.vmem [resolvable:$true] %s284_s14 }
  0x5b   : > { %p5014_p3 = scmp.lt.u32.totalorder %s5007_s13, %s6293_s7 }
  0x5c   : > { %p5010_p10 = pnand %p5008_p5, %p5256_p0 }
  0x5e   : > { %p5011_p2 = pneg %p5010_p10 }
  0x60   : > { %p5016_p4 = pnand %p5014_p3, %p5011_p2 }
  0x62   : > { %5019 = shalt.err (!%p5016_p4)
}
  0x63   : > { %s5020_s24 = scalar_lea.vmem %s285_s14, 512  ;;  %p5028_p13 = scmp.lt.s32.totalorder %s285_s14, %s285_s14 }
  0x64   : > { %p5021_p7 = scmp.ne.s32.totalorder %s285_s14, %s5020_s24  ;;  %p5029_p1 = scmp.lt.s32.totalorder %s5020_s24, %s5020_s24 }
  0x66   : > { %p5023_p8 = pnand %p5021_p7, %p5256_p0  ;;  %p5030_p6 = por %p5029_p1, %p5028_p13 }
  0x68   : > { %p5024_p11 = pneg %p5023_p8 }
  0x6a   : > { %p5031_p9 = pnand %p5030_p6, %p5024_p11 }
  0x6c   : > { %5034 = shalt.err (!%p5031_p9)
}
  0x6d   : > { %4629 = dma.hbm_to_vmem [thread:$0]  (!%p5240_p12), %s6293_s7, 512, %s285_s14, [#allocation9], %s5114_s26, %s5114_s26, %s5115_s10  }
  0x6e   : > { %p6322_p5 = scmp.ne.s32.totalorder %s6319_s17, 0 }
  0x6f   : > { %p6323_p0 = scmp.eq.s32.totalorder (!%p6322_p5), %s5202_s9, 0 }
  0x70   : > { %300 = sbr.rel (%p6322_p5) target bundleno = 5790 (0x169e), region = 52 }
  0x77   : > { %5080 = dma.done.wait (%p6323_p0), [#allocation3], 128   ;;  %p6324_p10 = pmov %p6323_p0 }
  0x78   : > { %p6325_p2 = pmov %p6323_p0 }
  0x79   : > { %5082 = vsyncadd (%p6324_p10), [#allocation3], 4294967168 }
  0x7a   : > { %5084 = dma.done.wait (%p6325_p2), [#allocation6], 1536   ;;  %p6326_p3 = pmov %p6323_p0 }
  0x7b   : > { %p6327_p4 = pmov %p6323_p0 }
  0x7c   : > { %5086 = vsyncadd (%p6326_p3), [#allocation6], 4294965760 }
  0x7d   : > { %5088 = dma.done.wait (%p6327_p4), [#allocation9], 512   ;;  %p6328_p12 = pmov %p6323_p0 }
  0x7e   : > { %s6302_s17 = sshll.u32 %s5202_s9, 4  ;;  %vm350_vm0 = vcmask 64512   ;;  %v344_v0 = vld [vmem:[#allocation2] sm:$0xff]  ;;  %vm452_vm1 = vcmask 253952   ;;  %vm435_vm2 = vcmask 1040384   ;;  %vm445_vm3 = vcmask 261120  }
  0x7f   : > { %5090 = vsyncadd (%p6328_p12), [#allocation9], 4294966784  ;;  %s341_s26 = scalar_lea.vmem %s6286_s0, %s6302_s17  ;;  %4111 = vmatprep.subr.mxu0 %v344_v0  ;;  %v3820_v3 = vld [vmem:[%s6287_s1] ss:$0 sm:$0xff]  ;;  %v432_v9 = vld [vmem:[%s6287_s1 + $0x1] sm:$0x1] }
  0x80   : > { %v342_v1 = vld [vmem:[%s341_s26] sm:$0xff]  ;;  %v343_v2 = vld [vmem:[%s341_s26 + $0x8] sm:$0xff]  ;;  %4112 = vmatpush3.msra.mxu0 %v344_v0  ;;  %v503_v33 = vld [vmem:[%s6289_s3 + $0x10] sm:$0xff]  ;;  %v5117_v34 = vmov 0.0|0.0   ;;  %vm5118_vm4 = vmmov 0   ;;  %v5119_v37 = vmov 0.0  }
  0x81   : > { %4113 = vmatprep.mubr.msk.f32.mxu0 %vm350_vm0, %v342_v1  ;;  %v501_v31 = vld [vmem:[%s6289_s3] sm:$0xff]  ;;  %v502_v32 = vld [vmem:[%s6289_s3 + $0x8] sm:$0xff]  ;;  %4495 = vmatprep.subr.bf16.mxu1 %v5117_v34  ;;  %v504_v36 = vld [vmem:[%s6289_s3 + $0x18] sm:$0xff]  ;;  %s5120_s14 = smov 96   ;;  %s5121_s16 = smov 80   ;;  %vm703_vm6 = vcmask 138240  }
  0x82   : > { %4114 = vmatmul.mubr.msk.f32.vlgmr.msra.gmra.mrb[0].mxu0 %vm350_vm0, %v343_v2  ;;  %v4496_v35 = vpack.c.bf16 %v502_v32, %v501_v31  ;;  %4124 = vmatprep.mubr.msk.f32.mxu1 %vm5118_vm4, %v5119_v37  ;;  %v4499_v38 = vpack.c.bf16 %v504_v36, %v503_v33  ;;  %v3823_v49 = vld [vmem:[%s6287_s1 + $0x3] ss:$0 sm:$0xff]  ;;  %v3824_v51 = vld [vmem:[%s6287_s1 + $0x4] ss:$0 sm:$0xff]  ;;  %v3825_v0 = vld [vmem:[%s6287_s1 + $0x5] ss:$0 sm:$0xff] }
  0x83   : > { %4501 = vmatprep.subr.bf16.mxu0 %v5117_v34  ;;  %4139 = vmatprep.mubr.msk.f32.mxu0 %vm5118_vm4, %v5119_v37  ;;  %s5122_s12 = smov 88   ;;  %s5123_s13 = smov 120   ;;  %vm5471_vm5 = vmpackc.low %vm350_vm0, %vm350_vm0  ;;  %vm710_vm7 = vcmask 131072   ;;  %vm1593_vm8 = vcmask 130048   ;;  %vm1597_vm9 = vcmask 195584  }
  0x84   : > { %4497 = vmatpush3.bf16.msra.mxu1 %v4496_v35  ;;  %s5124_s21 = smov 112   ;;  %s5125_s23 = smov 72  }
  0x85   : > { %4498 = vmatprep.subr.bf16.mxu1 %v5117_v34  ;;  %s5126_s25 = smov 104   ;;  %s5127_s19 = smov 64  }
  0x86   : > { %s5128_s24 = smov 56   ;;  %s6311_s22 = smov 48  }
  0x87   : > { %s6309_s29 = smov 40   ;;  %s6307_s20 = smov 8  }
  0x88   : > { %4500 = vmatpush3.bf16.msra.mxu1 %v4499_v38  ;;  %s6305_s18 = smov 16   ;;  %s6303_s26 = smov 24  }
  0x89   : > { %4505 = vmatprep.subr.bf16.mxu1 %v5117_v34  ;;  %s6336_s17 = sshll.u32 %s5202_s9, 4  ;;  %p6337_p8 = scmp.ne.s32.totalorder %s6316_s15, 0 }
  0x8a   : > { %s5135_s9 = smov [#allocation10]  }
 0x155   : > { %v4115_v4 = vpop.f32.mrb[0].mxu0 }
 0x156   : > { %v429_v5 = vadd.f32 %v4115_v4, %v3820_v3  ;;  %v423_v6 = vpop.f32.mrb[1].mxu0 }
 0x157   : > { %v424_v7 = vadd.f32 %v3820_v3, %v423_v6 }
 0x158   : > { %v5371_v8 = vrot.slane %v429_v5, 7 }
 0x159   : > { %v436_v10 = vrot.slane %v424_v7, 7 }
 0x15a   : > { %v453_v11 = vsel %vm452_vm1, %v5371_v8, 0.0 }
 0x15b   : > { %454 = vadd.xlane.f32.xlu1 %v453_v11  ;;  %v5379_v12 = vsel %vm435_vm2, %v432_v9, %v436_v10  ;;  %v5385_v14 = vsel %vm435_vm2, %v436_v10, %v5371_v8 }
 0x15c   : > { %v446_v13 = vsel %vm445_vm3, %v5379_v12, 0.0  ;;  %v449_v15 = vsel %vm445_vm3, %v5385_v14, 0.0 }
 0x15d   : > { %447 = vadd.xlane.f32.xlu0 %v446_v13 }
 0x161   : > { %450 = vadd.xlane.f32.xlu0 %v449_v15 }
 0x1e8   : > { %v455_v16 = vpop.xlane.xlu1 %454 }
 0x1e9   : > { %v459_v17 = vmul.f32 0.03125, %v455_v16 }
 0x1ea   : > { %v448_v18 = vpop.xlane.xlu0 %447 }
 0x1eb   : > { %v457_v19 = vmul.f32 0.03125, %v448_v18  ;;  %v462_v20 = vsub.f32 %v5371_v8, %v459_v17 }
 0x1ed   : > { %v460_v21 = vsub.f32 %v5379_v12, %v457_v19  ;;  %v465_v27 = vmul.f32 %v462_v20, %v462_v20 }
 0x1ee   : > { %v451_v22 = vpop.xlane.xlu0 %450 }
 0x1ef   : > { %v458_v23 = vmul.f32 0.03125, %v451_v22  ;;  %v463_v24 = vmul.f32 %v460_v21, %v460_v21  ;;  %v472_v29 = vsel %vm452_vm1, %v465_v27, 0.0 }
 0x1f1   : > { %v461_v25 = vsub.f32 %v5385_v14, %v458_v23  ;;  %v466_v26 = vsel %vm445_vm3, %v463_v24, 0.0 }
 0x1f2   : > { %467 = vadd.xlane.f32.xlu1 %v466_v26 }
 0x1f3   : > { %v464_v28 = vmul.f32 %v461_v25, %v461_v25 }
 0x1f5   : > { %v469_v30 = vsel %vm445_vm3, %v464_v28, 0.0 }
 0x1f6   : > { %473 = vadd.xlane.f32.xlu1 %v472_v29  ;;  %470 = vadd.xlane.f32.xlu0 %v469_v30 }
 0x27f   : > { %v468_v39 = vpop.xlane.xlu1 %467 }
 0x280   : > { %v475_v40 = vmul.f32 0.03125, %v468_v39 }
 0x282   : > { %v478_v41 = vadd.f32 1e-05, %v475_v40 }
 0x283   : > { %v474_v42 = vpop.xlane.xlu1 %473  ;;  %v471_v43 = vpop.xlane.xlu0 %470 }
 0x284   : > { %4779 = vrsqrt.f32 %v478_v41  ;;  %v477_v44 = vmul.f32 0.03125, %v474_v42  ;;  %v476_v45 = vmul.f32 0.03125, %v471_v43 }
 0x286   : > { %v480_v46 = vadd.f32 1e-05, %v477_v44  ;;  %v479_v47 = vadd.f32 1e-05, %v476_v45 }
 0x288   : > { %4781 = vrsqrt.f32 %v480_v46 }
 0x289   : > { %4783 = vrsqrt.f32 %v479_v47 }
 0x28e   : > { %v4780_v48 = vpop.eup %4779 }
 0x28f   : > { %v484_v50 = vmul.f32 %v4780_v48, %v460_v21 }
 0x291   : > { %v491_v52 = vmul.f32 %v3823_v49, %v484_v50 }
 0x292   : > { %v4782_v53 = vpop.eup %4781 }
 0x293   : > { %v4784_v54 = vpop.eup %4783  ;;  %v498_v55 = vadd.f32 %v3824_v51, %v491_v52  ;;  %v486_v57 = vmul.f32 %v4782_v53, %v462_v20 }
 0x294   : > { %v485_v56 = vmul.f32 %v4784_v54, %v461_v25 }
 0x295   : > { %4125 = vmatmul.mubr.msk.f32.vlgmr.msra.gmra.mrb[0].mxu1 %vm445_vm3, %v498_v55  ;;  %v493_v60 = vmul.f32 %v3823_v49, %v486_v57 }
 0x296   : > { %4127 = vmatprep.mubr.msk.f32.mxu1 %vm5118_vm4, %v5119_v37  ;;  %v492_v58 = vmul.f32 %v3823_v49, %v485_v56 }
 0x297   : > { %v500_v61 = vadd.f32 %v3824_v51, %v493_v60 }
 0x298   : > { %v499_v59 = vadd.f32 %v3824_v51, %v492_v58 }
 0x29a   : > { %4128 = vmatmul.mubr.msk.f32.gmra.mrb[2].mxu1 %vm445_vm3, %v499_v59 }
 0x29b   : > { %4130 = vmatprep.mubr.msk.f32.mxu1 %vm5118_vm4, %v5119_v37 }
 0x29e   : > { %4131 = vmatmul.mubr.msk.f32.gmra.mrb[4].mxu1 %vm445_vm3, %v500_v61 }
 0x29f   : > { %4154 = vmatprep.mubr.msk.f32.mxu1 %vm5118_vm4, %v5119_v37 }
 0x368   : > { %v585_v62 = vpop.f32.mrb[0].mxu1 }
 0x369   : > { %v4126_v63 = vpop.f32.mrb[1].mxu1  ;;  %v586_v2 = vadd.f32 %v3825_v0, %v585_v62 }
 0x36d   : > { %v590_v1 = vpop.f32.mrb[2].mxu1 }
 0x36e   : > { %v591_v3 = vadd.f32 %v3825_v0, %v590_v1  ;;  %v4129_v4 = vpop.f32.mrb[3].mxu1 }
 0x370   : > { %v5433_v5 = vpack.i.bf16 %v591_v3, %v586_v2 }
 0x371   : > { %v595_v6 = vpop.f32.mrb[4].mxu1 }
 0x372   : > { %v5435_v7 = vadd.f32 %v3825_v0, %v595_v6  ;;  %4700 = vrot.lane.b32.xlu0 %v5433_v5, %s5120_s14  ;;  %v4132_v9 = vpop.f32.mrb[5].mxu1 }
 0x374   : > { %606 = vrot.lane.b32.xlu1 %v5435_v7, %s5120_s14 }
 0x376   : > { %4710 = vrot.lane.b32.xlu0 %v5433_v5, %s5121_s16 }
 0x378   : > { %4705 = vrot.lane.b32.xlu1 %v5433_v5, %s5122_s12 }
 0x37a   : > { %839 = vrot.lane.b32.xlu0 %v591_v3, %s5123_s13 }
 0x37c   : > { %847 = vrot.lane.b32.xlu1 %v5435_v7, %s5122_s12 }
 0x37e   : > { %1086 = vrot.lane.b32.xlu0 %v5435_v7, %s5121_s16 }
 0x380   : > { %837 = vrot.lane.b32.xlu1 %v586_v2, %s5123_s13 }
 0x382   : > { %1076 = vrot.lane.b32.xlu0 %v586_v2, %s5124_s21 }
 0x384   : > { %841 = vrot.lane.b32.xlu1 %v5435_v7, %s5123_s13 }
 0x386   : > { %1080 = vrot.lane.b32.xlu0 %v5435_v7, %s5124_s21 }
 0x388   : > { %4715 = vrot.lane.b32.xlu1 %v5433_v5, %s5125_s23 }
 0x38a   : > { %1315 = vrot.lane.b32.xlu0 %v586_v2, %s5126_s25 }
 0x38c   : > { %1078 = vrot.lane.b32.xlu1 %v591_v3, %s5124_s21 }
 0x38e   : > { %1319 = vrot.lane.b32.xlu0 %v5435_v7, %s5126_s25 }
 0x390   : > { %1325 = vrot.lane.b32.xlu1 %v5435_v7, %s5125_s23 }
 0x392   : > { %4720 = vrot.lane.b32.xlu0 %v5433_v5, %s5127_s19 }
 0x394   : > { %1317 = vrot.lane.b32.xlu1 %v591_v3, %s5126_s25 }
 0x398   : > { %742 = vrot.lane.b32.xlu1 %v5435_v7, %s5127_s19 }
 0x3e4   : > { %v4701_v10 = vpop.permute.xlu0 %4700 }
 0x3e5   : > { %v4703_v11 = vunpack.i.h.bf16 %v4701_v10  ;;  %v4702_v13 = vunpack.i.l.bf16 %v4701_v10 }
 0x3e6   : > { %v607_v15 = vpop.permute.xlu1 %606 }
 0x3e7   : > { %v4502_v17 = vpack.c.bf16 %v4703_v11, %v4702_v13 }
 0x3e8   : > { %v4711_v18 = vpop.permute.xlu0 %4710 }
 0x3e9   : > { %4504 = vmatpush3.bf16.xpose.msk.msra.mxu0 %vm5471_vm5, %v4502_v17  ;;  %v4713_v31 = vunpack.i.h.bf16 %v4711_v18  ;;  %v4712_v32 = vunpack.i.l.bf16 %v4711_v18 }
 0x3ea   : > { %v4706_v19 = vpop.permute.xlu1 %4705  ;;  %4137 = vmatprep.subr.mxu0 %v5119_v37 }
 0x3eb   : > { %v4708_v22 = vunpack.i.h.bf16 %v4706_v19  ;;  %v4707_v23 = vunpack.i.l.bf16 %v4706_v19  ;;  %v4516_v36 = vpack.c.bf16 %v4713_v31, %v4712_v32 }
 0x3ec   : > { %v840_v20 = vpop.permute.xlu0 %839 }
 0x3ed   : > { %v4509_v26 = vpack.c.bf16 %v4708_v22, %v4707_v23 }
 0x3ee   : > { %v848_v21 = vpop.permute.xlu1 %847 }
 0x3f0   : > { %v1087_v24 = vpop.permute.xlu0 %1086 }
 0x3f1   : > { %4138 = vmatpush3.xpose.msk.msra.mxu0 %vm350_vm0, %v607_v15 }
 0x3f2   : > { %v838_v25 = vpop.permute.xlu1 %837  ;;  %4508 = vmatprep.subr.bf16.mxu0 %v5117_v34 }
 0x3f4   : > { %v1077_v27 = vpop.permute.xlu0 %1076  ;;  %4140 = vmatmul.mubr.msk.f32.vlgmr.msra.gmra.mrb[2].mxu0 %vm350_vm0, %v586_v2 }
 0x3f5   : > { %4511 = vmatpush3.bf16.xpose.msk.msra.mxu0 %vm5471_vm5, %v4509_v26  ;;  %4142 = vmatprep.mubr.msk.f32.mxu0 %vm5118_vm4, %v5119_v37 }
 0x3f6   : > { %v842_v28 = vpop.permute.xlu1 %841  ;;  %4167 = vmatprep.subr.mxu0 %v5119_v37 }
 0x3f8   : > { %v1081_v29 = vpop.permute.xlu0 %1080  ;;  %4143 = vmatmul.mubr.msk.f32.gmra.mrb[4].mxu0 %vm350_vm0, %v591_v3 }
 0x3f9   : > { %4145 = vmatprep.mubr.msk.f32.mxu0 %vm5118_vm4, %v5119_v37 }
 0x3fa   : > { %v4716_v30 = vpop.permute.xlu1 %4715 }
 0x3fb   : > { %v4718_v44 = vunpack.i.h.bf16 %v4716_v30  ;;  %v4717_v45 = vunpack.i.l.bf16 %v4716_v30 }
 0x3fc   : > { %v1316_v33 = vpop.permute.xlu0 %1315  ;;  %4146 = vmatmul.mubr.msk.f32.gmra.mrb[6].mxu0 %vm350_vm0, %v5435_v7 }
 0x3fd   : > { %4168 = vmatpush3.xpose.msk.msra.mxu0 %vm350_vm0, %v848_v21  ;;  %4169 = vmatprep.mubr.msk.f32.mxu0 %vm5118_vm4, %v5119_v37  ;;  %v4523_v47 = vpack.c.bf16 %v4718_v44, %v4717_v45 }
 0x3fe   : > { %v1079_v35 = vpop.permute.xlu1 %1078  ;;  %4515 = vmatprep.subr.bf16.mxu0 %v5117_v34 }
 0x400   : > { %v1320_v38 = vpop.permute.xlu0 %1319  ;;  %4170 = vmatmul.mubr.msk.f32.vlgmr.msra.gmra.mrb[8].mxu0 %vm350_vm0, %v838_v25 }
 0x401   : > { %4518 = vmatpush3.bf16.xpose.msk.msra.mxu0 %vm5471_vm5, %v4516_v36  ;;  %4172 = vmatprep.mubr.msk.f32.mxu0 %vm5118_vm4, %v5119_v37 }
 0x402   : > { %v1326_v39 = vpop.permute.xlu1 %1325  ;;  %4197 = vmatprep.subr.mxu0 %v5119_v37 }
 0x404   : > { %v4721_v40 = vpop.permute.xlu0 %4720  ;;  %4173 = vmatmul.mubr.msk.f32.gmra.mrb[10].mxu0 %vm350_vm0, %v840_v20 }
 0x405   : > { %v4723_v41 = vunpack.i.h.bf16 %v4721_v40  ;;  %v4722_v42 = vunpack.i.l.bf16 %v4721_v40  ;;  %4175 = vmatprep.mubr.msk.f32.mxu0 %vm5118_vm4, %v5119_v37 }
 0x406   : > { %v1318_v43 = vpop.permute.xlu1 %1317 }
 0x407   : > { %v4506_v46 = vpack.c.bf16 %v4723_v41, %v4722_v42 }
 0x408   : > { %4176 = vmatmul.mubr.msk.f32.gmra.mrb[12].mxu0 %vm350_vm0, %v842_v28 }
 0x409   : > { %4507 = vmatpush3.bf16.msra.mxu1 %v4506_v46  ;;  %4198 = vmatpush3.xpose.msk.msra.mxu0 %vm350_vm0, %v1087_v24 }
 0x40a   : > { %4199 = vmatprep.mubr.msk.f32.mxu0 %vm5118_vm4, %v5119_v37  ;;  %4152 = vmatprep.subr.mxu1 %v5119_v37  ;;  %v743_v48 = vpop.permute.xlu1 %742 }
 0x40b   : > { %4522 = vmatprep.subr.bf16.mxu0 %v5117_v34 }
 0x40c   : > { %4200 = vmatmul.mubr.msk.f32.vlgmr.msra.gmra.mrb[14].mxu0 %vm350_vm0, %v1077_v27 }
 0x40d   : > { %4153 = vmatpush3.msk.msra.mxu1 %vm435_vm2, %v743_v48  ;;  %4525 = vmatpush3.bf16.xpose.msk.msra.mxu0 %vm5471_vm5, %v4523_v47 }
 0x40e   : > { %4202 = vmatprep.mubr.msk.f32.mxu0 %vm5118_vm4, %v5119_v37  ;;  %4227 = vmatprep.subr.mxu0 %v5119_v37 }
 0x40f   : > { %4512 = vmatprep.subr.bf16.mxu1 %v5117_v34 }
 0x410   : > { %4203 = vmatmul.mubr.msk.f32.gmra.mrb[16].mxu0 %vm350_vm0, %v1079_v35 }
 0x411   : > { %4205 = vmatprep.mubr.msk.f32.mxu0 %vm5118_vm4, %v5119_v37 }
 0x414   : > { %4206 = vmatmul.mubr.msk.f32.gmra.mrb[18].mxu0 %vm350_vm0, %v1081_v29 }
 0x415   : > { %4228 = vmatpush3.xpose.msk.msra.mxu0 %vm350_vm0, %v1326_v39  ;;  %4229 = vmatprep.mubr.msk.f32.mxu0 %vm5118_vm4, %v5119_v37 }
 0x416   : > { %4529 = vmatprep.subr.bf16.mxu0 %v5117_v34 }
 0x418   : > { %4230 = vmatmul.mubr.msk.f32.vlgmr.msra.gmra.mrb[20].mxu0 %vm350_vm0, %v1316_v33 }
 0x419   : > { %4232 = vmatprep.mubr.msk.f32.mxu0 %vm5118_vm4, %v5119_v37 }
 0x41c   : > { %4233 = vmatmul.mubr.msk.f32.gmra.mrb[22].mxu0 %vm350_vm0, %v1318_v43 }
 0x41d   : > { %4235 = vmatprep.mubr.msk.f32.mxu0 %vm5118_vm4, %v5119_v37 }
 0x420   : > { %4236 = vmatmul.mubr.msk.f32.gmra.mrb[24].mxu0 %vm350_vm0, %v1320_v38 }
 0x421   : > { %4261 = vmatprep.mubr.msk.f32.mxu0 %vm5118_vm4, %v5119_v37 }
 0x4c7   : > { %v686_v49 = vpop.f32.mrb[2].mxu0 }
 0x4c8   : > { %v5535_v50 = vmul.f32 0.17677669, %v686_v49  ;;  %v4141_v51 = vpop.f32.mrb[3].mxu0 }
 0x4ca   : > { %v704_v52 = vsel %vm703_vm6, %v5535_v50, -inf }
 0x4cb   : > { %705 = vmax.xlane.f32.xlu1 %v704_v52  ;;  %v691_v53 = vpop.f32.mrb[4].mxu0 }
 0x4cc   : > { %v5539_v54 = vmul.f32 0.17677669, %v691_v53  ;;  %v4144_v55 = vpop.f32.mrb[5].mxu0 }
 0x4ce   : > { %v707_v56 = vsel %vm703_vm6, %v5539_v54, -inf }
 0x4cf   : > { %708 = vmax.xlane.f32.xlu0 %v707_v56  ;;  %v696_v57 = vpop.f32.mrb[6].mxu0 }
 0x4d0   : > { %v5543_v58 = vmul.f32 0.17677669, %v696_v57  ;;  %v4147_v59 = vpop.f32.mrb[7].mxu0 }
 0x4d2   : > { %v711_v60 = vsel %vm710_vm7, %v5543_v58, -inf }
 0x4d3   : > { %712 = vmax.xlane.f32.xlu0 %v711_v60  ;;  %v927_v61 = vpop.f32.mrb[8].mxu0 }
 0x4d4   : > { %v5547_v62 = vmul.f32 0.17677669, %v927_v61  ;;  %v4171_v63 = vpop.f32.mrb[9].mxu0 }
 0x4d6   : > { %v944_v0 = vsel %vm703_vm6, %v5547_v62, -inf }
 0x4d7   : > { %945 = vmax.xlane.f32.xlu0 %v944_v0  ;;  %v932_v1 = vpop.f32.mrb[10].mxu0 }
 0x4d8   : > { %v5551_v2 = vmul.f32 0.17677669, %v932_v1  ;;  %v4174_v3 = vpop.f32.mrb[11].mxu0 }
 0x4da   : > { %v947_v4 = vsel %vm703_vm6, %v5551_v2, -inf }
 0x4db   : > { %948 = vmax.xlane.f32.xlu1 %v947_v4  ;;  %v937_v6 = vpop.f32.mrb[12].mxu0 }
 0x4dc   : > { %v5555_v9 = vmul.f32 0.17677669, %v937_v6  ;;  %v4177_v10 = vpop.f32.mrb[13].mxu0 }
 0x4de   : > { %v950_v11 = vsel %vm710_vm7, %v5555_v9, -inf }
 0x4df   : > { %951 = vmax.xlane.f32.xlu0 %v950_v11  ;;  %v1166_v13 = vpop.f32.mrb[14].mxu0 }
 0x4e0   : > { %v4201_v15 = vpop.f32.mrb[15].mxu0  ;;  %v5573_v33 = vmul.f32 0.17677669, %v1166_v13 }
 0x4e2   : > { %v1183_v36 = vsel %vm703_vm6, %v5573_v33, -inf }
 0x4e3   : > { %v1171_v17 = vpop.f32.mrb[16].mxu0 }
 0x4e4   : > { %v5559_v18 = vmul.f32 0.17677669, %v1171_v17  ;;  %v4204_v19 = vpop.f32.mrb[17].mxu0 }
 0x4e6   : > { %v1186_v20 = vsel %vm703_vm6, %v5559_v18, -inf }
 0x4e7   : > { %1187 = vmax.xlane.f32.xlu0 %v1186_v20  ;;  %v1176_v21 = vpop.f32.mrb[18].mxu0 }
 0x4e8   : > { %v4207_v22 = vpop.f32.mrb[19].mxu0  ;;  %v5577_v35 = vmul.f32 0.17677669, %v1176_v21 }
 0x4ea   : > { %v1189_v39 = vsel %vm710_vm7, %v5577_v35, -inf }
 0x4eb   : > { %v1405_v23 = vpop.f32.mrb[20].mxu0 }
 0x4ec   : > { %v5563_v24 = vmul.f32 0.17677669, %v1405_v23  ;;  %4725 = vrot.lane.b32.xlu1 %v5433_v5, %s5128_s24  ;;  %v4231_v25 = vpop.f32.mrb[21].mxu0 }
 0x4ee   : > { %v1422_v26 = vsel %vm703_vm6, %v5563_v24, -inf }
 0x4ef   : > { %1423 = vmax.xlane.f32.xlu0 %v1422_v26  ;;  %v1410_v27 = vpop.f32.mrb[22].mxu0 }
 0x4f0   : > { %v4234_v28 = vpop.f32.mrb[23].mxu0  ;;  %v5581_v38 = vmul.f32 0.17677669, %v1410_v27 }
 0x4f2   : > { %v1425_v40 = vsel %vm703_vm6, %v5581_v38, -inf }
 0x4f3   : > { %v1415_v29 = vpop.f32.mrb[24].mxu0 }
 0x4f4   : > { %v5569_v30 = vmul.f32 0.17677669, %v1415_v29  ;;  %v4237_v31 = vpop.f32.mrb[25].mxu0 }
 0x4f6   : > { %v1428_v32 = vsel %vm710_vm7, %v5569_v30, -inf }
 0x4f7   : > { %1429 = vmax.xlane.f32.xlu0 %v1428_v32 }
 0x50d   : > { %981 = vrot.lane.b32.xlu0 %v5435_v7, %s5128_s24 }
 0x510   : > { %1184 = vmax.xlane.f32.xlu1 %v1183_v36 }
 0x514   : > { %1190 = vmax.xlane.f32.xlu1 %v1189_v39 }
 0x518   : > { %1426 = vmax.xlane.f32.xlu1 %v1425_v40 }
 0x529   : > { %4730 = vrot.lane.b32.xlu1 %v5433_v5, %s6311_s22 }
 0x558   : > { %v706_v41 = vpop.xlane.xlu1 %705 }
 0x559   : > { %v714_v42 = vsub.f32 %v5535_v50, %v706_v41 }
 0x55b   : > { %v717_v43 = vmul.f32 1.442695, %v714_v42 }
 0x55c   : > { %v709_v44 = vpop.xlane.xlu0 %708 }
 0x55d   : > { %4785 = vpow2.f32 %v717_v43  ;;  %v715_v45 = vsub.f32 %v5539_v54, %v709_v44 }
 0x55f   : > { %v719_v46 = vmul.f32 1.442695, %v715_v45 }
 0x560   : > { %v713_v47 = vpop.xlane.xlu0 %712 }
 0x561   : > { %4787 = vpow2.f32 %v719_v46  ;;  %v716_v48 = vsub.f32 %v5543_v58, %v713_v47 }
 0x563   : > { %v721_v49 = vmul.f32 1.442695, %v716_v48 }
 0x564   : > { %v946_v51 = vpop.xlane.xlu0 %945 }
 0x565   : > { %4789 = vpow2.f32 %v721_v49  ;;  %v953_v52 = vsub.f32 %v5547_v62, %v946_v51 }
 0x567   : > { %v5593_v53 = vpop.eup %4785  ;;  %v956_v55 = vmul.f32 1.442695, %v953_v52 }
 0x568   : > { %v949_v56 = vpop.xlane.xlu1 %948  ;;  %v723_v50 = vsel %vm703_vm6, %v5593_v53, 0.0 }
 0x569   : > { %4791 = vpow2.f32 %v956_v55  ;;  %v954_v54 = vsub.f32 %v5551_v2, %v949_v56  ;;  %724 = vadd.xlane.f32.xlu1 %v723_v50 }
 0x56b   : > { %v5598_v57 = vpop.eup %4787  ;;  %v958_v59 = vmul.f32 1.442695, %v954_v54 }
 0x56c   : > { %v952_v58 = vpop.xlane.xlu0 %951  ;;  %v726_v60 = vsel %vm703_vm6, %v5598_v57, 0.0  ;;  %v4726_v23 = vpop.permute.xlu1 %4725 }
 0x56d   : > { %4793 = vpow2.f32 %v958_v59  ;;  %v955_v61 = vsub.f32 %v5555_v9, %v952_v58  ;;  %727 = vadd.xlane.f32.xlu0 %v726_v60  ;;  %v4728_v52 = vunpack.i.h.bf16 %v4726_v23  ;;  %v4727_v55 = vunpack.i.l.bf16 %v4726_v23 }
 0x56f   : > { %v5603_v62 = vpop.eup %4789  ;;  %v960_v63 = vmul.f32 1.442695, %v955_v61  ;;  %v4513_v59 = vpack.c.bf16 %v4728_v52, %v4727_v55  ;;  %v1602_v52 = vld [vmem:[#allocation5 + $0x8] sm:$0xff]  ;;  %v1603_v55 = vld [vmem:[#allocation5 + $0x10] sm:$0xff] }
 0x570   : > { %v729_v0 = vsel %vm710_vm7, %v5603_v62, 0.0 }
 0x571   : > { %4795 = vpow2.f32 %v960_v63  ;;  %730 = vadd.xlane.f32.xlu1 %v729_v0 }
 0x573   : > { %v5607_v1 = vpop.eup %4791 }
 0x574   : > { %v1188_v2 = vpop.xlane.xlu0 %1187  ;;  %v962_v3 = vsel %vm703_vm6, %v5607_v1, 0.0 }
 0x575   : > { %v1193_v4 = vsub.f32 %v5559_v18, %v1188_v2  ;;  %963 = vadd.xlane.f32.xlu0 %v962_v3 }
 0x577   : > { %v5612_v6 = vpop.eup %4793  ;;  %v1197_v9 = vmul.f32 1.442695, %v1193_v4 }
 0x578   : > { %v965_v10 = vsel %vm703_vm6, %v5612_v6, 0.0 }
 0x579   : > { %4797 = vpow2.f32 %v1197_v9  ;;  %966 = vadd.xlane.f32.xlu1 %v965_v10 }
 0x57b   : > { %v5616_v11 = vpop.eup %4795 }
 0x57c   : > { %v1424_v13 = vpop.xlane.xlu0 %1423  ;;  %v968_v15 = vsel %vm710_vm7, %v5616_v11, 0.0 }
 0x57d   : > { %v1431_v17 = vsub.f32 %v5563_v24, %v1424_v13  ;;  %969 = vadd.xlane.f32.xlu1 %v968_v15 }
 0x57f   : > { %v1434_v19 = vmul.f32 1.442695, %v1431_v17 }
 0x581   : > { %4799 = vpow2.f32 %v1434_v19 }
 0x583   : > { %v5621_v18 = vpop.eup %4797 }
 0x584   : > { %v1204_v20 = vsel %vm703_vm6, %v5621_v18, 0.0  ;;  %v1430_v39 = vpop.xlane.xlu0 %1429 }
 0x585   : > { %1205 = vadd.xlane.f32.xlu0 %v1204_v20 }
 0x588   : > { %v982_v47 = vpop.permute.xlu0 %981 }
 0x58b   : > { %v5625_v21 = vpop.eup %4799 }
 0x58c   : > { %v1440_v22 = vsel %vm703_vm6, %v5625_v21, 0.0 }
 0x58d   : > { %1441 = vadd.xlane.f32.xlu0 %v1440_v22 }
 0x59d   : > { %v1185_v25 = vpop.xlane.xlu1 %1184 }
 0x59e   : > { %v1192_v26 = vsub.f32 %v5573_v33, %v1185_v25  ;;  %v1433_v33 = vsub.f32 %v5569_v30, %v1430_v39 }
 0x5a0   : > { %v1195_v24 = vmul.f32 1.442695, %v1192_v26  ;;  %v1438_v42 = vmul.f32 1.442695, %v1433_v33 }
 0x5a1   : > { %v1191_v27 = vpop.xlane.xlu1 %1190 }
 0x5a2   : > { %4801 = vpow2.f32 %v1195_v24  ;;  %v1194_v28 = vsub.f32 %v5577_v35, %v1191_v27 }
 0x5a3   : > { %1220 = vrot.lane.b32.xlu0 %v5435_v7, %s6311_s22 }
 0x5a4   : > { %v1199_v29 = vmul.f32 1.442695, %v1194_v28 }
 0x5a5   : > { %v1427_v31 = vpop.xlane.xlu1 %1426 }
 0x5a6   : > { %4803 = vpow2.f32 %v1199_v29  ;;  %v1432_v32 = vsub.f32 %v5581_v38, %v1427_v31 }
 0x5a8   : > { %v1436_v36 = vmul.f32 1.442695, %v1432_v32 }
 0x5a9   : > { %v4731_v46 = vpop.permute.xlu1 %4730 }
 0x5aa   : > { %4805 = vpow2.f32 %v1436_v36  ;;  %v4733_v63 = vunpack.i.h.bf16 %v4731_v46  ;;  %v4732_v0 = vunpack.i.l.bf16 %v4731_v46 }
 0x5ab   : > { %4807 = vpow2.f32 %v1438_v42 }
 0x5ac   : > { %v5634_v40 = vpop.eup %4801  ;;  %v4520_v3 = vpack.c.bf16 %v4733_v63, %v4732_v0 }
 0x5ad   : > { %v1201_v41 = vsel %vm703_vm6, %v5634_v40, 0.0 }
 0x5ae   : > { %1202 = vadd.xlane.f32.xlu1 %v1201_v41 }
 0x5b0   : > { %v5639_v35 = vpop.eup %4803 }
 0x5b1   : > { %v1207_v43 = vsel %vm710_vm7, %v5639_v35, 0.0 }
 0x5b2   : > { %1208 = vadd.xlane.f32.xlu1 %v1207_v43 }
 0x5b4   : > { %v5643_v44 = vpop.eup %4805 }
 0x5b5   : > { %v1443_v38 = vsel %vm703_vm6, %v5643_v44, 0.0  ;;  %v5647_v45 = vpop.eup %4807 }
 0x5b6   : > { %1444 = vadd.xlane.f32.xlu1 %v1443_v38  ;;  %v1446_v30 = vsel %vm710_vm7, %v5647_v45, 0.0 }
 0x5c2   : > { %1447 = vadd.xlane.f32.xlu0 %v1446_v30 }
 0x5c7   : > { %4735 = vrot.lane.b32.xlu1 %v5433_v5, %s6309_s29 }
 0x5cb   : > { %1459 = vrot.lane.b32.xlu1 %v5435_v7, %s6309_s29  ;;  %s6244_s29 = scalar_lea.hbm %s6294_s8, %s6336_s17 }
 0x5f6   : > { %v725_v48 = vpop.xlane.xlu1 %724 }
 0x5f7   : > { %4809 = vrcp.f32 %v725_v48 }
 0x5fa   : > { %v728_v49 = vpop.xlane.xlu0 %727 }
 0x5fb   : > { %4811 = vrcp.f32 %v728_v49 }
 0x5fe   : > { %v731_v51 = vpop.xlane.xlu1 %730 }
 0x5ff   : > { %4813 = vrcp.f32 %v731_v51  ;;  %v1601_v51 = vld [vmem:[#allocation5] sm:$0xff] }
 0x601   : > { %v4810_v56 = vpop.eup %4809 }
 0x602   : > { %v733_v50 = vmul.f32 %v4810_v56, %v5593_v53  ;;  %v964_v54 = vpop.xlane.xlu0 %963  ;;  %v4530_v56 = vpack.c.bf16 %v1602_v52, %v1601_v51 }
 0x603   : > { %4815 = vrcp.f32 %v964_v54 }
 0x604   : > { %4155 = vmatmul.mubr.msk.f32.vlgmr.msra.gmra.mrb[6].mxu1 %vm703_vm6, %v733_v50  ;;  %v1604_v50 = vld [vmem:[#allocation5 + $0x18] sm:$0xff]  ;;  %4531 = vmatpush3.bf16.msra.mxu0 %v4530_v56 }
 0x605   : > { %v4812_v5 = vpop.eup %4811  ;;  %4514 = vmatpush3.bf16.msra.mxu1 %v4513_v59  ;;  %4157 = vmatprep.mubr.msk.f32.mxu1 %vm5118_vm4, %v5119_v37  ;;  %v4533_v54 = vpack.c.bf16 %v1604_v50, %v1603_v55 }
 0x606   : > { %v967_v7 = vpop.xlane.xlu1 %966  ;;  %4182 = vmatprep.subr.mxu1 %v5119_v37  ;;  %v735_v58 = vmul.f32 %v4812_v5, %v5598_v57  ;;  %4532 = vmatprep.subr.bf16.mxu0 %v5117_v34 }
 0x607   : > { %4817 = vrcp.f32 %v967_v7 }
 0x608   : > { %4158 = vmatmul.mubr.msk.f32.gmra.mrb[8].mxu1 %vm703_vm6, %v735_v58  ;;  %4534 = vmatpush3.bf16.msra.mxu0 %v4533_v54 }
 0x609   : > { %v4814_v60 = vpop.eup %4813  ;;  %4183 = vmatpush3.msk.msra.mxu1 %vm435_vm2, %v982_v47  ;;  %4160 = vmatprep.mubr.msk.f32.mxu1 %vm5118_vm4, %v5119_v37 }
 0x60a   : > { %v970_v53 = vpop.xlane.xlu1 %969  ;;  %v737_v61 = vmul.f32 %v4814_v60, %v5603_v62  ;;  %4519 = vmatprep.subr.bf16.mxu1 %v5117_v34  ;;  %4541 = vmatprep.subr.bf16.mxu0 %v5117_v34 }
 0x60b   : > { %4819 = vrcp.f32 %v970_v53 }
 0x60c   : > { %4161 = vmatmul.mubr.msk.f32.gmra.mrb[10].mxu1 %vm703_vm6, %v737_v61 }
 0x60d   : > { %v4816_v57 = vpop.eup %4815  ;;  %4184 = vmatprep.mubr.msk.f32.mxu1 %vm5118_vm4, %v5119_v37 }
 0x60e   : > { %v972_v2 = vmul.f32 %v4816_v57, %v5607_v1 }
 0x610   : > { %4185 = vmatmul.mubr.msk.f32.vlgmr.msra.gmra.mrb[12].mxu1 %vm703_vm6, %v972_v2 }
 0x611   : > { %v4818_v4 = vpop.eup %4817  ;;  %4521 = vmatpush3.bf16.msra.mxu1 %v4520_v3  ;;  %4187 = vmatprep.mubr.msk.f32.mxu1 %vm5118_vm4, %v5119_v37 }
 0x612   : > { %v974_v62 = vmul.f32 %v4818_v4, %v5612_v6  ;;  %4212 = vmatprep.subr.mxu1 %v5119_v37  ;;  %v1206_v10 = vpop.xlane.xlu0 %1205 }
 0x614   : > { %4188 = vmatmul.mubr.msk.f32.gmra.mrb[14].mxu1 %vm703_vm6, %v974_v62 }
 0x615   : > { %v4820_v9 = vpop.eup %4819  ;;  %4190 = vmatprep.mubr.msk.f32.mxu1 %vm5118_vm4, %v5119_v37 }
 0x616   : > { %v976_v1 = vmul.f32 %v4820_v9, %v5616_v11 }
 0x618   : > { %4191 = vmatmul.mubr.msk.f32.gmra.mrb[16].mxu1 %vm703_vm6, %v976_v1 }
 0x619   : > { %4214 = vmatprep.mubr.msk.f32.mxu1 %vm5118_vm4, %v5119_v37 }
 0x61a   : > { %v1442_v13 = vpop.xlane.xlu0 %1441 }
 0x61e   : > { %v1221_v15 = vpop.permute.xlu0 %1220 }
 0x61f   : > { %4213 = vmatpush3.msk.msra.mxu1 %vm435_vm2, %v1221_v15 }
 0x620   : > { %4526 = vmatprep.subr.bf16.mxu1 %v5117_v34 }
 0x63b   : > { %v1203_v6 = vpop.xlane.xlu1 %1202 }
 0x63c   : > { %4821 = vrcp.f32 %v1203_v6 }
 0x63d   : > { %4823 = vrcp.f32 %v1206_v10 }
 0x63f   : > { %v1209_v17 = vpop.xlane.xlu1 %1208 }
 0x640   : > { %4825 = vrcp.f32 %v1209_v17 }
 0x641   : > { %4827 = vrcp.f32 %v1442_v13 }
 0x643   : > { %v1445_v19 = vpop.xlane.xlu1 %1444 }
 0x644   : > { %4829 = vrcp.f32 %v1445_v19 }
 0x646   : > { %v4822_v20 = vpop.eup %4821 }
 0x647   : > { %v1211_v11 = vmul.f32 %v4822_v20, %v5634_v40  ;;  %v4736_v22 = vpop.permute.xlu1 %4735  ;;  %v4824_v23 = vpop.eup %4823 }
 0x648   : > { %v4738_v25 = vunpack.i.h.bf16 %v4736_v22  ;;  %v4737_v26 = vunpack.i.l.bf16 %v4736_v22  ;;  %v1213_v27 = vmul.f32 %v4824_v23, %v5621_v18 }
 0x649   : > { %4215 = vmatmul.mubr.msk.f32.vlgmr.msra.gmra.mrb[18].mxu1 %vm703_vm6, %v1211_v11 }
 0x64a   : > { %v4527_v24 = vpack.c.bf16 %v4738_v25, %v4737_v26  ;;  %4217 = vmatprep.mubr.msk.f32.mxu1 %vm5118_vm4, %v5119_v37  ;;  %v4826_v28 = vpop.eup %4825 }
 0x64b   : > { %v1460_v29 = vpop.permute.xlu1 %1459  ;;  %v1215_v32 = vmul.f32 %v4826_v28, %v5639_v35  ;;  %v4828_v36 = vpop.eup %4827 }
 0x64c   : > { %4528 = vmatpush3.bf16.msra.mxu1 %v4527_v24  ;;  %v1450_v18 = vmul.f32 %v4828_v36, %v5625_v21 }
 0x64d   : > { %4218 = vmatmul.mubr.msk.f32.gmra.mrb[20].mxu1 %vm703_vm6, %v1213_v27  ;;  %4242 = vmatprep.subr.mxu1 %v5119_v37 }
 0x64e   : > { %4220 = vmatprep.mubr.msk.f32.mxu1 %vm5118_vm4, %v5119_v37  ;;  %v4830_v39 = vpop.eup %4829 }
 0x64f   : > { %v1448_v31 = vpop.xlane.xlu0 %1447  ;;  %v1452_v40 = vmul.f32 %v4830_v39, %v5643_v44 }
 0x650   : > { %4831 = vrcp.f32 %v1448_v31  ;;  %4243 = vmatpush3.msk.msra.mxu1 %vm435_vm2, %v1460_v29  ;;  %v3872_v29 = vld [vmem:[%s6287_s1 + $0x6] ss:$0 sm:$0xff] }
 0x651   : > { %4221 = vmatmul.mubr.msk.f32.gmra.mrb[22].mxu1 %vm703_vm6, %v1215_v32  ;;  %4535 = vmatprep.subr.bf16.mxu1 %v5117_v34 }
 0x652   : > { %4244 = vmatprep.mubr.msk.f32.mxu1 %vm5118_vm4, %v5119_v37 }
 0x655   : > { %4245 = vmatmul.mubr.msk.f32.vlgmr.msra.gmra.mrb[24].mxu1 %vm703_vm6, %v1450_v18 }
 0x656   : > { %4247 = vmatprep.mubr.msk.f32.mxu1 %vm5118_vm4, %v5119_v37 }
 0x659   : > { %4248 = vmatmul.mubr.msk.f32.gmra.mrb[26].mxu1 %vm703_vm6, %v1452_v40 }
 0x65a   : > { %v4832_v33 = vpop.eup %4831  ;;  %4250 = vmatprep.mubr.msk.f32.mxu1 %vm5118_vm4, %v5119_v37 }
 0x65b   : > { %v1454_v41 = vmul.f32 %v4832_v33, %v5647_v45 }
 0x65d   : > { %4251 = vmatmul.mubr.msk.f32.gmra.mrb[28].mxu1 %vm703_vm6, %v1454_v41 }
 0x65e   : > { %4278 = vmatprep.mubr.msk.f32.mxu1 %vm5118_vm4, %v5119_v37 }
 0x6d7   : > { %v823_v21 = vpop.f32.mrb[6].mxu1 }
 0x6d8   : > { %v4156_v35 = vpop.f32.mrb[7].mxu1 }
 0x6db   : > { %v828_v42 = vpop.f32.mrb[8].mxu1 }
 0x6dc   : > { %v4159_v43 = vpop.f32.mrb[9].mxu1 }
 0x6df   : > { %v5712_v38 = vpop.f32.mrb[10].mxu1 }
 0x6e0   : > { %v4162_v44 = vpop.f32.mrb[11].mxu1 }
 0x6e3   : > { %v1062_v30 = vpop.f32.mrb[12].mxu1 }
 0x6e4   : > { %1557 = vrot.lane.b32.xlu1 %v1062_v30, %s6307_s20  ;;  %v4186_v46 = vpop.f32.mrb[13].mxu1 }
 0x6e7   : > { %v1067_v47 = vpop.f32.mrb[14].mxu1 }
 0x6e8   : > { %1559 = vrot.lane.b32.xlu1 %v1067_v47, %s6307_s20  ;;  %v4189_v45 = vpop.f32.mrb[15].mxu1 }
 0x6eb   : > { %v1072_v48 = vpop.f32.mrb[16].mxu1 }
 0x6ec   : > { %v4192_v49 = vpop.f32.mrb[17].mxu1 }
 0x71c   : > { %v1301_v59 = vpop.f32.mrb[18].mxu1 }
 0x71d   : > { %1569 = vrot.lane.b32.xlu1 %v1301_v59, %s6305_s18  ;;  %v4216_v5 = vpop.f32.mrb[19].mxu1  ;;  %v1760_v59 = vld [vmem:[%s6291_s5] sm:$0xff] }
 0x71e   : > { %v1761_v5 = vld [vmem:[%s6291_s5 + $0x8] sm:$0xff] }
 0x720   : > { %v1306_v7 = vpop.f32.mrb[20].mxu1 }
 0x721   : > { %v4219_v58 = vpop.f32.mrb[21].mxu1 }
 0x722   : > { %v1762_v58 = vld [vmem:[%s6291_s5 + $0x10] sm:$0xff] }
 0x724   : > { %v1311_v60 = vpop.f32.mrb[22].mxu1 }
 0x725   : > { %v4222_v53 = vpop.f32.mrb[23].mxu1 }
 0x728   : > { %v1540_v61 = vpop.f32.mrb[24].mxu1 }
 0x729   : > { %1581 = vrot.lane.b32.xlu1 %v1540_v61, %s6303_s26  ;;  %v4246_v63 = vpop.f32.mrb[25].mxu1 }
 0x72c   : > { %v1545_v0 = vpop.f32.mrb[26].mxu1 }
 0x72d   : > { %1571 = vrot.lane.b32.xlu1 %v1306_v7, %s6305_s18  ;;  %1583 = vrot.lane.b32.xlu0 %v1545_v0, %s6303_s26  ;;  %v4249_v57 = vpop.f32.mrb[27].mxu1  ;;  %v4536_v7 = vpack.c.bf16 %v1761_v5, %v1760_v59 }
 0x72f   : > { %4537 = vmatpush3.bf16.msra.mxu1 %v4536_v7 }
 0x730   : > { %v1550_v2 = vpop.f32.mrb[28].mxu1  ;;  %4538 = vmatprep.subr.bf16.mxu1 %v5117_v34 }
 0x731   : > { %1561 = vrot.lane.b32.xlu1 %v1072_v48, %s6307_s20  ;;  %v4252_v3 = vpop.f32.mrb[29].mxu1 }
 0x735   : > { %1573 = vrot.lane.b32.xlu1 %v1311_v60, %s6305_s18  ;;  %v1763_v60 = vld [vmem:[%s6291_s5 + $0x18] sm:$0xff] }
 0x736   : > { %v4539_v53 = vpack.c.bf16 %v1763_v60, %v1762_v58 }
 0x738   : > { %4540 = vmatpush3.bf16.msra.mxu1 %v4539_v53 }
 0x739   : > { %1585 = vrot.lane.b32.xlu1 %v1550_v2, %s6303_s26  ;;  %4544 = vmatprep.subr.bf16.mxu1 %v5117_v34 }
 0x756   : > { %v1558_v4 = vpop.permute.xlu1 %1557 }
 0x757   : > { %v1590_v10 = vsel %vm350_vm0, %v823_v21, %v1558_v4 }
 0x75a   : > { %v1560_v62 = vpop.permute.xlu1 %1559 }
 0x75b   : > { %v1591_v6 = vsel %vm350_vm0, %v828_v42, %v1560_v62  ;;  %v3873_v62 = vld [vmem:[%s6287_s1 + $0x7] ss:$0 sm:$0xff] }
 0x78f   : > { %v1570_v9 = vpop.permute.xlu1 %1569 }
 0x790   : > { %v1594_v1 = vsel %vm1593_vm8, %v1590_v10, %v1570_v9 }
 0x79b   : > { %v1582_v13 = vpop.permute.xlu1 %1581 }
 0x79c   : > { %v1598_v15 = vsel %vm1597_vm9, %v1594_v1, %v1582_v13  ;;  %v3874_v1 = vld [vmem:[%s6287_s1 + $0x8] ss:$0 sm:$0xff] }
 0x79d   : > { %4262 = vmatmul.mubr.msk.f32.vlgmr.msra.gmra.mrb[26].mxu0 %vm445_vm3, %v1598_v15 }
 0x79e   : > { %4264 = vmatprep.mubr.msk.f32.mxu0 %vm5118_vm4, %v5119_v37 }
 0x79f   : > { %v1572_v17 = vpop.permute.xlu1 %1571  ;;  %v1584_v19 = vpop.permute.xlu0 %1583 }
 0x7a0   : > { %v1595_v20 = vsel %vm1593_vm8, %v1591_v6, %v1572_v17 }
 0x7a1   : > { %v1599_v11 = vsel %vm1597_vm9, %v1595_v20, %v1584_v19 }
 0x7a2   : > { %4265 = vmatmul.mubr.msk.f32.gmra.mrb[28].mxu0 %vm445_vm3, %v1599_v11 }
 0x7a3   : > { %v1562_v22 = vpop.permute.xlu1 %1561  ;;  %4267 = vmatprep.mubr.msk.f32.mxu0 %vm5118_vm4, %v5119_v37 }
 0x7a4   : > { %v1592_v25 = vsel %vm350_vm0, %v5712_v38, %v1562_v22 }
 0x7a7   : > { %v1574_v23 = vpop.permute.xlu1 %1573 }
 0x7a8   : > { %v1596_v26 = vsel %vm1593_vm8, %v1592_v25, %v1574_v23 }
 0x7ab   : > { %v1586_v24 = vpop.permute.xlu1 %1585 }
 0x7ac   : > { %v1600_v27 = vsel %vm1597_vm9, %v1596_v26, %v1586_v24 }
 0x7ad   : > { %4268 = vmatmul.mubr.msk.f32.gmra.mrb[30].mxu0 %vm445_vm3, %v1600_v27  ;;  %v1939_v27 = vld [vmem:[#allocation7] sm:$0xff] }
 0x7ae   : > { %4291 = vmatprep.mubr.msk.f32.mxu0 %vm5118_vm4, %v5119_v37 }
 0x870   : > { %v1680_v28 = vpop.f32.mrb[26].mxu0 }
 0x871   : > { %v1694_v31 = vadd.f32 %v1680_v28, %v5379_v12  ;;  %v4263_v32 = vpop.f32.mrb[27].mxu0  ;;  %v1940_v28 = vld [vmem:[#allocation7 + $0x8] sm:$0xff] }
 0x873   : > { %v5748_v36 = vadd.f32 %v3872_v29, %v1694_v31  ;;  %v3875_v31 = vld [vmem:[%s6287_s1 + $0x9] ss:$0 sm:$0xff] }
 0x875   : > { %v1685_v18 = vpop.f32.mrb[28].mxu0  ;;  %v1707_v39 = vsel %vm445_vm3, %v5748_v36, 0.0 }
 0x876   : > { %v1695_v40 = vadd.f32 %v1685_v18, %v5385_v14  ;;  %v4266_v33 = vpop.f32.mrb[29].mxu0  ;;  %1708 = vadd.xlane.f32.xlu1 %v1707_v39 }
 0x878   : > { %v5753_v41 = vadd.f32 %v3872_v29, %v1695_v40 }
 0x87a   : > { %v1710_v21 = vsel %vm445_vm3, %v5753_v41, 0.0 }
 0x87b   : > { %1711 = vadd.xlane.f32.xlu0 %v1710_v21 }
 0x880   : > { %v1690_v35 = vpop.f32.mrb[30].mxu0 }
 0x881   : > { %v1696_v12 = vadd.f32 %v1690_v35, %v5371_v8  ;;  %v4269_v42 = vpop.f32.mrb[31].mxu0 }
 0x883   : > { %v5758_v43 = vadd.f32 %v3872_v29, %v1696_v12  ;;  %v4542_v29 = vpack.c.bf16 %v1940_v28, %v1939_v27 }
 0x885   : > { %v1713_v38 = vsel %vm452_vm1, %v5758_v43, 0.0  ;;  %4543 = vmatpush3.bf16.msra.mxu0 %v4542_v29  ;;  %v5134_v29 = vmov -1.0  }
 0x886   : > { %1714 = vadd.xlane.f32.xlu1 %v1713_v38  ;;  %4550 = vmatprep.subr.bf16.mxu0 %v5117_v34 }
 0x903   : > { %v1709_v44 = vpop.xlane.xlu1 %1708 }
 0x904   : > { %v1716_v14 = vmul.f32 0.03125, %v1709_v44 }
 0x906   : > { %v1719_v30 = vsub.f32 %v5748_v36, %v1716_v14 }
 0x908   : > { %v1712_v46 = vpop.xlane.xlu0 %1711  ;;  %v1722_v47 = vmul.f32 %v1719_v30, %v1719_v30 }
 0x909   : > { %v1717_v45 = vmul.f32 0.03125, %v1712_v46 }
 0x90a   : > { %v1725_v48 = vsel %vm445_vm3, %v1722_v47, 0.0 }
 0x90b   : > { %v1720_v49 = vsub.f32 %v5753_v41, %v1717_v45  ;;  %1726 = vadd.xlane.f32.xlu1 %v1725_v48 }
 0x90d   : > { %v1723_v8 = vmul.f32 %v1720_v49, %v1720_v49 }
 0x90f   : > { %v1728_v51 = vsel %vm445_vm3, %v1723_v8, 0.0 }
 0x910   : > { %1729 = vadd.xlane.f32.xlu0 %v1728_v51 }
 0x913   : > { %v1715_v52 = vpop.xlane.xlu1 %1714 }
 0x914   : > { %v1718_v55 = vmul.f32 0.03125, %v1715_v52 }
 0x916   : > { %v1721_v56 = vsub.f32 %v5758_v43, %v1718_v55 }
 0x918   : > { %v1724_v50 = vmul.f32 %v1721_v56, %v1721_v56 }
 0x91a   : > { %v1731_v54 = vsel %vm452_vm1, %v1724_v50, 0.0 }
 0x91b   : > { %1732 = vadd.xlane.f32.xlu1 %v1731_v54 }
 0x998   : > { %v1727_v61 = vpop.xlane.xlu1 %1726 }
 0x999   : > { %v1734_v63 = vmul.f32 0.03125, %v1727_v61 }
 0x99b   : > { %v1737_v0 = vadd.f32 1e-05, %v1734_v63 }
 0x99d   : > { %4833 = vrsqrt.f32 %v1737_v0  ;;  %v1730_v57 = vpop.xlane.xlu0 %1729 }
 0x99e   : > { %v1735_v2 = vmul.f32 0.03125, %v1730_v57 }
 0x9a0   : > { %v1738_v3 = vadd.f32 1e-05, %v1735_v2 }
 0x9a2   : > { %4835 = vrsqrt.f32 %v1738_v3 }
 0x9a7   : > { %v4834_v4 = vpop.eup %4833 }
 0x9a8   : > { %v1743_v9 = vmul.f32 %v4834_v4, %v1719_v30  ;;  %v1733_v10 = vpop.xlane.xlu1 %1732 }
 0x9a9   : > { %v1736_v13 = vmul.f32 0.03125, %v1733_v10 }
 0x9aa   : > { %v1750_v15 = vmul.f32 %v3873_v62, %v1743_v9 }
 0x9ab   : > { %v1739_v6 = vadd.f32 1e-05, %v1736_v13 }
 0x9ac   : > { %v4836_v17 = vpop.eup %4835  ;;  %v1757_v19 = vadd.f32 %v3874_v1, %v1750_v15 }
 0x9ad   : > { %4837 = vrsqrt.f32 %v1739_v6  ;;  %v1744_v20 = vmul.f32 %v4836_v17, %v1720_v49 }
 0x9ae   : > { %4279 = vmatmul.mubr.msk.f32.vlgmr.msra.gmra.mrb[30].mxu1 %vm445_vm3, %v1757_v19 }
 0x9af   : > { %4281 = vmatprep.mubr.msk.f32.mxu1 %vm5118_vm4, %v5119_v37  ;;  %v1751_v11 = vmul.f32 %v3873_v62, %v1744_v20 }
 0x9b1   : > { %v1758_v22 = vadd.f32 %v3874_v1, %v1751_v11 }
 0x9b3   : > { %4282 = vmatmul.mubr.msk.f32.gmra.mrb[32].mxu1 %vm445_vm3, %v1758_v22 }
 0x9b4   : > { %4284 = vmatprep.mubr.msk.f32.mxu1 %vm5118_vm4, %v5119_v37 }
 0x9b7   : > { %v4838_v23 = vpop.eup %4837 }
 0x9b8   : > { %v1745_v25 = vmul.f32 %v4838_v23, %v1721_v56 }
 0x9ba   : > { %v1752_v26 = vmul.f32 %v3873_v62, %v1745_v25 }
 0x9bc   : > { %v1759_v24 = vadd.f32 %v3874_v1, %v1752_v26 }
 0x9be   : > { %4285 = vmatmul.mubr.msk.f32.gmra.mrb[34].mxu1 %vm445_vm3, %v1759_v24 }
 0x9bf   : > { %4308 = vmatprep.mubr.msk.f32.mxu1 %vm5118_vm4, %v5119_v37 }
 0xa81   : > { %v1844_v32 = vpop.f32.mrb[30].mxu1 }
 0xa82   : > { %v5801_v18 = vadd.f32 %v3875_v31, %v1844_v32  ;;  %v4280_v39 = vpop.f32.mrb[31].mxu1 }
 0xa84   : > { %v1861_v40 = vmul.f32 0.70710677, %v5801_v18 }
 0xa86   : > { %v1870_v33 = vand.u32 2147483647, %v1861_v40  ;;  %v1849_v21 = vpop.f32.mrb[32].mxu1  ;;  %vm1864_vm10 = vcmp.ge.f32.partialorder %v1861_v40, 0.0 }
 0xa87   : > { %v5804_v35 = vadd.f32 %v3875_v31, %v1849_v21  ;;  %v4283_v12 = vpop.f32.mrb[33].mxu1 }
 0xa88   : > { %v1873_v42 = vmul.f32 0.3275911, %v1870_v33  ;;  %v1912_v45 = vsub.f32 0.0, %v1870_v33 }
 0xa89   : > { %v5807_v38 = vmul.f32 0.70710677, %v5804_v35 }
 0xa8a   : > { %v1876_v44 = vadd.f32 1.0, %v1873_v42  ;;  %v1915_v52 = vmul.f32 %v1912_v45, %v1870_v33  ;;  %v1858_v42 = vmul.f32 0.5, %v5801_v18 }
 0xa8b   : > { %v1871_v14 = vand.u32 2147483647, %v5807_v38  ;;  %vm1865_vm11 = vcmp.ge.f32.partialorder %v5807_v38, 0.0 }
 0xa8c   : > { %4839 = vrcp.f32 %v1876_v44  ;;  %v1918_v5 = vmul.f32 1.442695, %v1915_v52 }
 0xa8d   : > { %v1874_v30 = vmul.f32 0.3275911, %v1871_v14  ;;  %v1913_v50 = vsub.f32 0.0, %v1871_v14 }
 0xa8f   : > { %v1877_v46 = vadd.f32 1.0, %v1874_v30  ;;  %v1916_v53 = vmul.f32 %v1913_v50, %v1871_v14 }
 0xa91   : > { %4841 = vrcp.f32 %v1877_v46  ;;  %v1854_v47 = vpop.f32.mrb[34].mxu1  ;;  %v1920_v2 = vmul.f32 1.442695, %v1916_v53  ;;  %v1868_v46 = vsel %vm1865_vm11, 1.0, %v5134_v29 }
 0xa92   : > { %v5810_v48 = vadd.f32 %v3875_v31, %v1854_v47  ;;  %v4286_v49 = vpop.f32.mrb[35].mxu1  ;;  %v1867_v31 = vsel %vm1864_vm10, 1.0, %v5134_v29 }
 0xa94   : > { %v5813_v8 = vmul.f32 0.70710677, %v5810_v48 }
 0xa96   : > { %v4840_v51 = vpop.eup %4839  ;;  %v1872_v55 = vand.u32 2147483647, %v5813_v8  ;;  %vm1866_vm12 = vcmp.ge.f32.partialorder %v5813_v8, 0.0  ;;  %v3882_v8 = vld [vmem:[%s6287_s1 + $0xa] ss:$0 sm:$0xff] }
 0xa97   : > { %v1885_v56 = vmul.f32 1.0614054, %v4840_v51 }
 0xa98   : > { %v1875_v54 = vmul.f32 0.3275911, %v1872_v55  ;;  %v1914_v9 = vsub.f32 0.0, %v1872_v55 }
 0xa99   : > { %v1888_v59 = vadd.f32 -1.4531521, %v1885_v56 }
 0xa9a   : > { %v1878_v7 = vadd.f32 1.0, %v1875_v54  ;;  %v1917_v17 = vmul.f32 %v1914_v9, %v1872_v55 }
 0xa9b   : > { %v4842_v58 = vpop.eup %4841  ;;  %v1891_v60 = vmul.f32 %v4840_v51, %v1888_v59  ;;  %v1869_v59 = vsel %vm1866_vm12, 1.0, %v5134_v29 }
 0xa9c   : > { %v1886_v61 = vmul.f32 1.0614054, %v4842_v58  ;;  %4843 = vrcp.f32 %v1878_v7  ;;  %v1922_v24 = vmul.f32 1.442695, %v1917_v17 }
 0xa9d   : > { %v1894_v63 = vadd.f32 1.4214138, %v1891_v60  ;;  %4845 = vpow2.f32 %v1918_v5  ;;  %v1860_v5 = vmul.f32 0.5, %v5810_v48 }
 0xa9e   : > { %v1889_v0 = vadd.f32 -1.4531521, %v1886_v61  ;;  %4847 = vpow2.f32 %v1920_v2 }
 0xa9f   : > { %v1897_v57 = vmul.f32 %v4840_v51, %v1894_v63  ;;  %4849 = vpow2.f32 %v1922_v24 }
 0xaa0   : > { %v1892_v3 = vmul.f32 %v4842_v58, %v1889_v0 }
 0xaa1   : > { %v1900_v4 = vadd.f32 -0.28449672, %v1897_v57 }
 0xaa2   : > { %v1895_v62 = vadd.f32 1.4214138, %v1892_v3 }
 0xaa3   : > { %v1903_v10 = vmul.f32 %v4840_v51, %v1900_v4 }
 0xaa4   : > { %v1898_v1 = vmul.f32 %v4842_v58, %v1895_v62 }
 0xaa5   : > { %v1906_v13 = vadd.f32 0.2548296, %v1903_v10 }
 0xaa6   : > { %v4844_v15 = vpop.eup %4843  ;;  %v1901_v6 = vadd.f32 -0.28449672, %v1898_v1 }
 0xaa7   : > { %v1909_v19 = vmul.f32 %v4840_v51, %v1906_v13  ;;  %v1887_v20 = vmul.f32 1.0614054, %v4844_v15  ;;  %v4846_v11 = vpop.eup %4845  ;;  %v1859_v51 = vmul.f32 0.5, %v5804_v35 }
 0xaa8   : > { %v1904_v22 = vmul.f32 %v4842_v58, %v1901_v6  ;;  %v4848_v39 = vpop.eup %4847 }
 0xaa9   : > { %v1924_v23 = vmul.f32 %v4846_v11, %v1909_v19  ;;  %v1890_v25 = vadd.f32 -1.4531521, %v1887_v20  ;;  %v4850_v56 = vpop.eup %4849 }
 0xaaa   : > { %v1907_v26 = vadd.f32 0.2548296, %v1904_v22 }
 0xaab   : > { %v1927_v27 = vsub.f32 1.0, %v1924_v23  ;;  %v1893_v28 = vmul.f32 %v4844_v15, %v1890_v25 }
 0xaac   : > { %v1910_v32 = vmul.f32 %v4842_v58, %v1907_v26 }
 0xaad   : > { %v1930_v33 = vmul.f32 %v1927_v27, %v1867_v31  ;;  %v1896_v21 = vadd.f32 1.4214138, %v1893_v28  ;;  %v3885_v28 = vld [vmem:[%s6289_s3 + $0x20] sm:$0xff]  ;;  %v3886_v31 = vld [vmem:[%s6289_s3 + $0x28] sm:$0xff] }
 0xaae   : > { %v1925_v12 = vmul.f32 %v4848_v39, %v1910_v32  ;;  %v4545_v32 = vpack.c.bf16 %v3886_v31, %v3885_v28  ;;  %v3887_v39 = vld [vmem:[%s6289_s3 + $0x30] sm:$0xff] }
 0xaaf   : > { %v1933_v40 = vadd.f32 1.0, %v1930_v33  ;;  %v1899_v44 = vmul.f32 %v4844_v15, %v1896_v21  ;;  %v3888_v33 = vld [vmem:[%s6289_s3 + $0x38] sm:$0xff] }
 0xab0   : > { %v1928_v14 = vsub.f32 1.0, %v1925_v12  ;;  %4546 = vmatpush3.bf16.msra.mxu1 %v4545_v32  ;;  %v4548_v21 = vpack.c.bf16 %v3888_v33, %v3887_v39 }
 0xab1   : > { %v1936_v30 = vmul.f32 %v1933_v40, %v1858_v42  ;;  %v1902_v47 = vadd.f32 -0.28449672, %v1899_v44  ;;  %4547 = vmatprep.subr.bf16.mxu1 %v5117_v34 }
 0xab2   : > { %v1931_v45 = vmul.f32 %v1928_v14, %v1868_v46 }
 0xab3   : > { %v1905_v49 = vmul.f32 %v4844_v15, %v1902_v47  ;;  %4292 = vmatmul.mubr.msk.f32.vlgmr.msra.gmra.mrb[32].mxu0 %vm1593_vm8, %v1936_v30  ;;  %v3883_v47 = vld [vmem:[%s6287_s1 + $0xb] ss:$0 sm:$0xff] }
 0xab4   : > { %v1934_v52 = vadd.f32 1.0, %v1931_v45  ;;  %4294 = vmatprep.mubr.msk.f32.mxu0 %vm5118_vm4, %v5119_v37  ;;  %4549 = vmatpush3.bf16.msra.mxu1 %v4548_v21 }
 0xab5   : > { %v1908_v38 = vadd.f32 0.2548296, %v1905_v49  ;;  %4554 = vmatprep.subr.bf16.mxu1 %v5117_v34 }
 0xab6   : > { %v1937_v55 = vmul.f32 %v1934_v52, %v1859_v51  ;;  %v3884_v51 = vld [vmem:[%s6287_s1 + $0xc] ss:$0 sm:$0xff] }
 0xab7   : > { %v1911_v18 = vmul.f32 %v4844_v15, %v1908_v38 }
 0xab8   : > { %4295 = vmatmul.mubr.msk.f32.gmra.mrb[34].mxu0 %vm1593_vm8, %v1937_v55 }
 0xab9   : > { %v1926_v50 = vmul.f32 %v4850_v56, %v1911_v18  ;;  %4297 = vmatprep.mubr.msk.f32.mxu0 %vm5118_vm4, %v5119_v37 }
 0xabb   : > { %v1929_v54 = vsub.f32 1.0, %v1926_v50 }
 0xabd   : > { %v1932_v35 = vmul.f32 %v1929_v54, %v1869_v59 }
 0xabf   : > { %v1935_v7 = vadd.f32 1.0, %v1932_v35 }
 0xac1   : > { %v1938_v58 = vmul.f32 %v1935_v7, %v1860_v5 }
 0xac3   : > { %4298 = vmatmul.mubr.msk.f32.gmra.mrb[36].mxu0 %vm1593_vm8, %v1938_v58 }
 0xac4   : > { %4323 = vmatprep.mubr.msk.f32.mxu0 %vm5118_vm4, %v5119_v37 }
 0xb86   : > { %v2016_v60 = vpop.f32.mrb[32].mxu0 }
 0xb87   : > { %v2030_v53 = vadd.f32 %v2016_v60, %v5748_v36  ;;  %v4293_v61 = vpop.f32.mrb[33].mxu0 }
 0xb89   : > { %v5837_v63 = vadd.f32 %v3882_v8, %v2030_v53  ;;  %v3889_v53 = vld [vmem:[%s6287_s1 + $0xd] ss:$0 sm:$0xff] }
 0xb8b   : > { %v2021_v0 = vpop.f32.mrb[34].mxu0  ;;  %v2043_v48 = vsel %vm445_vm3, %v5837_v63, 0.0 }
 0xb8c   : > { %v2031_v57 = vadd.f32 %v2021_v0, %v5753_v41  ;;  %2044 = vadd.xlane.f32.xlu0 %v2043_v48  ;;  %v4296_v2 = vpop.f32.mrb[35].mxu0 }
 0xb8e   : > { %v5842_v3 = vadd.f32 %v3882_v8, %v2031_v57 }
 0xb90   : > { %v2046_v4 = vsel %vm445_vm3, %v5842_v3, 0.0 }
 0xb91   : > { %2047 = vadd.xlane.f32.xlu1 %v2046_v4 }
 0xb96   : > { %v2026_v62 = vpop.f32.mrb[36].mxu0 }
 0xb97   : > { %v2032_v36 = vadd.f32 %v2026_v62, %v5758_v43  ;;  %v4299_v9 = vpop.f32.mrb[37].mxu0 }
 0xb99   : > { %v5847_v10 = vadd.f32 %v3882_v8, %v2032_v36 }
 0xb9b   : > { %v2049_v1 = vsel %vm452_vm1, %v5847_v10, 0.0 }
 0xb9c   : > { %2050 = vadd.xlane.f32.xlu0 %v2049_v1 }
 0xc19   : > { %v2045_v13 = vpop.xlane.xlu0 %2044 }
 0xc1a   : > { %v2052_v41 = vmul.f32 0.03125, %v2045_v13 }
 0xc1c   : > { %v2055_v15 = vsub.f32 %v5837_v63, %v2052_v41 }
 0xc1e   : > { %v2048_v6 = vpop.xlane.xlu1 %2047  ;;  %v2058_v17 = vmul.f32 %v2055_v15, %v2055_v15 }
 0xc1f   : > { %v2053_v19 = vmul.f32 0.03125, %v2048_v6 }
 0xc20   : > { %v2061_v20 = vsel %vm445_vm3, %v2058_v17, 0.0 }
 0xc21   : > { %v2056_v11 = vsub.f32 %v5842_v3, %v2053_v19  ;;  %2062 = vadd.xlane.f32.xlu1 %v2061_v20 }
 0xc23   : > { %v2059_v43 = vmul.f32 %v2056_v11, %v2056_v11 }
 0xc25   : > { %v2064_v22 = vsel %vm445_vm3, %v2059_v43, 0.0 }
 0xc26   : > { %2065 = vadd.xlane.f32.xlu0 %v2064_v22 }
 0xc29   : > { %v2051_v23 = vpop.xlane.xlu0 %2050 }
 0xc2a   : > { %v2054_v25 = vmul.f32 0.03125, %v2051_v23 }
 0xc2c   : > { %v2057_v26 = vsub.f32 %v5847_v10, %v2054_v25 }
 0xc2e   : > { %v2060_v24 = vmul.f32 %v2057_v26, %v2057_v26 }
 0xc30   : > { %v2067_v27 = vsel %vm452_vm1, %v2060_v24, 0.0 }
 0xc31   : > { %2068 = vadd.xlane.f32.xlu1 %v2067_v27 }
 0xcae   : > { %v2063_v12 = vpop.xlane.xlu1 %2062 }
 0xcaf   : > { %v2070_v42 = vmul.f32 0.03125, %v2063_v12 }
 0xcb1   : > { %v2073_v40 = vadd.f32 1e-05, %v2070_v42 }
 0xcb3   : > { %4851 = vrsqrt.f32 %v2073_v40  ;;  %v2066_v44 = vpop.xlane.xlu0 %2065 }
 0xcb4   : > { %v2071_v14 = vmul.f32 0.03125, %v2066_v44 }
 0xcb6   : > { %v2074_v30 = vadd.f32 1e-05, %v2071_v14 }
 0xcb8   : > { %4853 = vrsqrt.f32 %v2074_v30 }
 0xcbd   : > { %v4852_v46 = vpop.eup %4851 }
 0xcbe   : > { %v2079_v45 = vmul.f32 %v4852_v46, %v2055_v15  ;;  %v2069_v49 = vpop.xlane.xlu1 %2068 }
 0xcbf   : > { %v2072_v52 = vmul.f32 0.03125, %v2069_v49 }
 0xcc0   : > { %v2086_v38 = vmul.f32 %v3883_v47, %v2079_v45 }
 0xcc1   : > { %v2075_v55 = vadd.f32 1e-05, %v2072_v52 }
 0xcc2   : > { %v4854_v18 = vpop.eup %4853  ;;  %v2093_v56 = vadd.f32 %v3884_v51, %v2086_v38 }
 0xcc3   : > { %4855 = vrsqrt.f32 %v2075_v55  ;;  %v2080_v50 = vmul.f32 %v4854_v18, %v2056_v11 }
 0xcc4   : > { %4309 = vmatmul.mubr.msk.f32.vlgmr.msra.gmra.mrb[36].mxu1 %vm445_vm3, %v2093_v56 }
 0xcc5   : > { %4311 = vmatprep.mubr.msk.f32.mxu1 %vm5118_vm4, %v5119_v37  ;;  %v2087_v54 = vmul.f32 %v3883_v47, %v2080_v50 }
 0xcc7   : > { %v2094_v59 = vadd.f32 %v3884_v51, %v2087_v54 }
 0xcc9   : > { %4312 = vmatmul.mubr.msk.f32.gmra.mrb[38].mxu1 %vm445_vm3, %v2094_v59 }
 0xcca   : > { %4314 = vmatprep.mubr.msk.f32.mxu1 %vm5118_vm4, %v5119_v37 }
 0xccd   : > { %v4856_v35 = vpop.eup %4855 }
 0xcce   : > { %v2081_v5 = vmul.f32 %v4856_v35, %v2057_v26 }
 0xcd0   : > { %v2088_v7 = vmul.f32 %v3883_v47, %v2081_v5 }
 0xcd2   : > { %v2095_v58 = vadd.f32 %v3884_v51, %v2088_v7 }
 0xcd4   : > { %4315 = vmatmul.mubr.msk.f32.gmra.mrb[40].mxu1 %vm445_vm3, %v2095_v58 }
 0xcd5   : > { %4338 = vmatprep.mubr.msk.f32.mxu1 %vm5118_vm4, %v5119_v37 }
 0xd97   : > { %v2181_v60 = vpop.f32.mrb[36].mxu1 }
 0xd98   : > { %v4310_v8 = vpop.f32.mrb[37].mxu1  ;;  %v2182_v0 = vadd.f32 %v3889_v53, %v2181_v60 }
 0xd9c   : > { %v2186_v61 = vpop.f32.mrb[38].mxu1 }
 0xd9d   : > { %v2187_v48 = vadd.f32 %v3889_v53, %v2186_v61  ;;  %v4313_v57 = vpop.f32.mrb[39].mxu1 }
 0xd9f   : > { %v5889_v2 = vpack.i.bf16 %v2187_v48, %v2182_v0 }
 0xda1   : > { %4740 = vrot.lane.b32.xlu0 %v5889_v2, %s5120_s14 }
 0xda7   : > { %v2191_v4 = vpop.f32.mrb[40].mxu1 }
 0xda8   : > { %v5893_v62 = vadd.f32 %v3889_v53, %v2191_v4  ;;  %v4316_v36 = vpop.f32.mrb[41].mxu1 }
 0xdaa   : > { %2441 = vrot.lane.b32.xlu0 %v5893_v62, %s5122_s12  ;;  %2202 = vrot.lane.b32.xlu1 %v5893_v62, %s5120_s14  ;;  %s6331_s14 = smov 48  }
 0xdae   : > { %2431 = vrot.lane.b32.xlu0 %v2182_v0, %s5123_s13  ;;  %4745 = vrot.lane.b32.xlu1 %v5889_v2, %s5122_s12  ;;  %s6333_s12 = smov 8  }
 0xdb2   : > { %2435 = vrot.lane.b32.xlu0 %v5893_v62, %s5123_s13  ;;  %4750 = vrot.lane.b32.xlu1 %v5889_v2, %s5121_s16 }
 0xdb6   : > { %4755 = vrot.lane.b32.xlu0 %v5889_v2, %s5125_s23  ;;  %2433 = vrot.lane.b32.xlu1 %v2187_v48, %s5123_s13  ;;  %s6334_s13 = smov 16  }
 0xdba   : > { %2672 = vrot.lane.b32.xlu0 %v2187_v48, %s5124_s21  ;;  %2680 = vrot.lane.b32.xlu1 %v5893_v62, %s5121_s16  ;;  %s6332_s16 = smov 40  }
 0xdbe   : > { %2919 = vrot.lane.b32.xlu0 %v5893_v62, %s5125_s23  ;;  %2670 = vrot.lane.b32.xlu1 %v2182_v0, %s5124_s21 }
 0xdc2   : > { %2911 = vrot.lane.b32.xlu0 %v2187_v48, %s5126_s25  ;;  %2674 = vrot.lane.b32.xlu1 %v5893_v62, %s5124_s21  ;;  %s6335_s21 = smov 24  }
 0xdc6   : > { %4760 = vrot.lane.b32.xlu0 %v5889_v2, %s5127_s19  ;;  %2909 = vrot.lane.b32.xlu1 %v2182_v0, %s5126_s25 }
 0xdca   : > { %2913 = vrot.lane.b32.xlu1 %v5893_v62, %s5126_s25  ;;  %s338_s25 = sand.u32 1, %s5101_s28  }
 0xdcb   : > { %s339_s10 = scalar_lea.vmem [#allocation10], %s338_s25  ;;  %s3710_s18 = scalar_lea.sflag [#allocation4], %s338_s25 }
 0xdcc   : > { %s3722_s11 = sshll.u32 %s339_s10, 4  ;;  %s6246_s11 = int_to_ptr.vmem [resolvable:$true] %s3722_s11 }
 0xdcd   : > { %s5035_s26 = scalar_lea.vmem %s6246_s11, 16 }
 0xdce   : > { %2336 = vrot.lane.b32.xlu1 %v5893_v62, %s5127_s19  ;;  %p5036_p7 = scmp.ne.s32.totalorder %s6246_s11, %s5035_s26 }
 0xdd0   : > { %p5037_p11 = pnand %p5036_p7, %p6337_p8 }
 0xdd2   : > { %p5038_p13 = pneg %p5037_p11 }
 0xe13   : > { %v4741_v9 = vpop.permute.xlu0 %4740 }
 0xe14   : > { %v4743_v1 = vunpack.i.h.bf16 %v4741_v9  ;;  %v4742_v13 = vunpack.i.l.bf16 %v4741_v9 }
 0xe16   : > { %v4551_v41 = vpack.c.bf16 %v4743_v1, %v4742_v13 }
 0xe18   : > { %4553 = vmatpush3.bf16.xpose.msk.msra.mxu0 %vm5471_vm5, %v4551_v41 }
 0xe19   : > { %4321 = vmatprep.subr.mxu0 %v5119_v37 }
 0xe1c   : > { %v2442_v15 = vpop.permute.xlu0 %2441  ;;  %v2203_v6 = vpop.permute.xlu1 %2202 }
 0xe20   : > { %v2432_v17 = vpop.permute.xlu0 %2431  ;;  %4322 = vmatpush3.xpose.msk.msra.mxu0 %vm350_vm0, %v2203_v6  ;;  %v4746_v19 = vpop.permute.xlu1 %4745 }
 0xe21   : > { %v4748_v20 = vunpack.i.h.bf16 %v4746_v19  ;;  %v4747_v11 = vunpack.i.l.bf16 %v4746_v19  ;;  %4557 = vmatprep.subr.bf16.mxu0 %v5117_v34 }
 0xe23   : > { %v4558_v43 = vpack.c.bf16 %v4748_v20, %v4747_v11  ;;  %4324 = vmatmul.mubr.msk.f32.vlgmr.msra.gmra.mrb[38].mxu0 %vm350_vm0, %v2182_v0 }
 0xe24   : > { %v2436_v22 = vpop.permute.xlu0 %2435  ;;  %v4751_v23 = vpop.permute.xlu1 %4750  ;;  %4326 = vmatprep.mubr.msk.f32.mxu0 %vm5118_vm4, %v5119_v37 }
 0xe25   : > { %4560 = vmatpush3.bf16.xpose.msk.msra.mxu0 %vm5471_vm5, %v4558_v43  ;;  %v4753_v24 = vunpack.i.h.bf16 %v4751_v23  ;;  %v4752_v27 = vunpack.i.l.bf16 %v4751_v23 }
 0xe26   : > { %4351 = vmatprep.subr.mxu0 %v5119_v37 }
 0xe27   : > { %4327 = vmatmul.mubr.msk.f32.gmra.mrb[40].mxu0 %vm350_vm0, %v2187_v48  ;;  %v4565_v32 = vpack.c.bf16 %v4753_v24, %v4752_v27 }
 0xe28   : > { %v4756_v25 = vpop.permute.xlu0 %4755  ;;  %v2434_v26 = vpop.permute.xlu1 %2433  ;;  %4329 = vmatprep.mubr.msk.f32.mxu0 %vm5118_vm4, %v5119_v37 }
 0xe29   : > { %v4758_v42 = vunpack.i.h.bf16 %v4756_v25  ;;  %v4757_v40 = vunpack.i.l.bf16 %v4756_v25 }
 0xe2b   : > { %4330 = vmatmul.mubr.msk.f32.gmra.mrb[42].mxu0 %vm350_vm0, %v5893_v62  ;;  %v4572_v47 = vpack.c.bf16 %v4758_v42, %v4757_v40 }
 0xe2c   : > { %v2673_v28 = vpop.permute.xlu0 %2672  ;;  %v2681_v31 = vpop.permute.xlu1 %2680  ;;  %4353 = vmatprep.mubr.msk.f32.mxu0 %vm5118_vm4, %v5119_v37 }
 0xe2d   : > { %4352 = vmatpush3.xpose.msk.msra.mxu0 %vm350_vm0, %v2442_v15 }
 0xe2e   : > { %4564 = vmatprep.subr.bf16.mxu0 %v5117_v34 }
 0xe30   : > { %v2920_v39 = vpop.permute.xlu0 %2919  ;;  %v2671_v33 = vpop.permute.xlu1 %2670  ;;  %4354 = vmatmul.mubr.msk.f32.vlgmr.msra.gmra.mrb[44].mxu0 %vm350_vm0, %v2432_v17 }
 0xe31   : > { %4567 = vmatpush3.bf16.xpose.msk.msra.mxu0 %vm5471_vm5, %v4565_v32  ;;  %4356 = vmatprep.mubr.msk.f32.mxu0 %vm5118_vm4, %v5119_v37 }
 0xe32   : > { %4381 = vmatprep.subr.mxu0 %v5119_v37 }
 0xe34   : > { %v2912_v21 = vpop.permute.xlu0 %2911  ;;  %v2675_v12 = vpop.permute.xlu1 %2674  ;;  %4357 = vmatmul.mubr.msk.f32.gmra.mrb[46].mxu0 %vm350_vm0, %v2434_v26 }
 0xe35   : > { %4359 = vmatprep.mubr.msk.f32.mxu0 %vm5118_vm4, %v5119_v37 }
 0xe38   : > { %v4761_v44 = vpop.permute.xlu0 %4760  ;;  %v2910_v14 = vpop.permute.xlu1 %2909  ;;  %4360 = vmatmul.mubr.msk.f32.gmra.mrb[48].mxu0 %vm350_vm0, %v2436_v22 }
 0xe39   : > { %v4763_v30 = vunpack.i.h.bf16 %v4761_v44  ;;  %v4762_v46 = vunpack.i.l.bf16 %v4761_v44  ;;  %4382 = vmatpush3.xpose.msk.msra.mxu0 %vm350_vm0, %v2681_v31  ;;  %4383 = vmatprep.mubr.msk.f32.mxu0 %vm5118_vm4, %v5119_v37 }
 0xe3a   : > { %4571 = vmatprep.subr.bf16.mxu0 %v5117_v34 }
 0xe3b   : > { %v4555_v45 = vpack.c.bf16 %v4763_v30, %v4762_v46 }
 0xe3c   : > { %v2914_v49 = vpop.permute.xlu1 %2913  ;;  %4384 = vmatmul.mubr.msk.f32.vlgmr.msra.gmra.mrb[50].mxu0 %vm350_vm0, %v2671_v33 }
 0xe3d   : > { %4556 = vmatpush3.bf16.msra.mxu1 %v4555_v45  ;;  %4574 = vmatpush3.bf16.xpose.msk.msra.mxu0 %vm5471_vm5, %v4572_v47 }
 0xe3e   : > { %4386 = vmatprep.mubr.msk.f32.mxu0 %vm5118_vm4, %v5119_v37  ;;  %4336 = vmatprep.subr.mxu1 %v5119_v37 }
 0xe3f   : > { %4411 = vmatprep.subr.mxu0 %v5119_v37 }
 0xe40   : > { %v2337_v51 = vpop.permute.xlu1 %2336  ;;  %4387 = vmatmul.mubr.msk.f32.gmra.mrb[52].mxu0 %vm350_vm0, %v2673_v28 }
 0xe41   : > { %4337 = vmatpush3.msk.msra.mxu1 %vm435_vm2, %v2337_v51  ;;  %4389 = vmatprep.mubr.msk.f32.mxu0 %vm5118_vm4, %v5119_v37 }
 0xe42   : > { %4561 = vmatprep.subr.bf16.mxu1 %v5117_v34 }
 0xe44   : > { %4390 = vmatmul.mubr.msk.f32.gmra.mrb[54].mxu0 %vm350_vm0, %v2675_v12 }
 0xe45   : > { %4412 = vmatpush3.xpose.msk.msra.mxu0 %vm350_vm0, %v2920_v39  ;;  %4413 = vmatprep.mubr.msk.f32.mxu0 %vm5118_vm4, %v5119_v37 }
 0xe46   : > { %4578 = vmatprep.subr.bf16.mxu0 %v5117_v34 }
 0xe48   : > { %4414 = vmatmul.mubr.msk.f32.vlgmr.msra.gmra.mrb[56].mxu0 %vm350_vm0, %v2910_v14 }
 0xe49   : > { %4416 = vmatprep.mubr.msk.f32.mxu0 %vm5118_vm4, %v5119_v37 }
 0xe4c   : > { %4417 = vmatmul.mubr.msk.f32.gmra.mrb[58].mxu0 %vm350_vm0, %v2912_v21 }
 0xe4d   : > { %4419 = vmatprep.mubr.msk.f32.mxu0 %vm5118_vm4, %v5119_v37 }
 0xe50   : > { %4420 = vmatmul.mubr.msk.f32.gmra.mrb[60].mxu0 %vm350_vm0, %v2914_v49 }
 0xe51   : > { %4445 = vmatprep.mubr.msk.f32.mxu0 %vm5118_vm4, %v5119_v37 }
 0xef6   : > { %v2282_v16 = vpop.f32.mrb[38].mxu0 }
 0xef7   : > { %v2296_v52 = vmul.f32 0.17677669, %v2282_v16  ;;  %v4325_v38 = vpop.f32.mrb[39].mxu0 }
 0xef9   : > { %v2299_v55 = vsel %vm703_vm6, %v2296_v52, -inf }
 0xefa   : > { %2300 = vmax.xlane.f32.xlu0 %v2299_v55  ;;  %v2287_v18 = vpop.f32.mrb[40].mxu0 }
 0xefb   : > { %v2297_v56 = vmul.f32 0.17677669, %v2287_v18  ;;  %v4328_v50 = vpop.f32.mrb[41].mxu0 }
 0xefd   : > { %v2302_v54 = vsel %vm703_vm6, %v2297_v56, -inf }
 0xefe   : > { %2303 = vmax.xlane.f32.xlu1 %v2302_v54  ;;  %v2292_v59 = vpop.f32.mrb[42].mxu0 }
 0xeff   : > { %v2298_v35 = vmul.f32 0.17677669, %v2292_v59  ;;  %v4331_v5 = vpop.f32.mrb[43].mxu0 }
 0xf01   : > { %v2305_v7 = vsel %vm710_vm7, %v2298_v35, -inf }
 0xf02   : > { %2306 = vmax.xlane.f32.xlu0 %v2305_v7 }
 0xf03   : > { %v2521_v58 = vpop.f32.mrb[44].mxu0 }
 0xf04   : > { %v2535_v60 = vmul.f32 0.17677669, %v2521_v58  ;;  %v4355_v8 = vpop.f32.mrb[45].mxu0 }
 0xf06   : > { %v2538_v53 = vsel %vm703_vm6, %v2535_v60, -inf }
 0xf07   : > { %2539 = vmax.xlane.f32.xlu0 %v2538_v53  ;;  %v2526_v61 = vpop.f32.mrb[46].mxu0 }
 0xf08   : > { %v5989_v0 = vmul.f32 0.17677669, %v2526_v61  ;;  %v4358_v48 = vpop.f32.mrb[47].mxu0 }
 0xf0a   : > { %v2541_v57 = vsel %vm703_vm6, %v5989_v0, -inf }
 0xf0b   : > { %2542 = vmax.xlane.f32.xlu1 %v2541_v57  ;;  %v2531_v4 = vpop.f32.mrb[48].mxu0 }
 0xf0c   : > { %v5993_v36 = vmul.f32 0.17677669, %v2531_v4  ;;  %v4361_v9 = vpop.f32.mrb[49].mxu0 }
 0xf0e   : > { %v2544_v1 = vsel %vm710_vm7, %v5993_v36, -inf }
 0xf0f   : > { %2545 = vmax.xlane.f32.xlu0 %v2544_v1  ;;  %v2760_v13 = vpop.f32.mrb[50].mxu0 }
 0xf10   : > { %v5997_v41 = vmul.f32 0.17677669, %v2760_v13  ;;  %v4385_v15 = vpop.f32.mrb[51].mxu0 }
 0xf12   : > { %v2777_v6 = vsel %vm703_vm6, %v5997_v41, -inf }
 0xf13   : > { %2778 = vmax.xlane.f32.xlu1 %v2777_v6  ;;  %v2765_v17 = vpop.f32.mrb[52].mxu0 }
 0xf14   : > { %v2775_v19 = vmul.f32 0.17677669, %v2765_v17  ;;  %v4388_v20 = vpop.f32.mrb[53].mxu0 }
 0xf16   : > { %v2780_v11 = vsel %vm703_vm6, %v2775_v19, -inf }
 0xf17   : > { %2781 = vmax.xlane.f32.xlu0 %v2780_v11  ;;  %v2770_v43 = vpop.f32.mrb[54].mxu0 }
 0xf18   : > { %v6002_v22 = vmul.f32 0.17677669, %v2770_v43  ;;  %v4391_v23 = vpop.f32.mrb[55].mxu0 }
 0xf1a   : > { %v2783_v25 = vsel %vm710_vm7, %v6002_v22, -inf }
 0xf1b   : > { %2784 = vmax.xlane.f32.xlu1 %v2783_v25  ;;  %v2999_v26 = vpop.f32.mrb[56].mxu0 }
 0xf1c   : > { %v3013_v24 = vmul.f32 0.17677669, %v2999_v26  ;;  %v4415_v27 = vpop.f32.mrb[57].mxu0 }
 0xf1e   : > { %v3016_v28 = vsel %vm703_vm6, %v3013_v24, -inf }
 0xf1f   : > { %3017 = vmax.xlane.f32.xlu0 %v3016_v28  ;;  %v6007_v31 = vpop.f32.mrb[58].mxu0 }
 0xf20   : > { %v4418_v32 = vpop.f32.mrb[59].mxu0  ;;  %v6068_v27 = vmul.f32 0.17677669, %v6007_v31 }
 0xf22   : > { %v3019_v32 = vsel %vm703_vm6, %v6068_v27, -inf }
 0xf23   : > { %v6009_v39 = vpop.f32.mrb[60].mxu0 }
 0xf24   : > { %v4421_v33 = vpop.f32.mrb[61].mxu0  ;;  %v6071_v28 = vmul.f32 0.17677669, %v6009_v39 }
 0xf26   : > { %v3022_v33 = vsel %vm710_vm7, %v6071_v28, -inf }
 0xf2c   : > { %4765 = vrot.lane.b32.xlu1 %v5889_v2, %s5128_s24 }
 0xf35   : > { %2575 = vrot.lane.b32.xlu0 %v5893_v62, %s5128_s24 }
 0xf87   : > { %v2301_v21 = vpop.xlane.xlu0 %2300 }
 0xf88   : > { %v2308_v12 = vsub.f32 %v2296_v52, %v2301_v21 }
 0xf8a   : > { %v2311_v42 = vmul.f32 1.442695, %v2308_v12 }
 0xf8b   : > { %v2304_v40 = vpop.xlane.xlu1 %2303 }
 0xf8c   : > { %4857 = vpow2.f32 %v2311_v42  ;;  %v2309_v44 = vsub.f32 %v2297_v56, %v2304_v40 }
 0xf8e   : > { %v2313_v14 = vmul.f32 1.442695, %v2309_v44 }
 0xf8f   : > { %v2307_v30 = vpop.xlane.xlu0 %2306 }
 0xf90   : > { %4859 = vpow2.f32 %v2313_v14  ;;  %v2310_v46 = vsub.f32 %v2298_v35, %v2307_v30 }
 0xf92   : > { %v2315_v47 = vmul.f32 1.442695, %v2310_v46 }
 0xf94   : > { %4861 = vpow2.f32 %v2315_v47  ;;  %v2540_v45 = vpop.xlane.xlu0 %2539 }
 0xf95   : > { %v2547_v49 = vsub.f32 %v2535_v60, %v2540_v45 }
 0xf96   : > { %v6015_v51 = vpop.eup %4857 }
 0xf97   : > { %v2550_v16 = vmul.f32 1.442695, %v2547_v49  ;;  %v2317_v38 = vsel %vm703_vm6, %v6015_v51, 0.0 }
 0xf98   : > { %2318 = vadd.xlane.f32.xlu1 %v2317_v38  ;;  %v2543_v59 = vpop.xlane.xlu1 %2542 }
 0xf99   : > { %4863 = vpow2.f32 %v2550_v16  ;;  %v2548_v5 = vsub.f32 %v5989_v0, %v2543_v59 }
 0xf9a   : > { %v6019_v52 = vpop.eup %4859 }
 0xf9b   : > { %v2320_v55 = vsel %vm703_vm6, %v6019_v52, 0.0  ;;  %v2552_v58 = vmul.f32 1.442695, %v2548_v5 }
 0xf9c   : > { %2321 = vadd.xlane.f32.xlu0 %v2320_v55  ;;  %v2546_v35 = vpop.xlane.xlu0 %2545 }
 0xf9d   : > { %v2549_v60 = vsub.f32 %v5993_v36, %v2546_v35  ;;  %4865 = vpow2.f32 %v2552_v58 }
 0xf9e   : > { %v6023_v18 = vpop.eup %4861 }
 0xf9f   : > { %v2323_v56 = vsel %vm710_vm7, %v6023_v18, 0.0  ;;  %v2554_v48 = vmul.f32 1.442695, %v2549_v60 }
 0xfa0   : > { %2324 = vadd.xlane.f32.xlu1 %v2323_v56  ;;  %v2779_v8 = vpop.xlane.xlu1 %2778 }
 0xfa1   : > { %v2786_v57 = vsub.f32 %v5997_v41, %v2779_v8  ;;  %4867 = vpow2.f32 %v2554_v48 }
 0xfa3   : > { %v6027_v50 = vpop.eup %4863  ;;  %v2789_v13 = vmul.f32 1.442695, %v2786_v57 }
 0xfa4   : > { %v2556_v54 = vsel %vm703_vm6, %v6027_v50, 0.0  ;;  %v2782_v7 = vpop.xlane.xlu0 %2781 }
 0xfa5   : > { %2557 = vadd.xlane.f32.xlu0 %v2556_v54  ;;  %v2787_v53 = vsub.f32 %v2775_v19, %v2782_v7 }
 0xfa7   : > { %v2791_v4 = vmul.f32 1.442695, %v2787_v53  ;;  %v6039_v36 = vpop.eup %4865 }
 0xfa8   : > { %v2785_v9 = vpop.xlane.xlu1 %2784  ;;  %v2559_v17 = vsel %vm703_vm6, %v6039_v36, 0.0 }
 0xfa9   : > { %v2788_v15 = vsub.f32 %v6002_v22, %v2785_v9  ;;  %4869 = vpow2.f32 %v2791_v4 }
 0xfaa   : > { %4871 = vpow2.f32 %v2789_v13 }
 0xfab   : > { %v2793_v6 = vmul.f32 1.442695, %v2788_v15  ;;  %v6043_v19 = vpop.eup %4867 }
 0xfac   : > { %v3018_v61 = vpop.xlane.xlu0 %3017  ;;  %v2562_v20 = vsel %vm710_vm7, %v6043_v19, 0.0  ;;  %v4766_v21 = vpop.permute.xlu1 %4765 }
 0xfad   : > { %v3025_v1 = vsub.f32 %v3013_v24, %v3018_v61  ;;  %v4768_v31 = vunpack.i.h.bf16 %v4766_v21  ;;  %v4767_v40 = vunpack.i.l.bf16 %v4766_v21 }
 0xfaf   : > { %v3028_v0 = vmul.f32 1.442695, %v3025_v1  ;;  %v4562_v14 = vpack.c.bf16 %v4768_v31, %v4767_v40 }
 0xfb0   : > { %v2576_v12 = vpop.permute.xlu0 %2575 }
 0xfb1   : > { %4770 = vrot.lane.b32.xlu1 %v5889_v2, %s6331_s14  ;;  %4873 = vpow2.f32 %v3028_v0 }
 0xfb2   : > { %4875 = vpow2.f32 %v2793_v6 }
 0xfb3   : > { %v6045_v41 = vpop.eup %4869 }
 0xfb4   : > { %v6049_v11 = vpop.eup %4871  ;;  %v2798_v43 = vsel %vm703_vm6, %v6045_v41, 0.0 }
 0xfb5   : > { %v2795_v23 = vsel %vm703_vm6, %v6049_v11, 0.0 }
 0xfbb   : > { %2814 = vrot.lane.b32.xlu0 %v5893_v62, %s6331_s14  ;;  %v6053_v22 = vpop.eup %4873  ;;  %s5039_s14 = sshll.u32 %s5135_s9, 4  ;;  %s5040_s14 = int_to_ptr.vmem [resolvable:$false] %s5039_s14 }
 0xfbc   : > { %v6057_v25 = vpop.eup %4875  ;;  %v3034_v26 = vsel %vm703_vm6, %v6053_v22, 0.0  ;;  %p5042_p1 = scmp.lt.s32.totalorder %s6246_s11, %s5040_s14 }
 0xfbd   : > { %v2801_v24 = vsel %vm710_vm7, %v6057_v25, 0.0 }
 0xfd5   : > { %2560 = vadd.xlane.f32.xlu1 %v2559_v17 }
 0xfd9   : > { %2563 = vadd.xlane.f32.xlu1 %v2562_v20 }
 0xfda   : > { %2799 = vadd.xlane.f32.xlu0 %v2798_v43 }
 0xfdd   : > { %2796 = vadd.xlane.f32.xlu1 %v2795_v23 }
 0xfde   : > { %3035 = vadd.xlane.f32.xlu0 %v3034_v26 }
 0xfe1   : > { %2802 = vadd.xlane.f32.xlu1 %v2801_v24 }
 0xff2   : > { %3053 = vrot.lane.b32.xlu1 %v5893_v62, %s6332_s16 }
 0xff4   : > { %4775 = vrot.lane.b32.xlu0 %v5889_v2, %s6332_s16  ;;  %s5041_s16 = scalar_lea.vmem %s5040_s14, 32 }
 0xff5   : > { %p5043_p6 = scmp.lt.s32.totalorder %s5041_s16, %s5035_s26 }
 0xff7   : > { %p5044_p9 = por %p5043_p6, %p5042_p1 }
 0xff9   : > { %p5045_p5 = pnand %p5044_p9, %p5038_p13 }
0x1013   : > { %3020 = vmax.xlane.f32.xlu0 %v3019_v32 }
0x1016   : > { %3023 = vmax.xlane.f32.xlu1 %v3022_v33 }
0x1025   : > { %v2319_v62 = vpop.xlane.xlu1 %2318 }
0x1026   : > { %4877 = vrcp.f32 %v2319_v62 }
0x1029   : > { %v2322_v42 = vpop.xlane.xlu0 %2321 }
0x102a   : > { %4879 = vrcp.f32 %v2322_v42 }
0x102d   : > { %v2325_v2 = vpop.xlane.xlu1 %2324 }
0x102e   : > { %4881 = vrcp.f32 %v2325_v2 }
0x1030   : > { %v4878_v39 = vpop.eup %4877 }
0x1031   : > { %v2327_v44 = vmul.f32 %v4878_v39, %v6015_v51  ;;  %v4771_v49 = vpop.permute.xlu1 %4770  ;;  %v3194_v39 = vld [vmem:[#allocation5 + $0x20] sm:$0xff] }
0x1032   : > { %v2558_v30 = vpop.xlane.xlu0 %2557  ;;  %v4773_v16 = vunpack.i.h.bf16 %v4771_v49  ;;  %v4772_v38 = vunpack.i.l.bf16 %v4771_v49  ;;  %v3197_v49 = vld [vmem:[#allocation5 + $0x38] sm:$0xff] }
0x1033   : > { %4883 = vrcp.f32 %v2558_v30  ;;  %4339 = vmatmul.mubr.msk.f32.vlgmr.msra.gmra.mrb[42].mxu1 %vm703_vm6, %v2327_v44  ;;  %v3195_v44 = vld [vmem:[#allocation5 + $0x28] sm:$0xff] }
0x1034   : > { %v4880_v46 = vpop.eup %4879  ;;  %4563 = vmatpush3.bf16.msra.mxu1 %v4562_v14  ;;  %4341 = vmatprep.mubr.msk.f32.mxu1 %vm5118_vm4, %v5119_v37  ;;  %v4569_v56 = vpack.c.bf16 %v4773_v16, %v4772_v38  ;;  %v4579_v30 = vpack.c.bf16 %v3195_v44, %v3194_v39  ;;  %v3942_v39 = vld [vmem:[%s6291_s5 + $0x38] sm:$0xff] }
0x1035   : > { %4366 = vmatprep.subr.mxu1 %v5119_v37  ;;  %v2329_v47 = vmul.f32 %v4880_v46, %v6019_v52 }
0x1036   : > { %4580 = vmatpush3.bf16.msra.mxu0 %v4579_v30 }
0x1037   : > { %4342 = vmatmul.mubr.msk.f32.gmra.mrb[44].mxu1 %vm703_vm6, %v2329_v47  ;;  %4581 = vmatprep.subr.bf16.mxu0 %v5117_v34 }
0x1038   : > { %v4882_v45 = vpop.eup %4881  ;;  %4367 = vmatpush3.msk.msra.mxu1 %vm435_vm2, %v2576_v12  ;;  %4344 = vmatprep.mubr.msk.f32.mxu1 %vm5118_vm4, %v5119_v37 }
0x1039   : > { %v2331_v51 = vmul.f32 %v4882_v45, %v6023_v18  ;;  %4568 = vmatprep.subr.bf16.mxu1 %v5117_v34  ;;  %v2815_v18 = vpop.permute.xlu0 %2814  ;;  %v3196_v45 = vld [vmem:[#allocation5 + $0x30] sm:$0xff] }
0x103a   : > { %v4582_v16 = vpack.c.bf16 %v3197_v49, %v3196_v45 }
0x103b   : > { %4345 = vmatmul.mubr.msk.f32.gmra.mrb[46].mxu1 %vm703_vm6, %v2331_v51 }
0x103c   : > { %4368 = vmatprep.mubr.msk.f32.mxu1 %vm5118_vm4, %v5119_v37  ;;  %4583 = vmatpush3.bf16.msra.mxu0 %v4582_v16 }
0x103d   : > { %v4884_v52 = vpop.eup %4883  ;;  %4590 = vmatprep.subr.bf16.mxu0 %v5117_v34 }
0x103e   : > { %v2566_v55 = vmul.f32 %v4884_v52, %v6027_v50 }
0x1040   : > { %4369 = vmatmul.mubr.msk.f32.vlgmr.msra.gmra.mrb[48].mxu1 %vm703_vm6, %v2566_v55 }
0x1041   : > { %4570 = vmatpush3.bf16.msra.mxu1 %v4569_v56  ;;  %4371 = vmatprep.mubr.msk.f32.mxu1 %vm5118_vm4, %v5119_v37 }
0x1042   : > { %4396 = vmatprep.subr.mxu1 %v5119_v37 }
0x1045   : > { %4397 = vmatpush3.msk.msra.mxu1 %vm435_vm2, %v2815_v18 }
0x1046   : > { %4575 = vmatprep.subr.bf16.mxu1 %v5117_v34 }
0x1062   : > { %v2561_v54 = vpop.xlane.xlu1 %2560 }
0x1063   : > { %4885 = vrcp.f32 %v2561_v54 }
0x1066   : > { %v2564_v59 = vpop.xlane.xlu1 %2563 }
0x1067   : > { %4887 = vrcp.f32 %v2564_v59  ;;  %v2800_v35 = vpop.xlane.xlu0 %2799 }
0x106a   : > { %v2797_v50 = vpop.xlane.xlu1 %2796 }
0x106b   : > { %4889 = vrcp.f32 %v2797_v50  ;;  %v3036_v5 = vpop.xlane.xlu0 %3035 }
0x106c   : > { %4891 = vrcp.f32 %v2800_v35 }
0x106d   : > { %v4886_v7 = vpop.eup %4885 }
0x106e   : > { %v2803_v58 = vpop.xlane.xlu1 %2802  ;;  %v2568_v60 = vmul.f32 %v4886_v7, %v6039_v36 }
0x106f   : > { %v4776_v8 = vpop.permute.xlu0 %4775  ;;  %4893 = vrcp.f32 %v2803_v58 }
0x1070   : > { %4372 = vmatmul.mubr.msk.f32.gmra.mrb[50].mxu1 %vm703_vm6, %v2568_v60  ;;  %v4778_v48 = vunpack.i.h.bf16 %v4776_v8  ;;  %v4777_v57 = vunpack.i.l.bf16 %v4776_v8  ;;  %4895 = vrcp.f32 %v3036_v5 }
0x1071   : > { %v4888_v53 = vpop.eup %4887  ;;  %4374 = vmatprep.mubr.msk.f32.mxu1 %vm5118_vm4, %v5119_v37 }
0x1072   : > { %v2570_v61 = vmul.f32 %v4888_v53, %v6043_v19  ;;  %v4576_v13 = vpack.c.bf16 %v4778_v48, %v4777_v57  ;;  %v3054_v6 = vpop.permute.xlu1 %3053 }
0x1074   : > { %4375 = vmatmul.mubr.msk.f32.gmra.mrb[52].mxu1 %vm703_vm6, %v2570_v61 }
0x1075   : > { %v4890_v4 = vpop.eup %4889  ;;  %4398 = vmatprep.mubr.msk.f32.mxu1 %vm5118_vm4, %v5119_v37 }
0x1076   : > { %v2805_v9 = vmul.f32 %v4890_v4, %v6049_v11  ;;  %v4892_v1 = vpop.eup %4891 }
0x1077   : > { %v2807_v15 = vmul.f32 %v4892_v1, %v6045_v41 }
0x1078   : > { %4399 = vmatmul.mubr.msk.f32.vlgmr.msra.gmra.mrb[54].mxu1 %vm703_vm6, %v2805_v9 }
0x1079   : > { %4577 = vmatpush3.bf16.msra.mxu1 %v4576_v13  ;;  %4401 = vmatprep.mubr.msk.f32.mxu1 %vm5118_vm4, %v5119_v37  ;;  %v4894_v0 = vpop.eup %4893 }
0x107a   : > { %4426 = vmatprep.subr.mxu1 %v5119_v37  ;;  %v2809_v36 = vmul.f32 %v4894_v0, %v6057_v25  ;;  %v4896_v17 = vpop.eup %4895 }
0x107b   : > { %v3044_v19 = vmul.f32 %v4896_v17, %v6053_v22 }
0x107c   : > { %4402 = vmatmul.mubr.msk.f32.gmra.mrb[56].mxu1 %vm703_vm6, %v2807_v15 }
0x107d   : > { %4427 = vmatpush3.msk.msra.mxu1 %vm435_vm2, %v3054_v6  ;;  %4404 = vmatprep.mubr.msk.f32.mxu1 %vm5118_vm4, %v5119_v37 }
0x107e   : > { %4584 = vmatprep.subr.bf16.mxu1 %v5117_v34 }
0x1080   : > { %4405 = vmatmul.mubr.msk.f32.gmra.mrb[58].mxu1 %vm703_vm6, %v2809_v36 }
0x1081   : > { %4428 = vmatprep.mubr.msk.f32.mxu1 %vm5118_vm4, %v5119_v37 }
0x1084   : > { %4429 = vmatmul.mubr.msk.f32.vlgmr.msra.gmra.mrb[60].mxu1 %vm703_vm6, %v3044_v19 }
0x1085   : > { %4431 = vmatprep.mubr.msk.f32.mxu1 %vm5118_vm4, %v5119_v37 }
0x10a0   : > { %v3021_v41 = vpop.xlane.xlu0 %3020 }
0x10a1   : > { %v3026_v20 = vsub.f32 %v6068_v27, %v3021_v41 }
0x10a3   : > { %v3030_v11 = vmul.f32 1.442695, %v3026_v20  ;;  %v3024_v43 = vpop.xlane.xlu1 %3023 }
0x10a4   : > { %v3027_v23 = vsub.f32 %v6071_v28, %v3024_v43 }
0x10a5   : > { %4897 = vpow2.f32 %v3030_v11 }
0x10a6   : > { %v3032_v25 = vmul.f32 1.442695, %v3027_v23 }
0x10a8   : > { %4899 = vpow2.f32 %v3032_v25 }
0x10af   : > { %v4898_v26 = vpop.eup %4897 }
0x10b0   : > { %v3037_v24 = vsel %vm703_vm6, %v4898_v26, 0.0 }
0x10b1   : > { %3038 = vadd.xlane.f32.xlu0 %v3037_v24  ;;  %v3936_v24 = vld [vmem:[%s6287_s1 + $0xe] ss:$0 sm:$0xff] }
0x10b2   : > { %v4900_v22 = vpop.eup %4899 }
0x10b3   : > { %v3040_v32 = vsel %vm710_vm7, %v4900_v22, 0.0 }
0x10b5   : > { %3041 = vadd.xlane.f32.xlu0 %v3040_v32 }
0x1106   : > { %v2417_v33 = vpop.f32.mrb[42].mxu1 }
0x1107   : > { %v4340_v21 = vpop.f32.mrb[43].mxu1 }
0x110a   : > { %v6130_v12 = vpop.f32.mrb[44].mxu1 }
0x110b   : > { %v4343_v27 = vpop.f32.mrb[45].mxu1 }
0x110e   : > { %v6132_v62 = vpop.f32.mrb[46].mxu1 }
0x110f   : > { %v4346_v42 = vpop.f32.mrb[47].mxu1 }
0x1113   : > { %v2656_v28 = vpop.f32.mrb[48].mxu1 }
0x1114   : > { %3151 = vrot.lane.b32.xlu1 %v2656_v28, %s6333_s12  ;;  %v4370_v2 = vpop.f32.mrb[49].mxu1 }
0x1115   : > { %v3939_v2 = vld [vmem:[%s6291_s5 + $0x20] sm:$0xff] }
0x113e   : > { %v3039_v31 = vpop.xlane.xlu0 %3038 }
0x113f   : > { %4901 = vrcp.f32 %v3039_v31 }
0x1142   : > { %v3042_v40 = vpop.xlane.xlu0 %3041 }
0x1143   : > { %4903 = vrcp.f32 %v3042_v40  ;;  %v2661_v14 = vpop.f32.mrb[50].mxu1  ;;  %v3941_v40 = vld [vmem:[%s6291_s5 + $0x30] sm:$0xff] }
0x1144   : > { %v4373_v46 = vpop.f32.mrb[51].mxu1  ;;  %v4588_v44 = vpack.c.bf16 %v3942_v39, %v3941_v40 }
0x1147   : > { %v2666_v47 = vpop.f32.mrb[52].mxu1 }
0x1148   : > { %v4376_v51 = vpop.f32.mrb[53].mxu1 }
0x1149   : > { %v4902_v38 = vpop.eup %4901 }
0x114a   : > { %v3046_v52 = vmul.f32 %v4902_v38, %v4898_v26 }
0x114b   : > { %v2895_v55 = vpop.f32.mrb[54].mxu1 }
0x114c   : > { %4432 = vmatmul.mubr.msk.f32.gmra.mrb[62].mxu1 %vm703_vm6, %v3046_v52  ;;  %3163 = vrot.lane.b32.xlu0 %v2895_v55, %s6334_s13  ;;  %v4400_v56 = vpop.f32.mrb[55].mxu1 }
0x114d   : > { %v4904_v18 = vpop.eup %4903  ;;  %4434 = vmatprep.mubr.msk.f32.mxu1 %vm5118_vm4, %v5119_v37 }
0x114e   : > { %v3048_v54 = vmul.f32 %v4904_v18, %v4900_v22 }
0x114f   : > { %v2900_v59 = vpop.f32.mrb[56].mxu1 }
0x1150   : > { %4435 = vmatmul.mubr.msk.f32.gmra.mrb[64].mxu1 %vm703_vm6, %v3048_v54  ;;  %3165 = vrot.lane.b32.xlu0 %v2900_v59, %s6334_s13  ;;  %v4403_v35 = vpop.f32.mrb[57].mxu1 }
0x1151   : > { %4462 = vmatprep.mubr.msk.f32.mxu1 %vm5118_vm4, %v5119_v37 }
0x1153   : > { %v2905_v50 = vpop.f32.mrb[58].mxu1 }
0x1154   : > { %3155 = vrot.lane.b32.xlu0 %v2666_v47, %s6333_s12  ;;  %v4406_v5 = vpop.f32.mrb[59].mxu1 }
0x1157   : > { %v3134_v7 = vpop.f32.mrb[60].mxu1 }
0x1158   : > { %3175 = vrot.lane.b32.xlu1 %v3134_v7, %s6335_s21  ;;  %v4430_v58 = vpop.f32.mrb[61].mxu1 }
0x115c   : > { %3153 = vrot.lane.b32.xlu1 %v2661_v14, %s6333_s12 }
0x1186   : > { %v3152_v60 = vpop.permute.xlu1 %3151 }
0x1187   : > { %v3184_v53 = vsel %vm350_vm0, %v2417_v33, %v3152_v60 }
0x11be   : > { %v3164_v8 = vpop.permute.xlu0 %3163 }
0x11bf   : > { %v3187_v61 = vsel %vm1593_vm8, %v3184_v53, %v3164_v8 }
0x11c2   : > { %v3166_v15 = vpop.permute.xlu0 %3165 }
0x11c6   : > { %v3156_v36 = vpop.permute.xlu0 %3155 }
0x11c7   : > { %v3186_v20 = vsel %vm350_vm0, %v6132_v62, %v3156_v36 }
0x11ca   : > { %v3176_v48 = vpop.permute.xlu1 %3175 }
0x11cb   : > { %v3190_v57 = vsel %vm1597_vm9, %v3187_v61, %v3176_v48 }
0x11cc   : > { %4446 = vmatmul.mubr.msk.f32.vlgmr.msra.gmra.mrb[62].mxu0 %vm445_vm3, %v3190_v57 }
0x11cd   : > { %4448 = vmatprep.mubr.msk.f32.mxu0 %vm5118_vm4, %v5119_v37 }
0x11ce   : > { %v3154_v0 = vpop.permute.xlu1 %3153 }
0x11cf   : > { %v3185_v6 = vsel %vm350_vm0, %v6130_v12, %v3154_v0 }
0x11d0   : > { %v3188_v17 = vsel %vm1593_vm8, %v3185_v6, %v3166_v15 }
0x121f   : > { %v3139_v4 = vpop.f32.mrb[62].mxu1 }
0x1220   : > { %3177 = vrot.lane.b32.xlu1 %v3139_v4, %s6335_s21  ;;  %v4433_v9 = vpop.f32.mrb[63].mxu1 }
0x1221   : > { %v3534_v9 = vld [vmem:[#allocation7 + $0x10] sm:$0xff] }
0x1223   : > { %v3144_v1 = vpop.f32.mrb[64].mxu1 }
0x1224   : > { %3167 = vrot.lane.b32.xlu1 %v2905_v50, %s6334_s13  ;;  %3179 = vrot.lane.b32.xlu0 %v3144_v1, %s6335_s21  ;;  %v4436_v13 = vpop.f32.mrb[65].mxu1  ;;  %v3535_v1 = vld [vmem:[#allocation7 + $0x18] sm:$0xff] }
0x1225   : > { %v4591_v13 = vpack.c.bf16 %v3535_v1, %v3534_v9 }
0x1227   : > { %4592 = vmatpush3.bf16.msra.mxu0 %v4591_v13 }
0x1292   : > { %v3178_v19 = vpop.permute.xlu1 %3177 }
0x1293   : > { %v3191_v41 = vsel %vm1597_vm9, %v3188_v17, %v3178_v19 }
0x1294   : > { %4449 = vmatmul.mubr.msk.f32.gmra.mrb[64].mxu0 %vm445_vm3, %v3191_v41 }
0x1295   : > { %4451 = vmatprep.mubr.msk.f32.mxu0 %vm5118_vm4, %v5119_v37 }
0x1296   : > { %v3168_v11 = vpop.permute.xlu1 %3167  ;;  %v3180_v43 = vpop.permute.xlu0 %3179 }
0x1297   : > { %v3189_v23 = vsel %vm1593_vm8, %v3186_v20, %v3168_v11 }
0x1298   : > { %v3192_v25 = vsel %vm1597_vm9, %v3189_v23, %v3180_v43 }
0x1299   : > { %4452 = vmatmul.mubr.msk.f32.gmra.mrb[66].mxu0 %vm445_vm3, %v3192_v25 }
0x129a   : > { %4475 = vmatprep.mubr.msk.f32.mxu0 %vm5118_vm4, %v5119_v37 }
0x129f   : > { %v3273_v26 = vpop.f32.mrb[62].mxu0 }
0x12a0   : > { %v3287_v22 = vadd.f32 %v3273_v26, %v5837_v63  ;;  %v4447_v32 = vpop.f32.mrb[63].mxu0  ;;  %v3940_v63 = vld [vmem:[%s6291_s5 + $0x28] sm:$0xff] }
0x12a1   : > { %v4585_v31 = vpack.c.bf16 %v3940_v63, %v3939_v2 }
0x12a2   : > { %v6175_v33 = vadd.f32 %v3936_v24, %v3287_v22  ;;  %v3943_v22 = vld [vmem:[%s6287_s1 + $0x11] ss:$0 sm:$0xff] }
0x12a3   : > { %4586 = vmatpush3.bf16.msra.mxu1 %v4585_v31 }
0x12a4   : > { %v3300_v21 = vsel %vm445_vm3, %v6175_v33, 0.0  ;;  %4587 = vmatprep.subr.bf16.mxu1 %v5117_v34 }
0x12a5   : > { %3301 = vadd.xlane.f32.xlu1 %v3300_v21 }
0x12a7   : > { %4589 = vmatpush3.bf16.msra.mxu1 %v4588_v44 }
0x12a8   : > { %4593 = vmatprep.subr.bf16.mxu1 %v5117_v34 }
0x1332   : > { %v3302_v12 = vpop.xlane.xlu1 %3301 }
0x1333   : > { %v3309_v27 = vmul.f32 0.03125, %v3302_v12 }
0x1335   : > { %v3312_v62 = vsub.f32 %v6175_v33, %v3309_v27 }
0x1337   : > { %v3315_v42 = vmul.f32 %v3312_v62, %v3312_v62 }
0x1339   : > { %v3318_v28 = vsel %vm445_vm3, %v3315_v42, 0.0 }
0x133a   : > { %3319 = vadd.xlane.f32.xlu0 %v3318_v28 }
0x1367   : > { %v3278_v14 = vpop.f32.mrb[64].mxu0 }
0x1368   : > { %v3288_v30 = vadd.f32 %v3278_v14, %v5842_v3  ;;  %v4450_v46 = vpop.f32.mrb[65].mxu0  ;;  %v3937_v3 = vld [vmem:[%s6287_s1 + $0xf] ss:$0 sm:$0xff] }
0x136a   : > { %v3296_v47 = vadd.f32 %v3936_v24, %v3288_v30 }
0x136c   : > { %v3283_v45 = vpop.f32.mrb[66].mxu0  ;;  %v3303_v49 = vsel %vm445_vm3, %v3296_v47, 0.0 }
0x136d   : > { %v3289_v51 = vadd.f32 %v3283_v45, %v5847_v10  ;;  %3304 = vadd.xlane.f32.xlu0 %v3303_v49  ;;  %v4453_v16 = vpop.f32.mrb[67].mxu0  ;;  %v3938_v10 = vld [vmem:[%s6287_s1 + $0x10] ss:$0 sm:$0xff] }
0x136f   : > { %v3297_v38 = vadd.f32 %v3936_v24, %v3289_v51 }
0x1371   : > { %v3306_v52 = vsel %vm452_vm1, %v3297_v38, 0.0 }
0x1372   : > { %3307 = vadd.xlane.f32.xlu1 %v3306_v52 }
0x13c7   : > { %v3320_v55 = vpop.xlane.xlu0 %3319 }
0x13c8   : > { %v3327_v56 = vmul.f32 0.03125, %v3320_v55 }
0x13ca   : > { %v3330_v18 = vadd.f32 1e-05, %v3327_v56 }
0x13cc   : > { %4905 = vrsqrt.f32 %v3330_v18 }
0x13d6   : > { %v4906_v54 = vpop.eup %4905 }
0x13d7   : > { %v3336_v59 = vmul.f32 %v4906_v54, %v3312_v62 }
0x13d9   : > { %v3343_v35 = vmul.f32 %v3937_v3, %v3336_v59  ;;  %v3630_v59 = vld [vmem:[#allocation8] sm:$0xff] }
0x13db   : > { %v3350_v50 = vadd.f32 %v3938_v10, %v3343_v35 }
0x13dd   : > { %4463 = vmatmul.mubr.msk.f32.vlgmr.msra.gmra.mrb[66].mxu1 %vm445_vm3, %v3350_v50  ;;  %v3632_v50 = vld [vmem:[#allocation8 + $0x10] sm:$0xff] }
0x13de   : > { %4465 = vmatprep.mubr.msk.f32.mxu1 %vm5118_vm4, %v5119_v37 }
0x13fa   : > { %v3305_v5 = vpop.xlane.xlu0 %3304 }
0x13fb   : > { %v3310_v7 = vmul.f32 0.03125, %v3305_v5  ;;  %v3633_v5 = vld [vmem:[#allocation8 + $0x18] sm:$0xff] }
0x13fd   : > { %v3313_v58 = vsub.f32 %v3296_v47, %v3310_v7  ;;  %v4597_v7 = vpack.c.bf16 %v3633_v5, %v3632_v50 }
0x13ff   : > { %v3308_v60 = vpop.xlane.xlu1 %3307  ;;  %v3316_v8 = vmul.f32 %v3313_v58, %v3313_v58 }
0x1400   : > { %v3311_v53 = vmul.f32 0.03125, %v3308_v60 }
0x1401   : > { %v3321_v61 = vsel %vm445_vm3, %v3316_v8, 0.0 }
0x1402   : > { %v3314_v48 = vsub.f32 %v3297_v38, %v3311_v53  ;;  %3322 = vadd.xlane.f32.xlu0 %v3321_v61 }
0x1404   : > { %v3317_v57 = vmul.f32 %v3314_v48, %v3314_v48 }
0x1406   : > { %v3324_v4 = vsel %vm452_vm1, %v3317_v57, 0.0 }
0x1407   : > { %3325 = vadd.xlane.f32.xlu1 %v3324_v4 }
0x148f   : > { %v3323_v15 = vpop.xlane.xlu0 %3322 }
0x1490   : > { %v3328_v0 = vmul.f32 0.03125, %v3323_v15 }
0x1492   : > { %v3331_v6 = vadd.f32 1e-05, %v3328_v0 }
0x1494   : > { %4907 = vrsqrt.f32 %v3331_v6  ;;  %v3326_v36 = vpop.xlane.xlu1 %3325 }
0x1495   : > { %v3329_v17 = vmul.f32 0.03125, %v3326_v36 }
0x1497   : > { %v3332_v19 = vadd.f32 1e-05, %v3329_v17 }
0x1499   : > { %4909 = vrsqrt.f32 %v3332_v19 }
0x149e   : > { %v4908_v41 = vpop.eup %4907 }
0x149f   : > { %v3337_v20 = vmul.f32 %v4908_v41, %v3313_v58 }
0x14a1   : > { %v3344_v11 = vmul.f32 %v3937_v3, %v3337_v20 }
0x14a3   : > { %v4910_v43 = vpop.eup %4909  ;;  %v3351_v23 = vadd.f32 %v3938_v10, %v3344_v11 }
0x14a4   : > { %v3338_v25 = vmul.f32 %v4910_v43, %v3314_v48 }
0x14a5   : > { %4466 = vmatmul.mubr.msk.f32.gmra.mrb[68].mxu1 %vm445_vm3, %v3351_v23 }
0x14a6   : > { %4468 = vmatprep.mubr.msk.f32.mxu1 %vm5118_vm4, %v5119_v37  ;;  %v3345_v26 = vmul.f32 %v3937_v3, %v3338_v25 }
0x14a8   : > { %v3352_v24 = vadd.f32 %v3938_v10, %v3345_v26  ;;  %v3631_v10 = vld [vmem:[#allocation8 + $0x8] sm:$0xff] }
0x14a9   : > { %v4594_v35 = vpack.c.bf16 %v3631_v10, %v3630_v59 }
0x14aa   : > { %4469 = vmatmul.mubr.msk.f32.gmra.mrb[70].mxu1 %vm445_vm3, %v3352_v24 }
0x14ab   : > { %4492 = vmatprep.mubr.msk.f32.mxu1 %vm5118_vm4, %v5119_v37  ;;  %4595 = vmatpush3.bf16.msra.mxu1 %v4594_v35  ;;  %v3950_v35 = vld [vmem:[%s6287_s1 + $0x12] ss:$0 sm:$0xff] }
0x14ac   : > { %4596 = vmatprep.subr.bf16.mxu1 %v5117_v34 }
0x14af   : > { %4598 = vmatpush3.bf16.msra.mxu1 %v4597_v7 }
0x14b0   : > { %v3438_v32 = vpop.f32.mrb[66].mxu1 }
0x14b1   : > { %v3439_v21 = vadd.f32 %v3943_v22, %v3438_v32  ;;  %v4464_v12 = vpop.f32.mrb[67].mxu1 }
0x14b3   : > { %v3455_v27 = vmul.f32 0.70710677, %v3439_v21  ;;  %v3452_v18 = vmul.f32 0.5, %v3439_v21 }
0x14b5   : > { %v3464_v62 = vand.u32 2147483647, %v3455_v27  ;;  %vm3458_vm13 = vcmp.ge.f32.partialorder %v3455_v27, 0.0 }
0x14b6   : > { %v3461_v55 = vsel %vm3458_vm13, 1.0, %v5134_v29 }
0x14b7   : > { %v3467_v42 = vmul.f32 0.3275911, %v3464_v62  ;;  %v3506_v2 = vsub.f32 0.0, %v3464_v62 }
0x14b9   : > { %v3470_v28 = vadd.f32 1.0, %v3467_v42  ;;  %v3509_v31 = vmul.f32 %v3506_v2, %v3464_v62 }
0x14bb   : > { %4911 = vrcp.f32 %v3470_v28  ;;  %v3512_v44 = vmul.f32 1.442695, %v3509_v31 }
0x14bd   : > { %4913 = vpow2.f32 %v3512_v44 }
0x14c5   : > { %v4912_v63 = vpop.eup %4911 }
0x14c6   : > { %v3479_v40 = vmul.f32 1.0614054, %v4912_v63 }
0x14c7   : > { %v4914_v16 = vpop.eup %4913 }
0x14c8   : > { %v3482_v39 = vadd.f32 -1.4531521, %v3479_v40 }
0x14ca   : > { %v3485_v14 = vmul.f32 %v4912_v63, %v3482_v39 }
0x14cc   : > { %v3488_v30 = vadd.f32 1.4214138, %v3485_v14 }
0x14ce   : > { %v3491_v46 = vmul.f32 %v4912_v63, %v3488_v30 }
0x14d0   : > { %v3494_v47 = vadd.f32 -0.28449672, %v3491_v46 }
0x14d2   : > { %v3497_v45 = vmul.f32 %v4912_v63, %v3494_v47 }
0x14d4   : > { %v3500_v49 = vadd.f32 0.2548296, %v3497_v45 }
0x14d6   : > { %v3503_v51 = vmul.f32 %v4912_v63, %v3500_v49 }
0x14d8   : > { %v3518_v38 = vmul.f32 %v4914_v16, %v3503_v51 }
0x14da   : > { %v3521_v52 = vsub.f32 1.0, %v3518_v38 }
0x14dc   : > { %v3524_v56 = vmul.f32 %v3521_v52, %v3461_v55 }
0x14de   : > { %v3527_v54 = vadd.f32 1.0, %v3524_v56 }
0x14e0   : > { %v3530_v3 = vmul.f32 %v3527_v54, %v3452_v18 }
0x14e2   : > { %4476 = vmatmul.mubr.msk.f32.vlgmr.msra.gmra.mrb[68].mxu0 %vm1593_vm8, %v3530_v3 }
0x14e3   : > { %4478 = vmatprep.mubr.msk.f32.mxu0 %vm5118_vm4, %v5119_v37 }
0x1578   : > { %v3443_v58 = vpop.f32.mrb[68].mxu1 }
0x1579   : > { %v3444_v60 = vadd.f32 %v3943_v22, %v3443_v58  ;;  %v4467_v8 = vpop.f32.mrb[69].mxu1 }
0x157a   : > { %v3634_v8 = vld [vmem:[%s6287_s1 + $0x2] sm:$0x1] }
0x157b   : > { %v3456_v53 = vmul.f32 0.70710677, %v3444_v60  ;;  %v3453_v16 = vmul.f32 0.5, %v3444_v60 }
0x157d   : > { %v3465_v61 = vand.u32 2147483647, %v3456_v53  ;;  %v3448_v48 = vpop.f32.mrb[70].mxu1  ;;  %vm3459_vm14 = vcmp.ge.f32.partialorder %v3456_v53, 0.0 }
0x157e   : > { %v3449_v57 = vadd.f32 %v3943_v22, %v3448_v48  ;;  %v4470_v4 = vpop.f32.mrb[71].mxu1  ;;  %v3462_v46 = vsel %vm3459_vm14, 1.0, %v5134_v29 }
0x157f   : > { %v3468_v9 = vmul.f32 0.3275911, %v3465_v61  ;;  %v3507_v34 = vsub.f32 0.0, %v3465_v61 }
0x1580   : > { %v3457_v1 = vmul.f32 0.70710677, %v3449_v57  ;;  %v3454_v54 = vmul.f32 0.5, %v3449_v57 }
0x1581   : > { %v3471_v13 = vadd.f32 1.0, %v3468_v9  ;;  %v3510_v17 = vmul.f32 %v3507_v34, %v3465_v61 }
0x1582   : > { %v3466_v15 = vand.u32 2147483647, %v3457_v1  ;;  %vm3460_vm15 = vcmp.ge.f32.partialorder %v3457_v1, 0.0 }
0x1583   : > { %4915 = vrcp.f32 %v3471_v13  ;;  %v3514_v11 = vmul.f32 1.442695, %v3510_v17  ;;  %v3463_v56 = vsel %vm3460_vm15, 1.0, %v5134_v29 }
0x1584   : > { %v3469_v0 = vmul.f32 0.3275911, %v3466_v15  ;;  %v3508_v41 = vsub.f32 0.0, %v3466_v15 }
0x1586   : > { %v3472_v6 = vadd.f32 1.0, %v3469_v0  ;;  %v3511_v25 = vmul.f32 %v3508_v41, %v3466_v15 }
0x1588   : > { %4917 = vrcp.f32 %v3472_v6  ;;  %v3516_v21 = vmul.f32 1.442695, %v3511_v25 }
0x1589   : > { %4919 = vpow2.f32 %v3514_v11 }
0x158a   : > { %4921 = vpow2.f32 %v3516_v21 }
0x158d   : > { %v4916_v36 = vpop.eup %4915 }
0x158e   : > { %v3480_v19 = vmul.f32 1.0614054, %v4916_v36 }
0x1590   : > { %v3483_v20 = vadd.f32 -1.4531521, %v3480_v19 }
0x1592   : > { %v4918_v43 = vpop.eup %4917  ;;  %v3486_v23 = vmul.f32 %v4916_v36, %v3483_v20 }
0x1593   : > { %v3481_v26 = vmul.f32 1.0614054, %v4918_v43  ;;  %v4920_v40 = vpop.eup %4919 }
0x1594   : > { %v3489_v24 = vadd.f32 1.4214138, %v3486_v23  ;;  %v4922_v45 = vpop.eup %4921 }
0x1595   : > { %v3484_v22 = vadd.f32 -1.4531521, %v3481_v26 }
0x1596   : > { %v3492_v32 = vmul.f32 %v4916_v36, %v3489_v24 }
0x1597   : > { %v3487_v12 = vmul.f32 %v4918_v43, %v3484_v22 }
0x1598   : > { %v3495_v27 = vadd.f32 -0.28449672, %v3492_v32 }
0x1599   : > { %v3490_v62 = vadd.f32 1.4214138, %v3487_v12 }
0x159a   : > { %v3498_v42 = vmul.f32 %v4916_v36, %v3495_v27 }
0x159b   : > { %v3493_v28 = vmul.f32 %v4918_v43, %v3490_v62 }
0x159c   : > { %v3501_v2 = vadd.f32 0.2548296, %v3498_v42 }
0x159d   : > { %v3496_v63 = vadd.f32 -0.28449672, %v3493_v28 }
0x159e   : > { %v3504_v31 = vmul.f32 %v4916_v36, %v3501_v2 }
0x159f   : > { %v3499_v39 = vmul.f32 %v4918_v43, %v3496_v63 }
0x15a0   : > { %v3519_v44 = vmul.f32 %v4920_v40, %v3504_v31 }
0x15a1   : > { %v3502_v14 = vadd.f32 0.2548296, %v3499_v39 }
0x15a2   : > { %v3522_v30 = vsub.f32 1.0, %v3519_v44 }
0x15a3   : > { %v3505_v47 = vmul.f32 %v4918_v43, %v3502_v14 }
0x15a4   : > { %v3525_v49 = vmul.f32 %v3522_v30, %v3462_v46 }
0x15a5   : > { %v3520_v51 = vmul.f32 %v4922_v45, %v3505_v47 }
0x15a6   : > { %v3528_v38 = vadd.f32 1.0, %v3525_v49 }
0x15a7   : > { %v3523_v52 = vsub.f32 1.0, %v3520_v51 }
0x15a8   : > { %v3531_v55 = vmul.f32 %v3528_v38, %v3453_v16 }
0x15a9   : > { %v3526_v18 = vmul.f32 %v3523_v52, %v3463_v56 }
0x15aa   : > { %4479 = vmatmul.mubr.msk.f32.gmra.mrb[70].mxu0 %vm1593_vm8, %v3531_v55 }
0x15ab   : > { %v3529_v3 = vadd.f32 1.0, %v3526_v18  ;;  %4481 = vmatprep.mubr.msk.f32.mxu0 %vm5118_vm4, %v5119_v37 }
0x15ad   : > { %v3532_v59 = vmul.f32 %v3529_v3, %v3454_v54 }
0x15af   : > { %4482 = vmatmul.mubr.msk.f32.gmra.mrb[72].mxu0 %vm1593_vm8, %v3532_v59 }
0x15b5   : > { %v3611_v10 = vpop.f32.mrb[68].mxu0 }
0x15b6   : > { %v3623_v29 = vadd.f32 %v3611_v10, %v6175_v33  ;;  %v4477_v50 = vpop.f32.mrb[69].mxu0 }
0x15b8   : > { %v3629_v5 = vadd.f32 %v3950_v35, %v3623_v29 }
0x15ba   : > { %4493 = vmatmul.mubr.msk.f32.vlgmr.msra.gmra.mrb[72].mxu1 %vm445_vm3, %v3629_v5 }
0x167d   : > { %v3616_v7 = vpop.f32.mrb[70].mxu0 }
0x167e   : > { %v4480_v58 = vpop.f32.mrb[71].mxu0 }
0x1682   : > { %v3620_v60 = vpop.f32.mrb[72].mxu0 }
0x1683   : > { %v4483_v37 = vpop.f32.mrb[73].mxu0 }
0x168d   : > { %v3704_v33 = vpop.f32.mrb[72].mxu1 }
0x168e   : > { %v3705_v53 = vadd.f32 %v3704_v33, %v3634_v8  ;;  %v4494_v61 = vpop.f32.mrb[73].mxu1 }
0x1690   : > { %3708 = vst [vmem:[%s339_s10] sm:$0x1] %v3705_v53 }
0x1691   : > { %5048 = shalt.err (!%p5045_p5)
}
0x1692   : > { %s5049_s12 = scalar_lea.hbm %s6244_s29, 16  ;;  %s5053_s23 = scalar_lea.hbm %s6294_s8, 32 }
0x1693   : > { %p5050_p0 = scmp.ne.s32.totalorder %s6244_s29, %s5049_s12  ;;  %p5054_p3 = scmp.lt.u32.totalorder %s6244_s29, %s6294_s8 }
0x1694   : > { %p5055_p4 = scmp.lt.u32.totalorder %s5053_s23, %s5049_s12  ;;  %p5057_p7 = scmp.lt.u32.totalorder %s5049_s12, %s6244_s29 }
0x1695   : > { %p5051_p10 = pnand %p5050_p0, %p6337_p8 }
0x1696   : > { %p5056_p12 = por %p5055_p4, %p5054_p3 }
0x1697   : > { %p5052_p2 = pneg %p5051_p10 }
0x1698   : > { %p5058_p11 = por %p5057_p7, %p5056_p12 }
0x169a   : > { %p5059_p13 = pnand %p5058_p11, %p5052_p2 }
0x169c   : > { %5062 = shalt.err (!%p5059_p13)
}
0x169d   : > { %4615 = dma.vmem_to_hbm [thread:$0]  (%p6337_p8), %s6246_s11, 16, %s6244_s29, %s3710_s18  }
0x169e PF: > { %s6338_s24 = sld [smem:[#allocation18_spill]]  ;;  %p4642_p1 = scmp.ge.s32.totalorder %s5109_s30, 2 }
0x169f   : > { %s3734_s10 = sand.u32 1, %s5097_s27  }
0x16a0   : > { %s3735_s17 = scalar_lea.sflag [#allocation4], %s3734_s10 }
0x16a4   : > { %p6339_p6 = scmp.ne.s32.totalorder %s6338_s24, 0 }
0x16a6   : > { %p4631_p9 = pnand %p4642_p1, %p6339_p6 }
0x16a8   : > { %5092 = dma.done.wait (!%p4631_p9), %s3735_s17, 16  }
0x16a9   : > { %5094 = vsyncadd (!%p4631_p9), %s3735_s17, 4294967280  ;;  %s6340_s30 = sld [smem:[#allocation16_spill]]  ;;  %s6341_s20 = sld [smem:[#allocation15_spill]] }
0x16aa   : > { %s6342_s29 = sld [smem:[#allocation17_spill]]  ;;  %s6343_s27 = smov %s5101_s28 }
0x16af   : > { %p21_p5 = scmp.ge.s32.totalorder %s6340_s30, 4   ;;  %s6344_s28 = smov %s6341_s20 }
0x16b1   :  { %23 = sbr.rel (!%p21_p5) target bundleno = 6 (0x6), region = 106 }
0x16b8   :  { %3739 = vsyncpa [#allocation3], 1 }
0x16b9   :  { %3741 = vsyncpa [#allocation3 + $0x1], 1 }
0x16ba   :  { %3742 = vsyncpa [#allocation6], 1 }
0x16bb   :  { %3743 = vsyncpa [#allocation9], 1 }
0x16bc   :  { %3744 = vsyncpa [#allocation4], 1 }
0x16bd   :  { %3746 = vsyncpa [#allocation4 + $0x1], 1 }

</bundles_post_ra>
